<compile_context>
chip_gen: v6e
topology: v6e:2x2x1
jax: 0.10.0
libtpu: 0.0.40
codegen_flags: <defaults>
</compile_context>

<pallas_src>
import functools
import math

import jax
import jax.numpy as jnp
from jax.experimental import pallas as pl
from jax.experimental.pallas import tpu as pltpu


# ------------------------------------------------------------------ helpers --

def _round_up(x, m):
    return ((x + m - 1) // m) * m


# 64 MiB scoped VMEM: <= physical on v5e/v6e (128 MiB) and v7x (64 MiB).
# Actual tile footprints below stay <= ~20 MiB, so this is safe on all gens.
_VMEM_LIMIT = 64 * 1024 * 1024


# --------------------------------------------------- fused norm/residual GEMM --

def _linear_kernel(*refs, has_norm, has_res):
    """x[, scale, gamma], w[, residual], out, acc. bf16 MXU, f32 accumulate."""
    i = 0
    x_ref = refs[i]; i += 1
    if has_norm:
        s_ref = refs[i]; g_ref = refs[i + 1]; i += 2
    w_ref = refs[i]; i += 1
    if has_res:
        r_ref = refs[i]; i += 1
    o_ref = refs[i]; acc_ref = refs[i + 1]

    @pl.when(pl.program_id(2) == 0)
    def _init():
        acc_ref[...] = jnp.zeros_like(acc_ref)

    x = x_ref[...]
    if has_norm:
        # RMSNorm fused into the matmul prologue: x * inv_rms(row) * gamma.
        x = (x.astype(jnp.float32) * s_ref[...] * g_ref[...].astype(jnp.float32))
    x = x.astype(w_ref.dtype)
    acc_ref[...] += jnp.dot(x, w_ref[...], preferred_element_type=jnp.float32)

    @pl.when(pl.program_id(2) == pl.num_programs(2) - 1)
    def _store():
        out = acc_ref[...]
        if has_res:
            out = out + r_ref[...].astype(jnp.float32)   # fused residual add
        o_ref[...] = out.astype(o_ref.dtype)


def linear(x, w, *, scale=None, gamma=None, residual=None, out_dtype=None,
           tm=512, tn=1024, tk=512):
    """y = [(x * scale * gamma)] @ w [+ residual].  x:[M,K], w:[K,N]."""
    M, K = x.shape
    K2, N = w.shape
    assert K == K2
    has_norm = scale is not None
    has_res = residual is not None
    if has_norm:
        assert gamma is not None
    out_dtype = out_dtype or x.dtype

    tm = min(tm, _round_up(M, 8))
    tk = min(tk, _round_up(K, 128))
    tn = min(tn, _round_up(N, 128))
    Mp, Kp, Np = _round_up(M, tm), _round_up(K, tk), _round_up(N, tn)

    xp = x if (Mp, Kp) == (M, K) else jnp.pad(x, ((0, Mp - M), (0, Kp - K)))
    wp = w if (Kp, Np) == (K, N) else jnp.pad(w, ((0, Kp - K), (0, Np - N)))

    inputs = [xp]
    in_specs = [pl.BlockSpec((tm, tk), lambda i, j, k: (i, k))]
    if has_norm:
        sp = scale if Mp == M else jnp.pad(scale, ((0, Mp - M), (0, 0)))
        gp = gamma.reshape(1, K)
        gp = gp if Kp == K else jnp.pad(gp, ((0, 0), (0, Kp - K)))
        inputs += [sp, gp]
        in_specs += [pl.BlockSpec((tm, 1), lambda i, j, k: (i, 0)),
                     pl.BlockSpec((1, tk), lambda i, j, k: (0, k))]
    inputs.append(wp)
    in_specs.append(pl.BlockSpec((tk, tn), lambda i, j, k: (k, j)))
    if has_res:
        rp = residual if (Mp, Np) == (M, N) else jnp.pad(
            residual, ((0, Mp - M), (0, Np - N)))
        inputs.append(rp)
        in_specs.append(pl.BlockSpec((tm, tn), lambda i, j, k: (i, j)))

    out = pl.pallas_call(
        functools.partial(_linear_kernel, has_norm=has_norm, has_res=has_res),
        out_shape=jax.ShapeDtypeStruct((Mp, Np), out_dtype),
        grid=(Mp // tm, Np // tn, Kp // tk),
        in_specs=in_specs,
        out_specs=pl.BlockSpec((tm, tn), lambda i, j, k: (i, j)),
        scratch_shapes=[pltpu.VMEM((tm, tn), jnp.float32)],
        compiler_params=pltpu.CompilerParams(
            dimension_semantics=("parallel", "parallel", "arbitrary"),
            vmem_limit_bytes=_VMEM_LIMIT,
        ),
    )(*inputs)
    return out[:M, :N] if (Mp, Np) != (M, N) else out


# ------------------------------------- fused norm + gate/up matmul + SwiGLU --

def _gateup_swiglu_kernel(x_ref, s_ref, g_ref, wg_ref, wu_ref, o_ref,
                          accg_ref, accu_ref):
    @pl.when(pl.program_id(2) == 0)
    def _init():
        accg_ref[...] = jnp.zeros_like(accg_ref)
        accu_ref[...] = jnp.zeros_like(accu_ref)

    x = (x_ref[...].astype(jnp.float32) * s_ref[...]
         * g_ref[...].astype(jnp.float32)).astype(wg_ref.dtype)
    accg_ref[...] += jnp.dot(x, wg_ref[...], preferred_element_type=jnp.float32)
    accu_ref[...] += jnp.dot(x, wu_ref[...], preferred_element_type=jnp.float32)

    @pl.when(pl.program_id(2) == pl.num_programs(2) - 1)
    def _store():
        g = accg_ref[...]
        o_ref[...] = (g * jax.nn.sigmoid(g) * accu_ref[...]).astype(o_ref.dtype)


def gateup_swiglu(x, scale, gamma, wg, wu, *, tm=512, tn=1024, tk=512):
    """silu((xn) @ wg) * ((xn) @ wu) with xn = x * scale * gamma, fused."""
    M, K = x.shape
    K2, F = wg.shape
    assert K == K2 and wu.shape == (K, F)
    tm = min(tm, _round_up(M, 8))
    tk = min(tk, _round_up(K, 128))
    tn = min(tn, _round_up(F, 128))
    Mp, Kp, Fp = _round_up(M, tm), _round_up(K, tk), _round_up(F, tn)

    xp = x if (Mp, Kp) == (M, K) else jnp.pad(x, ((0, Mp - M), (0, Kp - K)))
    sp = scale if Mp == M else jnp.pad(scale, ((0, Mp - M), (0, 0)))
    gp = gamma.reshape(1, K)
    gp = gp if Kp == K else jnp.pad(gp, ((0, 0), (0, Kp - K)))
    wgp = wg if (Kp, Fp) == (K, F) else jnp.pad(wg, ((0, Kp - K), (0, Fp - F)))
    wup = wu if (Kp, Fp) == (K, F) else jnp.pad(wu, ((0, Kp - K), (0, Fp - F)))

    out = pl.pallas_call(
        _gateup_swiglu_kernel,
        out_shape=jax.ShapeDtypeStruct((Mp, Fp), x.dtype),
        grid=(Mp // tm, Fp // tn, Kp // tk),
        in_specs=[
            pl.BlockSpec((tm, tk), lambda i, j, k: (i, k)),
            pl.BlockSpec((tm, 1), lambda i, j, k: (i, 0)),
            pl.BlockSpec((1, tk), lambda i, j, k: (0, k)),
            pl.BlockSpec((tk, tn), lambda i, j, k: (k, j)),
            pl.BlockSpec((tk, tn), lambda i, j, k: (k, j)),
        ],
        out_specs=pl.BlockSpec((tm, tn), lambda i, j, k: (i, j)),
        scratch_shapes=[pltpu.VMEM((tm, tn), jnp.float32),
                        pltpu.VMEM((tm, tn), jnp.float32)],
        compiler_params=pltpu.CompilerParams(
            dimension_semantics=("parallel", "parallel", "arbitrary"),
            vmem_limit_bytes=_VMEM_LIMIT,
        ),
    )(xp, sp, gp, wgp, wup)
    return out[:M, :F] if (Mp, Fp) != (M, F) else out


# --------------------------------------------------------- per-row RMS scale --

def _rms_scale_kernel(x_ref, o_ref, *, eps):
    x = x_ref[...].astype(jnp.float32)
    var = jnp.mean(x * x, axis=-1, keepdims=True)
    o_ref[...] = jax.lax.rsqrt(var + eps)


def rms_scale(x, eps=1e-5, *, tm=512):
    """Per-row 1/rms of x:[M,D] -> [M,1] f32 (consumed by fused-norm matmuls)."""
    M, D = x.shape
    tm = min(tm, _round_up(M, 8))
    Mp = _round_up(M, tm)
    xp = x if Mp == M else jnp.pad(x, ((0, Mp - M), (0, 0)))
    out = pl.pallas_call(
        functools.partial(_rms_scale_kernel, eps=eps),
        out_shape=jax.ShapeDtypeStruct((Mp, 1), jnp.float32),
        grid=(Mp // tm,),
        in_specs=[pl.BlockSpec((tm, D), lambda i: (i, 0))],
        out_specs=pl.BlockSpec((tm, 1), lambda i: (i, 0)),
        compiler_params=pltpu.CompilerParams(
            dimension_semantics=("parallel",),
            vmem_limit_bytes=_VMEM_LIMIT,
        ),
    )(xp)
    return out[:M] if Mp != M else out


# -------------------------------------- flash causal GQA attention (+ RoPE) --

def _rope_rotate(x, cos, sin):
    """HF-style rotate_half RoPE, using the XLU (pltpu.roll) instead of concat."""
    d = x.shape[-1]
    half = d // 2
    rolled = pltpu.roll(x, shift=half, axis=1)        # [x2, x1]
    col = jax.lax.broadcasted_iota(jnp.int32, x.shape, 1)
    rot = jnp.where(col < half, -rolled, rolled)      # [-x2, x1]
    return x * cos + rot * sin


def _k_rope_kernel(k_ref, cos_ref, sin_ref, o_ref):
    k = k_ref[0].astype(jnp.float32)
    o_ref[0] = _rope_rotate(k, cos_ref[...], sin_ref[...]).astype(o_ref.dtype)


def _flash_attn_kernel(q_ref, k_ref, v_ref, cq_ref, sq_ref, o_ref,
                       q_sc, m_sc, l_sc, acc_sc, *, scale, tq, tk):
    qi = pl.program_id(3)
    ki = pl.program_id(4)
    n_kv = pl.num_programs(4)

    @pl.when(ki == 0)
    def _init():
        # Q RoPE + scale hoisted out of the kv loop: computed once per q block.
        q = _rope_rotate(q_ref[0].astype(jnp.float32),
                         cq_ref[...], sq_ref[...]) * scale
        q_sc[...] = q.astype(q_sc.dtype)
        m_sc[...] = jnp.full_like(m_sc, -jnp.inf)
        l_sc[...] = jnp.zeros_like(l_sc)
        acc_sc[...] = jnp.zeros_like(acc_sc)

    q_start = qi * tq
    k_start = ki * tk

    # Skip KV blocks that are entirely above the causal diagonal (DMA for these
    # is also skipped via the clamped K/V index maps in the caller).
    @pl.when(q_start + (tq - 1) >= k_start)
    def _compute():
        q = q_sc[...]                           # bf16, rotated + scaled
        k = k_ref[0]                            # bf16, already rotated
        s = jax.lax.dot_general(q, k, (((1,), (1,)), ((), ())),
                                preferred_element_type=jnp.float32)   # [tq, tk]
        row = q_start + jax.lax.broadcasted_iota(jnp.int32, (tq, tk), 0)
        col = k_start + jax.lax.broadcasted_iota(jnp.int32, (tq, tk), 1)
        s = jnp.where(row >= col, s, -1e30)

        m_prev = m_sc[...]
        m_new = jnp.maximum(m_prev, jnp.max(s, axis=-1, keepdims=True))
        alpha = jnp.exp(m_prev - m_new)
        p = jnp.exp(s - m_new)
        l_sc[...] = alpha * l_sc[...] + jnp.sum(p, axis=-1, keepdims=True)
        acc_sc[...] = alpha * acc_sc[...] + jnp.dot(
            p.astype(v_ref.dtype), v_ref[0], preferred_element_type=jnp.float32)
        m_sc[...] = m_new

    @pl.when(ki == n_kv - 1)
    def _finalize():
        o_ref[0] = (acc_sc[...] *
                    pl.reciprocal(l_sc[...], approx=True)).astype(o_ref.dtype)


def flash_attention_gqa(qkv, cos, sin, *, n_heads, n_kv_heads, head_dim,
                        block_q=256):
    """qkv: [B, S, (H + 2*KVH) * Dh] packed (q heads | k heads | v heads).

    Returns attention output [B, S, H * Dh]. No HBM head transposes: per-head
    views are expressed as 128-wide lane blocks via BlockSpec index maps.
    """
    B, S, packed = qkv.shape
    H, KVH, Dh = n_heads, n_kv_heads, head_dim
    assert packed == (H + 2 * KVH) * Dh
    assert H % KVH == 0
    group = H // KVH
    assert Dh % 128 == 0, "head_dim must be a multiple of 128 for packed-QKV blocking"

    tile = min(block_q, _round_up(S, 8))
    Sp = _round_up(S, tile)
    if Sp != S:
        qkv = jnp.pad(qkv, ((0, 0), (0, Sp - S), (0, 0)))
        cos = jnp.pad(cos, ((0, Sp - S), (0, 0)))
        sin = jnp.pad(sin, ((0, Sp - S), (0, 0)))
    tq = tk = tile
    n_q = n_kv = Sp // tile
    scale = 1.0 / math.sqrt(Dh)

    # K RoPE applied once per layer (removes group*n_q redundant rotations and
    # the ck/sk DMA streams from the attention inner loop).
    k_rot = pl.pallas_call(
        _k_rope_kernel,
        out_shape=jax.ShapeDtypeStruct((B, Sp, KVH * Dh), qkv.dtype),
        grid=(B, KVH, n_kv),
        in_specs=[
            pl.BlockSpec((1, tk, Dh), lambda b, kvh, si: (b, si, H + kvh)),
            pl.BlockSpec((tk, Dh), lambda b, kvh, si: (si, 0)),
            pl.BlockSpec((tk, Dh), lambda b, kvh, si: (si, 0)),
        ],
        out_specs=pl.BlockSpec((1, tk, Dh), lambda b, kvh, si: (b, si, kvh)),
        compiler_params=pltpu.CompilerParams(
            dimension_semantics=("parallel", "parallel", "parallel"),
            vmem_limit_bytes=_VMEM_LIMIT,
        ),
    )(qkv, cos, sin)

    # Causal clamp: blocks with ki > qi are fully masked — map them to the
    # block already resident in VMEM so Pallas does not re-DMA K/V for them.
    def k_map(b, kvh, g, qi, ki):
        return (b, jnp.minimum(ki, qi), kvh)

    def v_map(b, kvh, g, qi, ki):
        return (b, jnp.minimum(ki, qi), H + KVH + kvh)

    out = pl.pallas_call(
        functools.partial(_flash_attn_kernel, scale=scale, tq=tq, tk=tk),
        out_shape=jax.ShapeDtypeStruct((B, Sp, H * Dh), qkv.dtype),
        grid=(B, KVH, group, n_q, n_kv),
        in_specs=[
            # Q head = kvh*group + g (packed lane block in qkv)
            pl.BlockSpec((1, tq, Dh),
                         lambda b, kvh, g, qi, ki: (b, qi, kvh * group + g)),
            # K from the pre-rotated k_rot tensor
            pl.BlockSpec((1, tk, Dh), k_map),
            # V from the packed qkv tensor
            pl.BlockSpec((1, tk, Dh), v_map),
            # RoPE tables for the Q rows of this block (only read at ki==0;
            # constant block index across ki so no re-DMA).
            pl.BlockSpec((tq, Dh), lambda b, kvh, g, qi, ki: (qi, 0)),
            pl.BlockSpec((tq, Dh), lambda b, kvh, g, qi, ki: (qi, 0)),
        ],
        out_specs=pl.BlockSpec(
            (1, tq, Dh), lambda b, kvh, g, qi, ki: (b, qi, kvh * group + g)),
        scratch_shapes=[
            pltpu.VMEM((tq, Dh), qkv.dtype),     # rotated+scaled Q (MXU dtype)
            pltpu.VMEM((tq, 1), jnp.float32),    # running max
            pltpu.VMEM((tq, 1), jnp.float32),    # running denom
            pltpu.VMEM((tq, Dh), jnp.float32),   # output accumulator
        ],
        compiler_params=pltpu.CompilerParams(
            dimension_semantics=("parallel", "parallel", "parallel",
                                 "parallel", "arbitrary"),
            vmem_limit_bytes=_VMEM_LIMIT,
        ),
    )(qkv, k_rot, qkv, cos, sin)
    return out[:, :S] if Sp != S else out


# --------------------------------------------------------------------- glue --

def rope_cos_sin(positions, head_dim, theta=1_000_000.0):
    # Mistral-NeMo uses rope_theta = 1e6.
    half = head_dim // 2
    inv_freq = 1.0 / (theta ** (jnp.arange(0, half, dtype=jnp.float32) / half))
    freqs = positions.astype(jnp.float32)[:, None] * inv_freq[None, :]   # [S, half]
    emb = jnp.concatenate([freqs, freqs], axis=-1)                       # [S, Dh]
    return jnp.cos(emb), jnp.sin(emb)


def init_params(key, *, vocab, d_model, n_layers, n_heads, n_kv_heads,
                head_dim, ffn_dim, dtype=jnp.bfloat16):
    keys = iter(jax.random.split(key, 4 + 8 * n_layers))

    def dense(k, fan_in, fan_out):
        return (jax.random.normal(k, (fan_in, fan_out), jnp.float32)
                * 0.02).astype(dtype)

    params = {
        "embed": (jax.random.normal(next(keys), (vocab, d_model), jnp.float32)
                  * 0.02).astype(dtype),
        "final_norm": jnp.ones((d_model,), dtype),
        "lm_head": dense(next(keys), d_model, vocab),
        "layers": [],
    }
    for _ in range(n_layers):
        wq = dense(next(keys), d_model, n_heads * head_dim)
        wk = dense(next(keys), d_model, n_kv_heads * head_dim)
        wv = dense(next(keys), d_model, n_kv_heads * head_dim)
        params["layers"].append({
            "attn_norm": jnp.ones((d_model,), dtype),
            "ffn_norm": jnp.ones((d_model,), dtype),
            # Fused QKV projection weight: [D, (H + 2*KVH) * Dh]
            "wqkv": jnp.concatenate([wq, wk, wv], axis=1),
            "wo": dense(next(keys), n_heads * head_dim, d_model),
            "w_gate": dense(next(keys), d_model, ffn_dim),
            "w_up": dense(next(keys), d_model, ffn_dim),
            "w_down": dense(next(keys), ffn_dim, d_model),
        })
    return params


def mistral_upsampler_forward(params, tokens, *, n_heads, n_kv_heads, head_dim,
                              input_pos=None, token_embeddings=None,
                              rope_theta=1_000_000.0, norm_eps=1e-5,
                              logits_dtype=jnp.float32):
    """Matches T2WTransformer.forward: returns logits [B, S, vocab]."""
    if token_embeddings is None:
        h = params["embed"][tokens]                 # [B, S, D] (gather glue)
    else:
        h = token_embeddings
    B, S, D = h.shape
    if input_pos is None:
        input_pos = jnp.arange(S)
    cos, sin = rope_cos_sin(input_pos, head_dim, theta=rope_theta)   # [S, Dh] f32

    H, KVH, Dh = n_heads, n_kv_heads, head_dim
    h2d = h.reshape(B * S, D)
    for layer in params["layers"]:
        # ---- attention block: RMSNorm fused into the QKV matmul prologue ----
        s_attn = rms_scale(h2d, eps=norm_eps)                         # [M,1] f32
        qkv = linear(h2d, layer["wqkv"], scale=s_attn, gamma=layer["attn_norm"])
        qkv = qkv.reshape(B, S, (H + 2 * KVH) * Dh)
        attn = flash_attention_gqa(qkv, cos, sin, n_heads=H,
                                   n_kv_heads=KVH, head_dim=Dh)   # [B, S, H*Dh]
        attn = attn.reshape(B * S, H * Dh)
        # residual add fused into the wo matmul epilogue
        h2d = linear(attn, layer["wo"], residual=h2d)

        # ---- SwiGLU MLP: norm fused into gate/up, residual into down ----
        s_ffn = rms_scale(h2d, eps=norm_eps)
        act = gateup_swiglu(h2d, s_ffn, layer["ffn_norm"],
                            layer["w_gate"], layer["w_up"])
        h2d = linear(act, layer["w_down"], residual=h2d)

    # ---- final norm fused into the lm_head prologue; lane-dense vocab tiles ----
    s_final = rms_scale(h2d, eps=norm_eps)
    logits = linear(h2d, params["lm_head"], scale=s_final,
                    gamma=params["final_norm"], tn=2048, out_dtype=logits_dtype)
    vocab = params["lm_head"].shape[1]
    return logits.reshape(B, S, vocab)


# --------------------------------------------------------------------- main --

if __name__ == "__main__":
    # Small, shape-consistent config (the real model is a Mistral-NeMo LLM with
    # D=5120, head_dim=128, 32 q / 8 kv heads, FFN=14336, vocab~131k).
    VOCAB = 512
    D_MODEL = 256
    N_LAYERS = 2
    N_HEADS = 2
    N_KV_HEADS = 1          # grouped-query attention
    HEAD_DIM = 128          # Mistral-NeMo head_dim
    FFN_DIM = 512
    BATCH = 2
    SEQ = 16

    key = jax.random.PRNGKey(0)
    pkey, tkey = jax.random.split(key)

    params = init_params(
        pkey, vocab=VOCAB, d_model=D_MODEL, n_layers=N_LAYERS,
        n_heads=N_HEADS, n_kv_heads=N_KV_HEADS, head_dim=HEAD_DIM,
        ffn_dim=FFN_DIM,
    )
    tokens = jax.random.randint(tkey, (BATCH, SEQ), 0, VOCAB, dtype=jnp.int32)
    input_pos = jnp.arange(SEQ)

    fwd = jax.jit(functools.partial(
        mistral_upsampler_forward,
        n_heads=N_HEADS, n_kv_heads=N_KV_HEADS, head_dim=HEAD_DIM))

    logits = fwd(params, tokens, input_pos=input_pos)
    logits = jax.block_until_ready(logits)

    assert logits.shape == (BATCH, SEQ, VOCAB), logits.shape
    assert logits.dtype == jnp.float32
    assert bool(jnp.all(jnp.isfinite(logits)))

    # TODO(synk): autoregressive `generate` (KV-cache decode + top-k/top-p
    # sampling loop) is host-side control flow and is not part of forward().
    print("KERNEL_OK")
</pallas_src>

<mosaic_0001>
module attributes {stable_mosaic.version = 11 : i64} {
  func.func @_rms_scale_kernel(%arg0: i32, %arg1: memref<32x256xbf16, #tpu.memory_space<vmem>>, %arg2: memref<32x1xf32, #tpu.memory_space<vmem>>) attributes {dimension_semantics = [#tpu.dimension_semantics<parallel>], iteration_bounds = array<i64: 1>, scalar_prefetch = 0 : i64, scratch_operands = 0 : i64, tpu.core_type = #tpu.core_type<tc>, window_params = [{transform_indices = @transform_0, window_bounds = array<i64: 32, 256>}, {transform_indices = @transform_1, window_bounds = array<i64: 32, 1>}]} {
    %c0 = arith.constant 0 : index
    %c0_0 = arith.constant 0 : index
    %0 = vector.load %arg1[%c0, %c0_0] : memref<32x256xbf16, #tpu.memory_space<vmem>>, vector<32x256xbf16>
    %1 = arith.extf %0 : vector<32x256xbf16> to vector<32x256xf32>
    %2 = arith.mulf %1, %1 : vector<32x256xf32>
    %cst = arith.constant dense<0.000000e+00> : vector<32xf32>
    %3 = vector.multi_reduction <add>, %2, %cst [1] : vector<32x256xf32> to vector<32xf32>
    %4 = vector.shape_cast %3 : vector<32xf32> to vector<32x1xf32>
    %cst_1 = arith.constant 2.560000e+02 : f32
    %5 = vector.broadcast %cst_1 : f32 to vector<32x1xf32>
    %6 = arith.divf %4, %5 : vector<32x1xf32>
    %cst_2 = arith.constant 9.99999974E-6 : f32
    %7 = vector.broadcast %cst_2 : f32 to vector<32x1xf32>
    %8 = arith.addf %6, %7 : vector<32x1xf32>
    %9 = math.rsqrt %8 : vector<32x1xf32>
    %c0_3 = arith.constant 0 : index
    %c0_4 = arith.constant 0 : index
    %10 = vector.load %arg2[%c0_3, %c0_4] : memref<32x1xf32, #tpu.memory_space<vmem>>, vector<32x1xf32>
    tpu.vector_store %arg2[%c0_3, %c0_4], %9 {strides = array<i32>} : memref<32x1xf32, #tpu.memory_space<vmem>>, vector<32x1xf32>,
    return
  }
  func.func @transform_0(%arg0: i32) -> (i32, i32) {
    %c0_i32 = arith.constant 0 : i32
    %c0_i32_0 = arith.constant 0 : i32
    return %arg0, %c0_i32 : i32, i32
  }
  func.func @transform_1(%arg0: i32) -> (i32, i32) {
    %c0_i32 = arith.constant 0 : i32
    %c0_i32_0 = arith.constant 0 : i32
    return %arg0, %c0_i32 : i32, i32
  }
}

module attributes {stable_mosaic.version = 11 : i64} {
  func.func @_linear_kernel(%arg0: i32, %arg1: i32, %arg2: i32, %arg3: memref<32x256xbf16, #tpu.memory_space<vmem>>, %arg4: memref<32x1xf32, #tpu.memory_space<vmem>>, %arg5: memref<1x256xbf16, #tpu.memory_space<vmem>>, %arg6: memref<256x512xbf16, #tpu.memory_space<vmem>>, %arg7: memref<32x512xbf16, #tpu.memory_space<vmem>>, %arg8: memref<32x512xf32, #tpu.memory_space<vmem>>) attributes {dimension_semantics = [#tpu.dimension_semantics<parallel>, #tpu.dimension_semantics<parallel>, #tpu.dimension_semantics<arbitrary>], iteration_bounds = array<i64: 1, 1, 1>, scalar_prefetch = 0 : i64, scratch_operands = 1 : i64, tpu.core_type = #tpu.core_type<tc>, window_params = [{transform_indices = @transform_0, window_bounds = array<i64: 32, 256>}, {transform_indices = @transform_1, window_bounds = array<i64: 32, 1>}, {transform_indices = @transform_2, window_bounds = array<i64: 1, 256>}, {transform_indices = @transform_3, window_bounds = array<i64: 256, 512>}, {transform_indices = @transform_4, window_bounds = array<i64: 32, 512>}]} {
    %c0_i32 = arith.constant 0 : i32
    %0 = arith.cmpi eq, %arg2, %c0_i32 : i32
    %1 = arith.extui %0 : i1 to i32
    %c0_i32_0 = arith.constant 0 : i32
    %2 = arith.cmpi ne, %1, %c0_i32_0 : i32
    scf.if %2 {
      %cst_14 = arith.constant 0.000000e+00 : f32
      %21 = vector.broadcast %cst_14 : f32 to vector<32x512xf32>
      %c0_15 = arith.constant 0 : index
      %c0_16 = arith.constant 0 : index
      %22 = vector.load %arg8[%c0_15, %c0_16] : memref<32x512xf32, #tpu.memory_space<vmem>>, vector<32x512xf32>
      tpu.vector_store %arg8[%c0_15, %c0_16], %21 {strides = array<i32>} : memref<32x512xf32, #tpu.memory_space<vmem>>, vector<32x512xf32>,
    } else {
    }
    %c0 = arith.constant 0 : index
    %c0_1 = arith.constant 0 : index
    %3 = vector.load %arg3[%c0, %c0_1] : memref<32x256xbf16, #tpu.memory_space<vmem>>, vector<32x256xbf16>
    %4 = arith.extf %3 : vector<32x256xbf16> to vector<32x256xf32>
    %c0_2 = arith.constant 0 : index
    %c0_3 = arith.constant 0 : index
    %5 = vector.load %arg4[%c0_2, %c0_3] : memref<32x1xf32, #tpu.memory_space<vmem>>, vector<32x1xf32>
    %6 = vector.broadcast %5 : vector<32x1xf32> to vector<32x256xf32>
    %7 = arith.mulf %4, %6 : vector<32x256xf32>
    %c0_4 = arith.constant 0 : index
    %c0_5 = arith.constant 0 : index
    %8 = vector.load %arg5[%c0_4, %c0_5] : memref<1x256xbf16, #tpu.memory_space<vmem>>, vector<1x256xbf16>
    %9 = arith.extf %8 : vector<1x256xbf16> to vector<1x256xf32>
    %10 = vector.broadcast %9 : vector<1x256xf32> to vector<32x256xf32>
    %11 = arith.mulf %7, %10 : vector<32x256xf32>
    %12 = arith.truncf %11 : vector<32x256xf32> to vector<32x256xbf16>
    %c0_6 = arith.constant 0 : index
    %c0_7 = arith.constant 0 : index
    %13 = vector.load %arg8[%c0_6, %c0_7] : memref<32x512xf32, #tpu.memory_space<vmem>>, vector<32x512xf32>
    %c0_8 = arith.constant 0 : index
    %c0_9 = arith.constant 0 : index
    %14 = vector.load %arg6[%c0_8, %c0_9] : memref<256x512xbf16, #tpu.memory_space<vmem>>, vector<256x512xbf16>
    %cst = arith.constant dense<0.000000e+00> : vector<32x512xf32>
    %15 = tpu.matmul %12, %14, %cst {dimension_numbers = #tpu.dot_dimension_numbers<[1], [0], [0], [1], [0, 0, 1, 1], [], []>} : vector<32x256xbf16>, vector<256x512xbf16>, vector<32x512xf32> -> vector<32x512xf32>
    %16 = arith.addf %13, %15 : vector<32x512xf32>
    %c0_10 = arith.constant 0 : index
    %c0_11 = arith.constant 0 : index
    %17 = vector.load %arg8[%c0_10, %c0_11] : memref<32x512xf32, #tpu.memory_space<vmem>>, vector<32x512xf32>
    tpu.vector_store %arg8[%c0_10, %c0_11], %16 {strides = array<i32>} : memref<32x512xf32, #tpu.memory_space<vmem>>, vector<32x512xf32>,
    %c0_i32_12 = arith.constant 0 : i32
    %18 = arith.cmpi eq, %arg2, %c0_i32_12 : i32
    %19 = arith.extui %18 : i1 to i32
    %c0_i32_13 = arith.constant 0 : i32
    %20 = arith.cmpi ne, %19, %c0_i32_13 : i32
    scf.if %20 {
      %c0_14 = arith.constant 0 : index
      %c0_15 = arith.constant 0 : index
      %21 = vector.load %arg8[%c0_14, %c0_15] : memref<32x512xf32, #tpu.memory_space<vmem>>, vector<32x512xf32>
      %22 = arith.truncf %21 : vector<32x512xf32> to vector<32x512xbf16>
      %c0_16 = arith.constant 0 : index
      %c0_17 = arith.constant 0 : index
      %23 = vector.load %arg7[%c0_16, %c0_17] : memref<32x512xbf16, #tpu.memory_space<vmem>>, vector<32x512xbf16>
      tpu.vector_store %arg7[%c0_16, %c0_17], %22 {strides = array<i32>} : memref<32x512xbf16, #tpu.memory_space<vmem>>, vector<32x512xbf16>,
    } else {
    }
    return
  }
  func.func @transform_0(%arg0: i32, %arg1: i32, %arg2: i32) -> (i32, i32) {
    %c0_i32 = arith.constant 0 : i32
    return %arg0, %arg2 : i32, i32
  }
  func.func @transform_1(%arg0: i32, %arg1: i32, %arg2: i32) -> (i32, i32) {
    %c0_i32 = arith.constant 0 : i32
    %c0_i32_0 = arith.constant 0 : i32
    return %arg0, %c0_i32 : i32, i32
  }
  func.func @transform_2(%arg0: i32, %arg1: i32, %arg2: i32) -> (i32, i32) {
    %c0_i32 = arith.constant 0 : i32
    %c0_i32_0 = arith.constant 0 : i32
    return %c0_i32, %arg2 : i32, i32
  }
  func.func @transform_3(%arg0: i32, %arg1: i32, %arg2: i32) -> (i32, i32) {
    %c0_i32 = arith.constant 0 : i32
    return %arg2, %arg1 : i32, i32
  }
  func.func @transform_4(%arg0: i32, %arg1: i32, %arg2: i32) -> (i32, i32) {
    %c0_i32 = arith.constant 0 : i32
    return %arg0, %arg1 : i32, i32
  }
}

module attributes {stable_mosaic.version = 11 : i64} {
  func.func @_k_rope_kernel(%arg0: i32, %arg1: i32, %arg2: i32, %arg3: memref<1x16x128xbf16, #tpu.memory_space<vmem>>, %arg4: memref<16x128xf32, #tpu.memory_space<vmem>>, %arg5: memref<16x128xf32, #tpu.memory_space<vmem>>, %arg6: memref<1x16x128xbf16, #tpu.memory_space<vmem>>) attributes {dimension_semantics = [#tpu.dimension_semantics<parallel>, #tpu.dimension_semantics<parallel>, #tpu.dimension_semantics<parallel>], iteration_bounds = array<i64: 2, 1, 1>, scalar_prefetch = 0 : i64, scratch_operands = 0 : i64, tpu.core_type = #tpu.core_type<tc>, window_params = [{transform_indices = @transform_0, window_bounds = array<i64: 1, 16, 128>}, {transform_indices = @transform_1, window_bounds = array<i64: 16, 128>}, {transform_indices = @transform_2, window_bounds = array<i64: 16, 128>}, {transform_indices = @transform_3, window_bounds = array<i64: 1, 16, 128>}]} {
    %c0 = arith.constant 0 : index
    %c0_0 = arith.constant 0 : index
    %c0_1 = arith.constant 0 : index
    %0 = vector.load %arg3[%c0, %c0_0, %c0_1] : memref<1x16x128xbf16, #tpu.memory_space<vmem>>, vector<1x16x128xbf16>
    %1 = vector.shape_cast %0 : vector<1x16x128xbf16> to vector<16x128xbf16>
    %2 = arith.extf %1 : vector<16x128xbf16> to vector<16x128xf32>
    %c0_2 = arith.constant 0 : index
    %c0_3 = arith.constant 0 : index
    %3 = vector.load %arg4[%c0_2, %c0_3] : memref<16x128xf32, #tpu.memory_space<vmem>>, vector<16x128xf32>
    %c0_4 = arith.constant 0 : index
    %c0_5 = arith.constant 0 : index
    %4 = vector.load %arg5[%c0_4, %c0_5] : memref<16x128xf32, #tpu.memory_space<vmem>>, vector<16x128xf32>
    %c64_i32 = arith.constant 64 : i32
    %5 = tpu.dynamic_rotate %2 by %c64_i32 dim 1 : vector<16x128xf32>, i32 -> vector<16x128xf32>
    %6 = tpu.iota {dimensions = array<i32: 1>} : vector<16x128xi32>
    %c64_i32_6 = arith.constant 64 : i32
    %7 = vector.broadcast %c64_i32_6 : i32 to vector<16x128xi32>
    %8 = arith.cmpi slt, %6, %7 : vector<16x128xi32>
    %cst = arith.constant 0.000000e+00 : f32
    %9 = vector.broadcast %cst : f32 to vector<16x128xf32>
    %10 = arith.subf %9, %5 : vector<16x128xf32>
    %11 = arith.select %8, %10, %5 : vector<16x128xi1>, vector<16x128xf32>
    %12 = arith.mulf %2, %3 : vector<16x128xf32>
    %13 = arith.mulf %11, %4 : vector<16x128xf32>
    %14 = arith.addf %12, %13 : vector<16x128xf32>
    %15 = arith.truncf %14 : vector<16x128xf32> to vector<16x128xbf16>
    %c0_7 = arith.constant 0 : index
    %c0_8 = arith.constant 0 : index
    %c0_9 = arith.constant 0 : index
    %16 = vector.load %arg6[%c0_7, %c0_8, %c0_9] : memref<1x16x128xbf16, #tpu.memory_space<vmem>>, vector<1x16x128xbf16>
    %17 = vector.shape_cast %16 : vector<1x16x128xbf16> to vector<16x128xbf16>
    %18 = vector.shape_cast %15 : vector<16x128xbf16> to vector<1x16x128xbf16>
    tpu.vector_store %arg6[%c0_7, %c0_8, %c0_9], %18 {strides = array<i32>} : memref<1x16x128xbf16, #tpu.memory_space<vmem>>, vector<1x16x128xbf16>,
    return
  }
  func.func @transform_0(%arg0: i32, %arg1: i32, %arg2: i32) -> (i32, i32, i32) {
    %c2_i32 = arith.constant 2 : i32
    %0 = arith.addi %c2_i32, %arg1 : i32
    %c0_i32 = arith.constant 0 : i32
    return %arg0, %arg2, %0 : i32, i32, i32
  }
  func.func @transform_1(%arg0: i32, %arg1: i32, %arg2: i32) -> (i32, i32) {
    %c0_i32 = arith.constant 0 : i32
    %c0_i32_0 = arith.constant 0 : i32
    return %arg2, %c0_i32 : i32, i32
  }
  func.func @transform_2(%arg0: i32, %arg1: i32, %arg2: i32) -> (i32, i32) {
    %c0_i32 = arith.constant 0 : i32
    %c0_i32_0 = arith.constant 0 : i32
    return %arg2, %c0_i32 : i32, i32
  }
  func.func @transform_3(%arg0: i32, %arg1: i32, %arg2: i32) -> (i32, i32, i32) {
    %c0_i32 = arith.constant 0 : i32
    return %arg0, %arg2, %arg1 : i32, i32, i32
  }
}

module attributes {stable_mosaic.version = 11 : i64} {
  func.func @_flash_attn_kernel(%arg0: i32, %arg1: i32, %arg2: i32, %arg3: i32, %arg4: i32, %arg5: memref<1x16x128xbf16, #tpu.memory_space<vmem>>, %arg6: memref<1x16x128xbf16, #tpu.memory_space<vmem>>, %arg7: memref<1x16x128xbf16, #tpu.memory_space<vmem>>, %arg8: memref<16x128xf32, #tpu.memory_space<vmem>>, %arg9: memref<16x128xf32, #tpu.memory_space<vmem>>, %arg10: memref<1x16x128xbf16, #tpu.memory_space<vmem>>, %arg11: memref<16x128xbf16, #tpu.memory_space<vmem>>, %arg12: memref<16x1xf32, #tpu.memory_space<vmem>>, %arg13: memref<16x1xf32, #tpu.memory_space<vmem>>, %arg14: memref<16x128xf32, #tpu.memory_space<vmem>>) attributes {dimension_semantics = [#tpu.dimension_semantics<parallel>, #tpu.dimension_semantics<parallel>, #tpu.dimension_semantics<parallel>, #tpu.dimension_semantics<parallel>, #tpu.dimension_semantics<arbitrary>], iteration_bounds = array<i64: 2, 1, 2, 1, 1>, scalar_prefetch = 0 : i64, scratch_operands = 4 : i64, tpu.core_type = #tpu.core_type<tc>, window_params = [{transform_indices = @transform_0, window_bounds = array<i64: 1, 16, 128>}, {transform_indices = @transform_1, window_bounds = array<i64: 1, 16, 128>}, {transform_indices = @transform_2, window_bounds = array<i64: 1, 16, 128>}, {transform_indices = @transform_3, window_bounds = array<i64: 16, 128>}, {transform_indices = @transform_4, window_bounds = array<i64: 16, 128>}, {transform_indices = @transform_5, window_bounds = array<i64: 1, 16, 128>}]} {
    %c0_i32 = arith.constant 0 : i32
    %0 = arith.cmpi eq, %arg4, %c0_i32 : i32
    %1 = arith.extui %0 : i1 to i32
    %c0_i32_0 = arith.constant 0 : i32
    %2 = arith.cmpi ne, %1, %c0_i32_0 : i32
    scf.if %2 {
      %c0 = arith.constant 0 : index
      %c0_5 = arith.constant 0 : index
      %c0_6 = arith.constant 0 : index
      %12 = vector.load %arg5[%c0, %c0_5, %c0_6] : memref<1x16x128xbf16, #tpu.memory_space<vmem>>, vector<1x16x128xbf16>
      %13 = vector.shape_cast %12 : vector<1x16x128xbf16> to vector<16x128xbf16>
      %14 = arith.extf %13 : vector<16x128xbf16> to vector<16x128xf32>
      %c0_7 = arith.constant 0 : index
      %c0_8 = arith.constant 0 : index
      %15 = vector.load %arg8[%c0_7, %c0_8] : memref<16x128xf32, #tpu.memory_space<vmem>>, vector<16x128xf32>
      %c0_9 = arith.constant 0 : index
      %c0_10 = arith.constant 0 : index
      %16 = vector.load %arg9[%c0_9, %c0_10] : memref<16x128xf32, #tpu.memory_space<vmem>>, vector<16x128xf32>
      %c64_i32 = arith.constant 64 : i32
      %17 = tpu.dynamic_rotate %14 by %c64_i32 dim 1 : vector<16x128xf32>, i32 -> vector<16x128xf32>
      %18 = tpu.iota {dimensions = array<i32: 1>} : vector<16x128xi32>
      %c64_i32_11 = arith.constant 64 : i32
      %19 = vector.broadcast %c64_i32_11 : i32 to vector<16x128xi32>
      %20 = arith.cmpi slt, %18, %19 : vector<16x128xi32>
      %cst = arith.constant 0.000000e+00 : f32
      %21 = vector.broadcast %cst : f32 to vector<16x128xf32>
      %22 = arith.subf %21, %17 : vector<16x128xf32>
      %23 = arith.select %20, %22, %17 : vector<16x128xi1>, vector<16x128xf32>
      %24 = arith.mulf %14, %15 : vector<16x128xf32>
      %25 = arith.mulf %23, %16 : vector<16x128xf32>
      %26 = arith.addf %24, %25 : vector<16x128xf32>
      %cst_12 = arith.constant 0.0883883461 : f32
      %27 = vector.broadcast %cst_12 : f32 to vector<16x128xf32>
      %28 = arith.mulf %26, %27 : vector<16x128xf32>
      %29 = arith.truncf %28 : vector<16x128xf32> to vector<16x128xbf16>
      %c0_13 = arith.constant 0 : index
      %c0_14 = arith.constant 0 : index
      %30 = vector.load %arg11[%c0_13, %c0_14] : memref<16x128xbf16, #tpu.memory_space<vmem>>, vector<16x128xbf16>
      tpu.vector_store %arg11[%c0_13, %c0_14], %29 {strides = array<i32>} : memref<16x128xbf16, #tpu.memory_space<vmem>>, vector<16x128xbf16>,
      %cst_15 = arith.constant 0xFF800000 : f32
      %31 = vector.broadcast %cst_15 : f32 to vector<16x1xf32>
      %c0_16 = arith.constant 0 : index
      %c0_17 = arith.constant 0 : index
      %32 = vector.load %arg12[%c0_16, %c0_17] : memref<16x1xf32, #tpu.memory_space<vmem>>, vector<16x1xf32>
      tpu.vector_store %arg12[%c0_16, %c0_17], %31 {strides = array<i32>} : memref<16x1xf32, #tpu.memory_space<vmem>>, vector<16x1xf32>,
      %cst_18 = arith.constant 0.000000e+00 : f32
      %33 = vector.broadcast %cst_18 : f32 to vector<16x1xf32>
      %c0_19 = arith.constant 0 : index
      %c0_20 = arith.constant 0 : index
      %34 = vector.load %arg13[%c0_19, %c0_20] : memref<16x1xf32, #tpu.memory_space<vmem>>, vector<16x1xf32>
      tpu.vector_store %arg13[%c0_19, %c0_20], %33 {strides = array<i32>} : memref<16x1xf32, #tpu.memory_space<vmem>>, vector<16x1xf32>,
      %cst_21 = arith.constant 0.000000e+00 : f32
      %35 = vector.broadcast %cst_21 : f32 to vector<16x128xf32>
      %c0_22 = arith.constant 0 : index
      %c0_23 = arith.constant 0 : index
      %36 = vector.load %arg14[%c0_22, %c0_23] : memref<16x128xf32, #tpu.memory_space<vmem>>, vector<16x128xf32>
      tpu.vector_store %arg14[%c0_22, %c0_23], %35 {strides = array<i32>} : memref<16x128xf32, #tpu.memory_space<vmem>>, vector<16x128xf32>,
    } else {
    }
    %c16_i32 = arith.constant 16 : i32
    %3 = arith.muli %arg3, %c16_i32 : i32
    %c16_i32_1 = arith.constant 16 : i32
    %4 = arith.muli %arg4, %c16_i32_1 : i32
    %c15_i32 = arith.constant 15 : i32
    %5 = arith.addi %3, %c15_i32 : i32
    %6 = arith.cmpi sge, %5, %4 : i32
    %7 = arith.extui %6 : i1 to i32
    %c0_i32_2 = arith.constant 0 : i32
    %8 = arith.cmpi ne, %7, %c0_i32_2 : i32
    scf.if %8 {
      %c0 = arith.constant 0 : index
      %c0_5 = arith.constant 0 : index
      %12 = vector.load %arg11[%c0, %c0_5] : memref<16x128xbf16, #tpu.memory_space<vmem>>, vector<16x128xbf16>
      %c0_6 = arith.constant 0 : index
      %c0_7 = arith.constant 0 : index
      %c0_8 = arith.constant 0 : index
      %13 = vector.load %arg6[%c0_6, %c0_7, %c0_8] : memref<1x16x128xbf16, #tpu.memory_space<vmem>>, vector<1x16x128xbf16>
      %14 = vector.shape_cast %13 : vector<1x16x128xbf16> to vector<16x128xbf16>
      %cst = arith.constant dense<0.000000e+00> : vector<16x16xf32>
      %15 = tpu.matmul %12, %14, %cst {dimension_numbers = #tpu.dot_dimension_numbers<[1], [1], [0], [0], [0, 0, 1, 0], [], []>} : vector<16x128xbf16>, vector<16x128xbf16>, vector<16x16xf32> -> vector<16x16xf32>
      %16 = tpu.iota {dimensions = array<i32: 0>} : vector<16x16xi32>
      %17 = vector.broadcast %3 : i32 to vector<16x16xi32>
      %18 = arith.addi %17, %16 : vector<16x16xi32>
      %19 = tpu.iota {dimensions = array<i32: 1>} : vector<16x16xi32>
      %20 = vector.broadcast %4 : i32 to vector<16x16xi32>
      %21 = arith.addi %20, %19 : vector<16x16xi32>
      %22 = arith.cmpi sge, %18, %21 : vector<16x16xi32>
      %cst_9 = arith.constant -1.000000e+30 : f32
      %23 = vector.broadcast %cst_9 : f32 to vector<16x16xf32>
      %24 = arith.select %22, %15, %23 : vector<16x16xi1>, vector<16x16xf32>
      %c0_10 = arith.constant 0 : index
      %c0_11 = arith.constant 0 : index
      %25 = vector.load %arg12[%c0_10, %c0_11] : memref<16x1xf32, #tpu.memory_space<vmem>>, vector<16x1xf32>
      %cst_12 = arith.constant dense<0xFF800000> : vector<16xf32>
      %26 = vector.multi_reduction <maximumf>, %24, %cst_12 [1] : vector<16x16xf32> to vector<16xf32>
      %27 = vector.shape_cast %26 : vector<16xf32> to vector<16x1xf32>
      %28 = arith.maximumf %25, %27 : vector<16x1xf32>
      %29 = arith.subf %25, %28 : vector<16x1xf32>
      %30 = math.exp %29 : vector<16x1xf32>
      %31 = vector.broadcast %28 : vector<16x1xf32> to vector<16x16xf32>
      %32 = arith.subf %24, %31 : vector<16x16xf32>
      %33 = math.exp %32 : vector<16x16xf32>
      %c0_13 = arith.constant 0 : index
      %c0_14 = arith.constant 0 : index
      %34 = vector.load %arg13[%c0_13, %c0_14] : memref<16x1xf32, #tpu.memory_space<vmem>>, vector<16x1xf32>
      %35 = arith.mulf %30, %34 : vector<16x1xf32>
      %cst_15 = arith.constant dense<0.000000e+00> : vector<16xf32>
      %36 = vector.multi_reduction <add>, %33, %cst_15 [1] : vector<16x16xf32> to vector<16xf32>
      %37 = vector.shape_cast %36 : vector<16xf32> to vector<16x1xf32>
      %38 = arith.addf %35, %37 : vector<16x1xf32>
      %c0_16 = arith.constant 0 : index
      %c0_17 = arith.constant 0 : index
      %39 = vector.load %arg13[%c0_16, %c0_17] : memref<16x1xf32, #tpu.memory_space<vmem>>, vector<16x1xf32>
      tpu.vector_store %arg13[%c0_16, %c0_17], %38 {strides = array<i32>} : memref<16x1xf32, #tpu.memory_space<vmem>>, vector<16x1xf32>,
      %c0_18 = arith.constant 0 : index
      %c0_19 = arith.constant 0 : index
      %40 = vector.load %arg14[%c0_18, %c0_19] : memref<16x128xf32, #tpu.memory_space<vmem>>, vector<16x128xf32>
      %41 = vector.broadcast %30 : vector<16x1xf32> to vector<16x128xf32>
      %42 = arith.mulf %41, %40 : vector<16x128xf32>
      %43 = arith.truncf %33 : vector<16x16xf32> to vector<16x16xbf16>
      %c0_20 = arith.constant 0 : index
      %c0_21 = arith.constant 0 : index
      %c0_22 = arith.constant 0 : index
      %44 = vector.load %arg7[%c0_20, %c0_21, %c0_22] : memref<1x16x128xbf16, #tpu.memory_space<vmem>>, vector<1x16x128xbf16>
      %45 = vector.shape_cast %44 : vector<1x16x128xbf16> to vector<16x128xbf16>
      %cst_23 = arith.constant dense<0.000000e+00> : vector<16x128xf32>
      %46 = tpu.matmul %43, %45, %cst_23 {dimension_numbers = #tpu.dot_dimension_numbers<[1], [0], [0], [1], [0, 0, 1, 1], [], []>} : vector<16x16xbf16>, vector<16x128xbf16>, vector<16x128xf32> -> vector<16x128xf32>
      %47 = arith.addf %42, %46 : vector<16x128xf32>
      %c0_24 = arith.constant 0 : index
      %c0_25 = arith.constant 0 : index
      %48 = vector.load %arg14[%c0_24, %c0_25] : memref<16x128xf32, #tpu.memory_space<vmem>>, vector<16x128xf32>
      tpu.vector_store %arg14[%c0_24, %c0_25], %47 {strides = array<i32>} : memref<16x128xf32, #tpu.memory_space<vmem>>, vector<16x128xf32>,
      %c0_26 = arith.constant 0 : index
      %c0_27 = arith.constant 0 : index
      %49 = vector.load %arg12[%c0_26, %c0_27] : memref<16x1xf32, #tpu.memory_space<vmem>>, vector<16x1xf32>
      tpu.vector_store %arg12[%c0_26, %c0_27], %28 {strides = array<i32>} : memref<16x1xf32, #tpu.memory_space<vmem>>, vector<16x1xf32>,
    } else {
    }
    %c0_i32_3 = arith.constant 0 : i32
    %9 = arith.cmpi eq, %arg4, %c0_i32_3 : i32
    %10 = arith.extui %9 : i1 to i32
    %c0_i32_4 = arith.constant 0 : i32
    %11 = arith.cmpi ne, %10, %c0_i32_4 : i32
    scf.if %11 {
      %c0 = arith.constant 0 : index
      %c0_5 = arith.constant 0 : index
      %12 = vector.load %arg14[%c0, %c0_5] : memref<16x128xf32, #tpu.memory_space<vmem>>, vector<16x128xf32>
      %c0_6 = arith.constant 0 : index
      %c0_7 = arith.constant 0 : index
      %13 = vector.load %arg13[%c0_6, %c0_7] : memref<16x1xf32, #tpu.memory_space<vmem>>, vector<16x1xf32>
      %14 = tpu.reciprocal %13 {approx = true} : vector<16x1xf32> -> vector<16x1xf32>
      %15 = vector.broadcast %14 : vector<16x1xf32> to vector<16x128xf32>
      %16 = arith.mulf %12, %15 : vector<16x128xf32>
      %17 = arith.truncf %16 : vector<16x128xf32> to vector<16x128xbf16>
      %c0_8 = arith.constant 0 : index
      %c0_9 = arith.constant 0 : index
      %c0_10 = arith.constant 0 : index
      %18 = vector.load %arg10[%c0_8, %c0_9, %c0_10] : memref<1x16x128xbf16, #tpu.memory_space<vmem>>, vector<1x16x128xbf16>
      %19 = vector.shape_cast %18 : vector<1x16x128xbf16> to vector<16x128xbf16>
      %20 = vector.shape_cast %17 : vector<16x128xbf16> to vector<1x16x128xbf16>
      tpu.vector_store %arg10[%c0_8, %c0_9, %c0_10], %20 {strides = array<i32>} : memref<1x16x128xbf16, #tpu.memory_space<vmem>>, vector<1x16x128xbf16>,
    } else {
    }
    return
  }
  func.func @transform_0(%arg0: i32, %arg1: i32, %arg2: i32, %arg3: i32, %arg4: i32) -> (i32, i32, i32) {
    %c2_i32 = arith.constant 2 : i32
    %0 = arith.muli %arg1, %c2_i32 : i32
    %1 = arith.addi %0, %arg2 : i32
    %c0_i32 = arith.constant 0 : i32
    return %arg0, %arg3, %1 : i32, i32, i32
  }
  func.func @transform_1(%arg0: i32, %arg1: i32, %arg2: i32, %arg3: i32, %arg4: i32) -> (i32, i32, i32) {
    %0 = arith.minsi %arg4, %arg3 : i32
    %c0_i32 = arith.constant 0 : i32
    return %arg0, %0, %arg1 : i32, i32, i32
  }
  func.func @transform_2(%arg0: i32, %arg1: i32, %arg2: i32, %arg3: i32, %arg4: i32) -> (i32, i32, i32) {
    %0 = arith.minsi %arg4, %arg3 : i32
    %c3_i32 = arith.constant 3 : i32
    %1 = arith.addi %c3_i32, %arg1 : i32
    %c0_i32 = arith.constant 0 : i32
    return %arg0, %0, %1 : i32, i32, i32
  }
  func.func @transform_3(%arg0: i32, %arg1: i32, %arg2: i32, %arg3: i32, %arg4: i32) -> (i32, i32) {
    %c0_i32 = arith.constant 0 : i32
    %c0_i32_0 = arith.constant 0 : i32
    return %arg3, %c0_i32 : i32, i32
  }
  func.func @transform_4(%arg0: i32, %arg1: i32, %arg2: i32, %arg3: i32, %arg4: i32) -> (i32, i32) {
    %c0_i32 = arith.constant 0 : i32
    %c0_i32_0 = arith.constant 0 : i32
    return %arg3, %c0_i32 : i32, i32
  }
  func.func @transform_5(%arg0: i32, %arg1: i32, %arg2: i32, %arg3: i32, %arg4: i32) -> (i32, i32, i32) {
    %c2_i32 = arith.constant 2 : i32
    %0 = arith.muli %arg1, %c2_i32 : i32
    %1 = arith.addi %0, %arg2 : i32
    %c0_i32 = arith.constant 0 : i32
    return %arg0, %arg3, %1 : i32, i32, i32
  }
}

module attributes {stable_mosaic.version = 11 : i64} {
  func.func @_linear_kernel(%arg0: i32, %arg1: i32, %arg2: i32, %arg3: memref<32x256xbf16, #tpu.memory_space<vmem>>, %arg4: memref<256x256xbf16, #tpu.memory_space<vmem>>, %arg5: memref<32x256xbf16, #tpu.memory_space<vmem>>, %arg6: memref<32x256xbf16, #tpu.memory_space<vmem>>, %arg7: memref<32x256xf32, #tpu.memory_space<vmem>>) attributes {dimension_semantics = [#tpu.dimension_semantics<parallel>, #tpu.dimension_semantics<parallel>, #tpu.dimension_semantics<arbitrary>], iteration_bounds = array<i64: 1, 1, 1>, scalar_prefetch = 0 : i64, scratch_operands = 1 : i64, tpu.core_type = #tpu.core_type<tc>, window_params = [{transform_indices = @transform_0, window_bounds = array<i64: 32, 256>}, {transform_indices = @transform_1, window_bounds = array<i64: 256, 256>}, {transform_indices = @transform_2, window_bounds = array<i64: 32, 256>}, {transform_indices = @transform_3, window_bounds = array<i64: 32, 256>}]} {
    %c0_i32 = arith.constant 0 : i32
    %0 = arith.cmpi eq, %arg2, %c0_i32 : i32
    %1 = arith.extui %0 : i1 to i32
    %c0_i32_0 = arith.constant 0 : i32
    %2 = arith.cmpi ne, %1, %c0_i32_0 : i32
    scf.if %2 {
      %cst_10 = arith.constant 0.000000e+00 : f32
      %12 = vector.broadcast %cst_10 : f32 to vector<32x256xf32>
      %c0_11 = arith.constant 0 : index
      %c0_12 = arith.constant 0 : index
      %13 = vector.load %arg7[%c0_11, %c0_12] : memref<32x256xf32, #tpu.memory_space<vmem>>, vector<32x256xf32>
      tpu.vector_store %arg7[%c0_11, %c0_12], %12 {strides = array<i32>} : memref<32x256xf32, #tpu.memory_space<vmem>>, vector<32x256xf32>,
    } else {
    }
    %c0 = arith.constant 0 : index
    %c0_1 = arith.constant 0 : index
    %3 = vector.load %arg3[%c0, %c0_1] : memref<32x256xbf16, #tpu.memory_space<vmem>>, vector<32x256xbf16>
    %c0_2 = arith.constant 0 : index
    %c0_3 = arith.constant 0 : index
    %4 = vector.load %arg7[%c0_2, %c0_3] : memref<32x256xf32, #tpu.memory_space<vmem>>, vector<32x256xf32>
    %c0_4 = arith.constant 0 : index
    %c0_5 = arith.constant 0 : index
    %5 = vector.load %arg4[%c0_4, %c0_5] : memref<256x256xbf16, #tpu.memory_space<vmem>>, vector<256x256xbf16>
    %cst = arith.constant dense<0.000000e+00> : vector<32x256xf32>
    %6 = tpu.matmul %3, %5, %cst {dimension_numbers = #tpu.dot_dimension_numbers<[1], [0], [0], [1], [0, 0, 1, 1], [], []>} : vector<32x256xbf16>, vector<256x256xbf16>, vector<32x256xf32> -> vector<32x256xf32>
    %7 = arith.addf %4, %6 : vector<32x256xf32>
    %c0_6 = arith.constant 0 : index
    %c0_7 = arith.constant 0 : index
    %8 = vector.load %arg7[%c0_6, %c0_7] : memref<32x256xf32, #tpu.memory_space<vmem>>, vector<32x256xf32>
    tpu.vector_store %arg7[%c0_6, %c0_7], %7 {strides = array<i32>} : memref<32x256xf32, #tpu.memory_space<vmem>>, vector<32x256xf32>,
    %c0_i32_8 = arith.constant 0 : i32
    %9 = arith.cmpi eq, %arg2, %c0_i32_8 : i32
    %10 = arith.extui %9 : i1 to i32
    %c0_i32_9 = arith.constant 0 : i32
    %11 = arith.cmpi ne, %10, %c0_i32_9 : i32
    scf.if %11 {
      %c0_10 = arith.constant 0 : index
      %c0_11 = arith.constant 0 : index
      %12 = vector.load %arg7[%c0_10, %c0_11] : memref<32x256xf32, #tpu.memory_space<vmem>>, vector<32x256xf32>
      %c0_12 = arith.constant 0 : index
      %c0_13 = arith.constant 0 : index
      %13 = vector.load %arg5[%c0_12, %c0_13] : memref<32x256xbf16, #tpu.memory_space<vmem>>, vector<32x256xbf16>
      %14 = arith.extf %13 : vector<32x256xbf16> to vector<32x256xf32>
      %15 = arith.addf %12, %14 : vector<32x256xf32>
      %16 = arith.truncf %15 : vector<32x256xf32> to vector<32x256xbf16>
      %c0_14 = arith.constant 0 : index
      %c0_15 = arith.constant 0 : index
      %17 = vector.load %arg6[%c0_14, %c0_15] : memref<32x256xbf16, #tpu.memory_space<vmem>>, vector<32x256xbf16>
      tpu.vector_store %arg6[%c0_14, %c0_15], %16 {strides = array<i32>} : memref<32x256xbf16, #tpu.memory_space<vmem>>, vector<32x256xbf16>,
    } else {
    }
    return
  }
  func.func @transform_0(%arg0: i32, %arg1: i32, %arg2: i32) -> (i32, i32) {
    %c0_i32 = arith.constant 0 : i32
    return %arg0, %arg2 : i32, i32
  }
  func.func @transform_1(%arg0: i32, %arg1: i32, %arg2: i32) -> (i32, i32) {
    %c0_i32 = arith.constant 0 : i32
    return %arg2, %arg1 : i32, i32
  }
  func.func @transform_2(%arg0: i32, %arg1: i32, %arg2: i32) -> (i32, i32) {
    %c0_i32 = arith.constant 0 : i32
    return %arg0, %arg1 : i32, i32
  }
  func.func @transform_3(%arg0: i32, %arg1: i32, %arg2: i32) -> (i32, i32) {
    %c0_i32 = arith.constant 0 : i32
    return %arg0, %arg1 : i32, i32
  }
}

module attributes {stable_mosaic.version = 11 : i64} {
  func.func @_gateup_swiglu_kernel(%arg0: i32, %arg1: i32, %arg2: i32, %arg3: memref<32x256xbf16, #tpu.memory_space<vmem>>, %arg4: memref<32x1xf32, #tpu.memory_space<vmem>>, %arg5: memref<1x256xbf16, #tpu.memory_space<vmem>>, %arg6: memref<256x512xbf16, #tpu.memory_space<vmem>>, %arg7: memref<256x512xbf16, #tpu.memory_space<vmem>>, %arg8: memref<32x512xbf16, #tpu.memory_space<vmem>>, %arg9: memref<32x512xf32, #tpu.memory_space<vmem>>, %arg10: memref<32x512xf32, #tpu.memory_space<vmem>>) attributes {dimension_semantics = [#tpu.dimension_semantics<parallel>, #tpu.dimension_semantics<parallel>, #tpu.dimension_semantics<arbitrary>], iteration_bounds = array<i64: 1, 1, 1>, scalar_prefetch = 0 : i64, scratch_operands = 2 : i64, tpu.core_type = #tpu.core_type<tc>, window_params = [{transform_indices = @transform_0, window_bounds = array<i64: 32, 256>}, {transform_indices = @transform_1, window_bounds = array<i64: 32, 1>}, {transform_indices = @transform_2, window_bounds = array<i64: 1, 256>}, {transform_indices = @transform_3, window_bounds = array<i64: 256, 512>}, {transform_indices = @transform_4, window_bounds = array<i64: 256, 512>}, {transform_indices = @transform_5, window_bounds = array<i64: 32, 512>}]} {
    %c0_i32 = arith.constant 0 : i32
    %0 = arith.cmpi eq, %arg2, %c0_i32 : i32
    %1 = arith.extui %0 : i1 to i32
    %c0_i32_0 = arith.constant 0 : i32
    %2 = arith.cmpi ne, %1, %c0_i32_0 : i32
    scf.if %2 {
      %cst_21 = arith.constant 0.000000e+00 : f32
      %26 = vector.broadcast %cst_21 : f32 to vector<32x512xf32>
      %c0_22 = arith.constant 0 : index
      %c0_23 = arith.constant 0 : index
      %27 = vector.load %arg9[%c0_22, %c0_23] : memref<32x512xf32, #tpu.memory_space<vmem>>, vector<32x512xf32>
      tpu.vector_store %arg9[%c0_22, %c0_23], %26 {strides = array<i32>} : memref<32x512xf32, #tpu.memory_space<vmem>>, vector<32x512xf32>,
      %cst_24 = arith.constant 0.000000e+00 : f32
      %28 = vector.broadcast %cst_24 : f32 to vector<32x512xf32>
      %c0_25 = arith.constant 0 : index
      %c0_26 = arith.constant 0 : index
      %29 = vector.load %arg10[%c0_25, %c0_26] : memref<32x512xf32, #tpu.memory_space<vmem>>, vector<32x512xf32>
      tpu.vector_store %arg10[%c0_25, %c0_26], %28 {strides = array<i32>} : memref<32x512xf32, #tpu.memory_space<vmem>>, vector<32x512xf32>,
    } else {
    }
    %c0 = arith.constant 0 : index
    %c0_1 = arith.constant 0 : index
    %3 = vector.load %arg3[%c0, %c0_1] : memref<32x256xbf16, #tpu.memory_space<vmem>>, vector<32x256xbf16>
    %4 = arith.extf %3 : vector<32x256xbf16> to vector<32x256xf32>
    %c0_2 = arith.constant 0 : index
    %c0_3 = arith.constant 0 : index
    %5 = vector.load %arg4[%c0_2, %c0_3] : memref<32x1xf32, #tpu.memory_space<vmem>>, vector<32x1xf32>
    %6 = vector.broadcast %5 : vector<32x1xf32> to vector<32x256xf32>
    %7 = arith.mulf %4, %6 : vector<32x256xf32>
    %c0_4 = arith.constant 0 : index
    %c0_5 = arith.constant 0 : index
    %8 = vector.load %arg5[%c0_4, %c0_5] : memref<1x256xbf16, #tpu.memory_space<vmem>>, vector<1x256xbf16>
    %9 = arith.extf %8 : vector<1x256xbf16> to vector<1x256xf32>
    %10 = vector.broadcast %9 : vector<1x256xf32> to vector<32x256xf32>
    %11 = arith.mulf %7, %10 : vector<32x256xf32>
    %12 = arith.truncf %11 : vector<32x256xf32> to vector<32x256xbf16>
    %c0_6 = arith.constant 0 : index
    %c0_7 = arith.constant 0 : index
    %13 = vector.load %arg9[%c0_6, %c0_7] : memref<32x512xf32, #tpu.memory_space<vmem>>, vector<32x512xf32>
    %c0_8 = arith.constant 0 : index
    %c0_9 = arith.constant 0 : index
    %14 = vector.load %arg6[%c0_8, %c0_9] : memref<256x512xbf16, #tpu.memory_space<vmem>>, vector<256x512xbf16>
    %cst = arith.constant dense<0.000000e+00> : vector<32x512xf32>
    %15 = tpu.matmul %12, %14, %cst {dimension_numbers = #tpu.dot_dimension_numbers<[1], [0], [0], [1], [0, 0, 1, 1], [], []>} : vector<32x256xbf16>, vector<256x512xbf16>, vector<32x512xf32> -> vector<32x512xf32>
    %16 = arith.addf %13, %15 : vector<32x512xf32>
    %c0_10 = arith.constant 0 : index
    %c0_11 = arith.constant 0 : index
    %17 = vector.load %arg9[%c0_10, %c0_11] : memref<32x512xf32, #tpu.memory_space<vmem>>, vector<32x512xf32>
    tpu.vector_store %arg9[%c0_10, %c0_11], %16 {strides = array<i32>} : memref<32x512xf32, #tpu.memory_space<vmem>>, vector<32x512xf32>,
    %c0_12 = arith.constant 0 : index
    %c0_13 = arith.constant 0 : index
    %18 = vector.load %arg10[%c0_12, %c0_13] : memref<32x512xf32, #tpu.memory_space<vmem>>, vector<32x512xf32>
    %c0_14 = arith.constant 0 : index
    %c0_15 = arith.constant 0 : index
    %19 = vector.load %arg7[%c0_14, %c0_15] : memref<256x512xbf16, #tpu.memory_space<vmem>>, vector<256x512xbf16>
    %cst_16 = arith.constant dense<0.000000e+00> : vector<32x512xf32>
    %20 = tpu.matmul %12, %19, %cst_16 {dimension_numbers = #tpu.dot_dimension_numbers<[1], [0], [0], [1], [0, 0, 1, 1], [], []>} : vector<32x256xbf16>, vector<256x512xbf16>, vector<32x512xf32> -> vector<32x512xf32>
    %21 = arith.addf %18, %20 : vector<32x512xf32>
    %c0_17 = arith.constant 0 : index
    %c0_18 = arith.constant 0 : index
    %22 = vector.load %arg10[%c0_17, %c0_18] : memref<32x512xf32, #tpu.memory_space<vmem>>, vector<32x512xf32>
    tpu.vector_store %arg10[%c0_17, %c0_18], %21 {strides = array<i32>} : memref<32x512xf32, #tpu.memory_space<vmem>>, vector<32x512xf32>,
    %c0_i32_19 = arith.constant 0 : i32
    %23 = arith.cmpi eq, %arg2, %c0_i32_19 : i32
    %24 = arith.extui %23 : i1 to i32
    %c0_i32_20 = arith.constant 0 : i32
    %25 = arith.cmpi ne, %24, %c0_i32_20 : i32
    scf.if %25 {
      %c0_21 = arith.constant 0 : index
      %c0_22 = arith.constant 0 : index
      %26 = vector.load %arg9[%c0_21, %c0_22] : memref<32x512xf32, #tpu.memory_space<vmem>>, vector<32x512xf32>
      %27 = arith.negf %26 : vector<32x512xf32>
      %28 = math.exp %27 : vector<32x512xf32>
      %cst_23 = arith.constant 1.000000e+00 : f32
      %29 = vector.broadcast %cst_23 : f32 to vector<32x512xf32>
      %30 = arith.addf %29, %28 : vector<32x512xf32>
      %31 = arith.divf %29, %30 : vector<32x512xf32>
      %32 = arith.mulf %26, %31 : vector<32x512xf32>
      %c0_24 = arith.constant 0 : index
      %c0_25 = arith.constant 0 : index
      %33 = vector.load %arg10[%c0_24, %c0_25] : memref<32x512xf32, #tpu.memory_space<vmem>>, vector<32x512xf32>
      %34 = arith.mulf %32, %33 : vector<32x512xf32>
      %35 = arith.truncf %34 : vector<32x512xf32> to vector<32x512xbf16>
      %c0_26 = arith.constant 0 : index
      %c0_27 = arith.constant 0 : index
      %36 = vector.load %arg8[%c0_26, %c0_27] : memref<32x512xbf16, #tpu.memory_space<vmem>>, vector<32x512xbf16>
      tpu.vector_store %arg8[%c0_26, %c0_27], %35 {strides = array<i32>} : memref<32x512xbf16, #tpu.memory_space<vmem>>, vector<32x512xbf16>,
    } else {
    }
    return
  }
  func.func @transform_0(%arg0: i32, %arg1: i32, %arg2: i32) -> (i32, i32) {
    %c0_i32 = arith.constant 0 : i32
    return %arg0, %arg2 : i32, i32
  }
  func.func @transform_1(%arg0: i32, %arg1: i32, %arg2: i32) -> (i32, i32) {
    %c0_i32 = arith.constant 0 : i32
    %c0_i32_0 = arith.constant 0 : i32
    return %arg0, %c0_i32 : i32, i32
  }
  func.func @transform_2(%arg0: i32, %arg1: i32, %arg2: i32) -> (i32, i32) {
    %c0_i32 = arith.constant 0 : i32
    %c0_i32_0 = arith.constant 0 : i32
    return %c0_i32, %arg2 : i32, i32
  }
  func.func @transform_3(%arg0: i32, %arg1: i32, %arg2: i32) -> (i32, i32) {
    %c0_i32 = arith.constant 0 : i32
    return %arg2, %arg1 : i32, i32
  }
  func.func @transform_4(%arg0: i32, %arg1: i32, %arg2: i32) -> (i32, i32) {
    %c0_i32 = arith.constant 0 : i32
    return %arg2, %arg1 : i32, i32
  }
  func.func @transform_5(%arg0: i32, %arg1: i32, %arg2: i32) -> (i32, i32) {
    %c0_i32 = arith.constant 0 : i32
    return %arg0, %arg1 : i32, i32
  }
}

module attributes {stable_mosaic.version = 11 : i64} {
  func.func @_linear_kernel(%arg0: i32, %arg1: i32, %arg2: i32, %arg3: memref<32x512xbf16, #tpu.memory_space<vmem>>, %arg4: memref<512x256xbf16, #tpu.memory_space<vmem>>, %arg5: memref<32x256xbf16, #tpu.memory_space<vmem>>, %arg6: memref<32x256xbf16, #tpu.memory_space<vmem>>, %arg7: memref<32x256xf32, #tpu.memory_space<vmem>>) attributes {dimension_semantics = [#tpu.dimension_semantics<parallel>, #tpu.dimension_semantics<parallel>, #tpu.dimension_semantics<arbitrary>], iteration_bounds = array<i64: 1, 1, 1>, scalar_prefetch = 0 : i64, scratch_operands = 1 : i64, tpu.core_type = #tpu.core_type<tc>, window_params = [{transform_indices = @transform_0, window_bounds = array<i64: 32, 512>}, {transform_indices = @transform_1, window_bounds = array<i64: 512, 256>}, {transform_indices = @transform_2, window_bounds = array<i64: 32, 256>}, {transform_indices = @transform_3, window_bounds = array<i64: 32, 256>}]} {
    %c0_i32 = arith.constant 0 : i32
    %0 = arith.cmpi eq, %arg2, %c0_i32 : i32
    %1 = arith.extui %0 : i1 to i32
    %c0_i32_0 = arith.constant 0 : i32
    %2 = arith.cmpi ne, %1, %c0_i32_0 : i32
    scf.if %2 {
      %cst_10 = arith.constant 0.000000e+00 : f32
      %12 = vector.broadcast %cst_10 : f32 to vector<32x256xf32>
      %c0_11 = arith.constant 0 : index
      %c0_12 = arith.constant 0 : index
      %13 = vector.load %arg7[%c0_11, %c0_12] : memref<32x256xf32, #tpu.memory_space<vmem>>, vector<32x256xf32>
      tpu.vector_store %arg7[%c0_11, %c0_12], %12 {strides = array<i32>} : memref<32x256xf32, #tpu.memory_space<vmem>>, vector<32x256xf32>,
    } else {
    }
    %c0 = arith.constant 0 : index
    %c0_1 = arith.constant 0 : index
    %3 = vector.load %arg3[%c0, %c0_1] : memref<32x512xbf16, #tpu.memory_space<vmem>>, vector<32x512xbf16>
    %c0_2 = arith.constant 0 : index
    %c0_3 = arith.constant 0 : index
    %4 = vector.load %arg7[%c0_2, %c0_3] : memref<32x256xf32, #tpu.memory_space<vmem>>, vector<32x256xf32>
    %c0_4 = arith.constant 0 : index
    %c0_5 = arith.constant 0 : index
    %5 = vector.load %arg4[%c0_4, %c0_5] : memref<512x256xbf16, #tpu.memory_space<vmem>>, vector<512x256xbf16>
    %cst = arith.constant dense<0.000000e+00> : vector<32x256xf32>
    %6 = tpu.matmul %3, %5, %cst {dimension_numbers = #tpu.dot_dimension_numbers<[1], [0], [0], [1], [0, 0, 1, 1], [], []>} : vector<32x512xbf16>, vector<512x256xbf16>, vector<32x256xf32> -> vector<32x256xf32>
    %7 = arith.addf %4, %6 : vector<32x256xf32>
    %c0_6 = arith.constant 0 : index
    %c0_7 = arith.constant 0 : index
    %8 = vector.load %arg7[%c0_6, %c0_7] : memref<32x256xf32, #tpu.memory_space<vmem>>, vector<32x256xf32>
    tpu.vector_store %arg7[%c0_6, %c0_7], %7 {strides = array<i32>} : memref<32x256xf32, #tpu.memory_space<vmem>>, vector<32x256xf32>,
    %c0_i32_8 = arith.constant 0 : i32
    %9 = arith.cmpi eq, %arg2, %c0_i32_8 : i32
    %10 = arith.extui %9 : i1 to i32
    %c0_i32_9 = arith.constant 0 : i32
    %11 = arith.cmpi ne, %10, %c0_i32_9 : i32
    scf.if %11 {
      %c0_10 = arith.constant 0 : index
      %c0_11 = arith.constant 0 : index
      %12 = vector.load %arg7[%c0_10, %c0_11] : memref<32x256xf32, #tpu.memory_space<vmem>>, vector<32x256xf32>
      %c0_12 = arith.constant 0 : index
      %c0_13 = arith.constant 0 : index
      %13 = vector.load %arg5[%c0_12, %c0_13] : memref<32x256xbf16, #tpu.memory_space<vmem>>, vector<32x256xbf16>
      %14 = arith.extf %13 : vector<32x256xbf16> to vector<32x256xf32>
      %15 = arith.addf %12, %14 : vector<32x256xf32>
      %16 = arith.truncf %15 : vector<32x256xf32> to vector<32x256xbf16>
      %c0_14 = arith.constant 0 : index
      %c0_15 = arith.constant 0 : index
      %17 = vector.load %arg6[%c0_14, %c0_15] : memref<32x256xbf16, #tpu.memory_space<vmem>>, vector<32x256xbf16>
      tpu.vector_store %arg6[%c0_14, %c0_15], %16 {strides = array<i32>} : memref<32x256xbf16, #tpu.memory_space<vmem>>, vector<32x256xbf16>,
    } else {
    }
    return
  }
  func.func @transform_0(%arg0: i32, %arg1: i32, %arg2: i32) -> (i32, i32) {
    %c0_i32 = arith.constant 0 : i32
    return %arg0, %arg2 : i32, i32
  }
  func.func @transform_1(%arg0: i32, %arg1: i32, %arg2: i32) -> (i32, i32) {
    %c0_i32 = arith.constant 0 : i32
    return %arg2, %arg1 : i32, i32
  }
  func.func @transform_2(%arg0: i32, %arg1: i32, %arg2: i32) -> (i32, i32) {
    %c0_i32 = arith.constant 0 : i32
    return %arg0, %arg1 : i32, i32
  }
  func.func @transform_3(%arg0: i32, %arg1: i32, %arg2: i32) -> (i32, i32) {
    %c0_i32 = arith.constant 0 : i32
    return %arg0, %arg1 : i32, i32
  }
}

module attributes {stable_mosaic.version = 11 : i64} {
  func.func @_linear_kernel(%arg0: i32, %arg1: i32, %arg2: i32, %arg3: memref<32x256xbf16, #tpu.memory_space<vmem>>, %arg4: memref<32x1xf32, #tpu.memory_space<vmem>>, %arg5: memref<1x256xbf16, #tpu.memory_space<vmem>>, %arg6: memref<256x512xbf16, #tpu.memory_space<vmem>>, %arg7: memref<32x512xbf16, #tpu.memory_space<vmem>>, %arg8: memref<32x512xf32, #tpu.memory_space<vmem>>) attributes {dimension_semantics = [#tpu.dimension_semantics<parallel>, #tpu.dimension_semantics<parallel>, #tpu.dimension_semantics<arbitrary>], iteration_bounds = array<i64: 1, 1, 1>, scalar_prefetch = 0 : i64, scratch_operands = 1 : i64, tpu.core_type = #tpu.core_type<tc>, window_params = [{transform_indices = @transform_0, window_bounds = array<i64: 32, 256>}, {transform_indices = @transform_1, window_bounds = array<i64: 32, 1>}, {transform_indices = @transform_2, window_bounds = array<i64: 1, 256>}, {transform_indices = @transform_3, window_bounds = array<i64: 256, 512>}, {transform_indices = @transform_4, window_bounds = array<i64: 32, 512>}]} {
    %c0_i32 = arith.constant 0 : i32
    %0 = arith.cmpi eq, %arg2, %c0_i32 : i32
    %1 = arith.extui %0 : i1 to i32
    %c0_i32_0 = arith.constant 0 : i32
    %2 = arith.cmpi ne, %1, %c0_i32_0 : i32
    scf.if %2 {
      %cst_14 = arith.constant 0.000000e+00 : f32
      %21 = vector.broadcast %cst_14 : f32 to vector<32x512xf32>
      %c0_15 = arith.constant 0 : index
      %c0_16 = arith.constant 0 : index
      %22 = vector.load %arg8[%c0_15, %c0_16] : memref<32x512xf32, #tpu.memory_space<vmem>>, vector<32x512xf32>
      tpu.vector_store %arg8[%c0_15, %c0_16], %21 {strides = array<i32>} : memref<32x512xf32, #tpu.memory_space<vmem>>, vector<32x512xf32>,
    } else {
    }
    %c0 = arith.constant 0 : index
    %c0_1 = arith.constant 0 : index
    %3 = vector.load %arg3[%c0, %c0_1] : memref<32x256xbf16, #tpu.memory_space<vmem>>, vector<32x256xbf16>
    %4 = arith.extf %3 : vector<32x256xbf16> to vector<32x256xf32>
    %c0_2 = arith.constant 0 : index
    %c0_3 = arith.constant 0 : index
    %5 = vector.load %arg4[%c0_2, %c0_3] : memref<32x1xf32, #tpu.memory_space<vmem>>, vector<32x1xf32>
    %6 = vector.broadcast %5 : vector<32x1xf32> to vector<32x256xf32>
    %7 = arith.mulf %4, %6 : vector<32x256xf32>
    %c0_4 = arith.constant 0 : index
    %c0_5 = arith.constant 0 : index
    %8 = vector.load %arg5[%c0_4, %c0_5] : memref<1x256xbf16, #tpu.memory_space<vmem>>, vector<1x256xbf16>
    %9 = arith.extf %8 : vector<1x256xbf16> to vector<1x256xf32>
    %10 = vector.broadcast %9 : vector<1x256xf32> to vector<32x256xf32>
    %11 = arith.mulf %7, %10 : vector<32x256xf32>
    %12 = arith.truncf %11 : vector<32x256xf32> to vector<32x256xbf16>
    %c0_6 = arith.constant 0 : index
    %c0_7 = arith.constant 0 : index
    %13 = vector.load %arg8[%c0_6, %c0_7] : memref<32x512xf32, #tpu.memory_space<vmem>>, vector<32x512xf32>
    %c0_8 = arith.constant 0 : index
    %c0_9 = arith.constant 0 : index
    %14 = vector.load %arg6[%c0_8, %c0_9] : memref<256x512xbf16, #tpu.memory_space<vmem>>, vector<256x512xbf16>
    %cst = arith.constant dense<0.000000e+00> : vector<32x512xf32>
    %15 = tpu.matmul %12, %14, %cst {dimension_numbers = #tpu.dot_dimension_numbers<[1], [0], [0], [1], [0, 0, 1, 1], [], []>} : vector<32x256xbf16>, vector<256x512xbf16>, vector<32x512xf32> -> vector<32x512xf32>
    %16 = arith.addf %13, %15 : vector<32x512xf32>
    %c0_10 = arith.constant 0 : index
    %c0_11 = arith.constant 0 : index
    %17 = vector.load %arg8[%c0_10, %c0_11] : memref<32x512xf32, #tpu.memory_space<vmem>>, vector<32x512xf32>
    tpu.vector_store %arg8[%c0_10, %c0_11], %16 {strides = array<i32>} : memref<32x512xf32, #tpu.memory_space<vmem>>, vector<32x512xf32>,
    %c0_i32_12 = arith.constant 0 : i32
    %18 = arith.cmpi eq, %arg2, %c0_i32_12 : i32
    %19 = arith.extui %18 : i1 to i32
    %c0_i32_13 = arith.constant 0 : i32
    %20 = arith.cmpi ne, %19, %c0_i32_13 : i32
    scf.if %20 {
      %c0_14 = arith.constant 0 : index
      %c0_15 = arith.constant 0 : index
      %21 = vector.load %arg8[%c0_14, %c0_15] : memref<32x512xf32, #tpu.memory_space<vmem>>, vector<32x512xf32>
      %22 = arith.truncf %21 : vector<32x512xf32> to vector<32x512xbf16>
      %c0_16 = arith.constant 0 : index
      %c0_17 = arith.constant 0 : index
      %23 = vector.load %arg7[%c0_16, %c0_17] : memref<32x512xbf16, #tpu.memory_space<vmem>>, vector<32x512xbf16>
      tpu.vector_store %arg7[%c0_16, %c0_17], %22 {strides = array<i32>} : memref<32x512xbf16, #tpu.memory_space<vmem>>, vector<32x512xbf16>,
    } else {
    }
    return
  }
  func.func @transform_0(%arg0: i32, %arg1: i32, %arg2: i32) -> (i32, i32) {
    %c0_i32 = arith.constant 0 : i32
    return %arg0, %arg2 : i32, i32
  }
  func.func @transform_1(%arg0: i32, %arg1: i32, %arg2: i32) -> (i32, i32) {
    %c0_i32 = arith.constant 0 : i32
    %c0_i32_0 = arith.constant 0 : i32
    return %arg0, %c0_i32 : i32, i32
  }
  func.func @transform_2(%arg0: i32, %arg1: i32, %arg2: i32) -> (i32, i32) {
    %c0_i32 = arith.constant 0 : i32
    %c0_i32_0 = arith.constant 0 : i32
    return %c0_i32, %arg2 : i32, i32
  }
  func.func @transform_3(%arg0: i32, %arg1: i32, %arg2: i32) -> (i32, i32) {
    %c0_i32 = arith.constant 0 : i32
    return %arg2, %arg1 : i32, i32
  }
  func.func @transform_4(%arg0: i32, %arg1: i32, %arg2: i32) -> (i32, i32) {
    %c0_i32 = arith.constant 0 : i32
    return %arg0, %arg1 : i32, i32
  }
}

module attributes {stable_mosaic.version = 11 : i64} {
  func.func @_linear_kernel(%arg0: i32, %arg1: i32, %arg2: i32, %arg3: memref<32x256xbf16, #tpu.memory_space<vmem>>, %arg4: memref<32x1xf32, #tpu.memory_space<vmem>>, %arg5: memref<1x256xbf16, #tpu.memory_space<vmem>>, %arg6: memref<256x512xbf16, #tpu.memory_space<vmem>>, %arg7: memref<32x512xf32, #tpu.memory_space<vmem>>, %arg8: memref<32x512xf32, #tpu.memory_space<vmem>>) attributes {dimension_semantics = [#tpu.dimension_semantics<parallel>, #tpu.dimension_semantics<parallel>, #tpu.dimension_semantics<arbitrary>], iteration_bounds = array<i64: 1, 1, 1>, scalar_prefetch = 0 : i64, scratch_operands = 1 : i64, tpu.core_type = #tpu.core_type<tc>, window_params = [{transform_indices = @transform_0, window_bounds = array<i64: 32, 256>}, {transform_indices = @transform_1, window_bounds = array<i64: 32, 1>}, {transform_indices = @transform_2, window_bounds = array<i64: 1, 256>}, {transform_indices = @transform_3, window_bounds = array<i64: 256, 512>}, {transform_indices = @transform_4, window_bounds = array<i64: 32, 512>}]} {
    %c0_i32 = arith.constant 0 : i32
    %0 = arith.cmpi eq, %arg2, %c0_i32 : i32
    %1 = arith.extui %0 : i1 to i32
    %c0_i32_0 = arith.constant 0 : i32
    %2 = arith.cmpi ne, %1, %c0_i32_0 : i32
    scf.if %2 {
      %cst_14 = arith.constant 0.000000e+00 : f32
      %21 = vector.broadcast %cst_14 : f32 to vector<32x512xf32>
      %c0_15 = arith.constant 0 : index
      %c0_16 = arith.constant 0 : index
      %22 = vector.load %arg8[%c0_15, %c0_16] : memref<32x512xf32, #tpu.memory_space<vmem>>, vector<32x512xf32>
      tpu.vector_store %arg8[%c0_15, %c0_16], %21 {strides = array<i32>} : memref<32x512xf32, #tpu.memory_space<vmem>>, vector<32x512xf32>,
    } else {
    }
    %c0 = arith.constant 0 : index
    %c0_1 = arith.constant 0 : index
    %3 = vector.load %arg3[%c0, %c0_1] : memref<32x256xbf16, #tpu.memory_space<vmem>>, vector<32x256xbf16>
    %4 = arith.extf %3 : vector<32x256xbf16> to vector<32x256xf32>
    %c0_2 = arith.constant 0 : index
    %c0_3 = arith.constant 0 : index
    %5 = vector.load %arg4[%c0_2, %c0_3] : memref<32x1xf32, #tpu.memory_space<vmem>>, vector<32x1xf32>
    %6 = vector.broadcast %5 : vector<32x1xf32> to vector<32x256xf32>
    %7 = arith.mulf %4, %6 : vector<32x256xf32>
    %c0_4 = arith.constant 0 : index
    %c0_5 = arith.constant 0 : index
    %8 = vector.load %arg5[%c0_4, %c0_5] : memref<1x256xbf16, #tpu.memory_space<vmem>>, vector<1x256xbf16>
    %9 = arith.extf %8 : vector<1x256xbf16> to vector<1x256xf32>
    %10 = vector.broadcast %9 : vector<1x256xf32> to vector<32x256xf32>
    %11 = arith.mulf %7, %10 : vector<32x256xf32>
    %12 = arith.truncf %11 : vector<32x256xf32> to vector<32x256xbf16>
    %c0_6 = arith.constant 0 : index
    %c0_7 = arith.constant 0 : index
    %13 = vector.load %arg8[%c0_6, %c0_7] : memref<32x512xf32, #tpu.memory_space<vmem>>, vector<32x512xf32>
    %c0_8 = arith.constant 0 : index
    %c0_9 = arith.constant 0 : index
    %14 = vector.load %arg6[%c0_8, %c0_9] : memref<256x512xbf16, #tpu.memory_space<vmem>>, vector<256x512xbf16>
    %cst = arith.constant dense<0.000000e+00> : vector<32x512xf32>
    %15 = tpu.matmul %12, %14, %cst {dimension_numbers = #tpu.dot_dimension_numbers<[1], [0], [0], [1], [0, 0, 1, 1], [], []>} : vector<32x256xbf16>, vector<256x512xbf16>, vector<32x512xf32> -> vector<32x512xf32>
    %16 = arith.addf %13, %15 : vector<32x512xf32>
    %c0_10 = arith.constant 0 : index
    %c0_11 = arith.constant 0 : index
    %17 = vector.load %arg8[%c0_10, %c0_11] : memref<32x512xf32, #tpu.memory_space<vmem>>, vector<32x512xf32>
    tpu.vector_store %arg8[%c0_10, %c0_11], %16 {strides = array<i32>} : memref<32x512xf32, #tpu.memory_space<vmem>>, vector<32x512xf32>,
    %c0_i32_12 = arith.constant 0 : i32
    %18 = arith.cmpi eq, %arg2, %c0_i32_12 : i32
    %19 = arith.extui %18 : i1 to i32
    %c0_i32_13 = arith.constant 0 : i32
    %20 = arith.cmpi ne, %19, %c0_i32_13 : i32
    scf.if %20 {
      %c0_14 = arith.constant 0 : index
      %c0_15 = arith.constant 0 : index
      %21 = vector.load %arg8[%c0_14, %c0_15] : memref<32x512xf32, #tpu.memory_space<vmem>>, vector<32x512xf32>
      %c0_16 = arith.constant 0 : index
      %c0_17 = arith.constant 0 : index
      %22 = vector.load %arg7[%c0_16, %c0_17] : memref<32x512xf32, #tpu.memory_space<vmem>>, vector<32x512xf32>
      tpu.vector_store %arg7[%c0_16, %c0_17], %21 {strides = array<i32>} : memref<32x512xf32, #tpu.memory_space<vmem>>, vector<32x512xf32>,
    } else {
    }
    return
  }
  func.func @transform_0(%arg0: i32, %arg1: i32, %arg2: i32) -> (i32, i32) {
    %c0_i32 = arith.constant 0 : i32
    return %arg0, %arg2 : i32, i32
  }
  func.func @transform_1(%arg0: i32, %arg1: i32, %arg2: i32) -> (i32, i32) {
    %c0_i32 = arith.constant 0 : i32
    %c0_i32_0 = arith.constant 0 : i32
    return %arg0, %c0_i32 : i32, i32
  }
  func.func @transform_2(%arg0: i32, %arg1: i32, %arg2: i32) -> (i32, i32) {
    %c0_i32 = arith.constant 0 : i32
    %c0_i32_0 = arith.constant 0 : i32
    return %c0_i32, %arg2 : i32, i32
  }
  func.func @transform_3(%arg0: i32, %arg1: i32, %arg2: i32) -> (i32, i32) {
    %c0_i32 = arith.constant 0 : i32
    return %arg2, %arg1 : i32, i32
  }
  func.func @transform_4(%arg0: i32, %arg1: i32, %arg2: i32) -> (i32, i32) {
    %c0_i32 = arith.constant 0 : i32
    return %arg0, %arg1 : i32, i32
  }
}

</mosaic_0001>

<bundles_post_ra>
// kernel: mistral_upsampler_forward.18
= control target key start
LH: loop header
LB: loop body
LE: loop exit
PB: predicated region body
PF: predicated region fallthrough
CT: control target
= control target key end

     0   :  { %vm53_vm0 = vcmask 7168   ;;  %s104_s0 = inlined_call_operand.vmem [shape: bf16[32,256], index: 0, kind: input, shape index: {}]   ;;  %s105_s1 = inlined_call_operand.vmem [shape: f32[32,1], index: 1, kind: output, shape index: {}]  }
   0x1   :  { %v10_v0 = vld [vmem:[%s104_s0 + $0x10] sm:$0xff]  ;;  %v8_v1 = vld [vmem:[%s104_s0] sm:$0xff]  ;;  %v11_v2 = vld [vmem:[%s104_s0 + $0x18] sm:$0xff] }
   0x2   :  { %v16_v3 = vunpack.c.l.bf16 %v10_v0  ;;  %v17_v4 = vunpack.c.h.bf16 %v10_v0  ;;  %v12_v5 = vunpack.c.l.bf16 %v8_v1  ;;  %v13_v6 = vunpack.c.h.bf16 %v8_v1  ;;  %v9_v7 = vld [vmem:[%s104_s0 + $0x8] sm:$0xff] }
   0x3   :  { %v18_v8 = vunpack.c.l.bf16 %v11_v2  ;;  %v19_v9 = vunpack.c.h.bf16 %v11_v2  ;;  %v14_v10 = vunpack.c.l.bf16 %v9_v7  ;;  %v15_v11 = vunpack.c.h.bf16 %v9_v7 }
   0x4   :  { %v24_v12 = vmul.f32 %v16_v3, %v16_v3  ;;  %v25_v13 = vmul.f32 %v17_v4, %v17_v4  ;;  %v20_v14 = vmul.f32 %v12_v5, %v12_v5  ;;  %v21_v15 = vmul.f32 %v13_v6, %v13_v6 }
   0x5   :  { %v26_v16 = vmul.f32 %v18_v8, %v18_v8  ;;  %v27_v17 = vmul.f32 %v19_v9, %v19_v9  ;;  %v22_v18 = vmul.f32 %v14_v10, %v14_v10  ;;  %v23_v19 = vmul.f32 %v15_v11, %v15_v11 }
   0x6   :  { %v34_v20 = vadd.f32 %v25_v13, %v24_v12  ;;  %v28_v21 = vadd.f32 %v21_v15, %v20_v14 }
   0x7   :  { %v37_v22 = vadd.f32 %v27_v17, %v26_v16  ;;  %v31_v23 = vadd.f32 %v23_v19, %v22_v18 }
   0x8   :  { %35 = vadd.xlane.f32.xlu1 %v34_v20  ;;  %29 = vadd.xlane.f32.xlu0 %v28_v21 }
   0xc   :  { %38 = vadd.xlane.f32.xlu1 %v37_v22  ;;  %32 = vadd.xlane.f32.xlu0 %v31_v23 }
  0x91   :  { %v36_v24 = vpop.xlane.xlu1 %35  ;;  %v30_v25 = vpop.xlane.xlu0 %29 }
  0x92   :  { %v43_v26 = vmul.f32 0.00390625, %v36_v24  ;;  %v41_v27 = vmul.f32 0.00390625, %v30_v25 }
  0x94   :  { %v47_v28 = vadd.f32 1e-05, %v43_v26  ;;  %v45_v29 = vadd.f32 1e-05, %v41_v27 }
  0x95   :  { %v39_v30 = vpop.xlane.xlu1 %38  ;;  %v33_v31 = vpop.xlane.xlu0 %32 }
  0x96   :  { %62 = vrsqrt.f32 %v47_v28  ;;  %v44_v32 = vmul.f32 0.00390625, %v39_v30  ;;  %v42_v33 = vmul.f32 0.00390625, %v33_v31 }
  0x97   :  { %64 = vrsqrt.f32 %v45_v29 }
  0x98   :  { %v48_v34 = vadd.f32 1e-05, %v44_v32  ;;  %v46_v35 = vadd.f32 1e-05, %v42_v33 }
  0x9a   :  { %66 = vrsqrt.f32 %v48_v34 }
  0x9b   :  { %68 = vrsqrt.f32 %v46_v35 }
  0xa3   :  { %v63_v36 = vpop.eup %62 }
  0xa4   :  { %v65_v37 = vpop.eup %64  ;;  %56 = vst.msk [vmem:[%s105_s1 + $0x10] sm:$0xff] %vm53_vm0, %v63_v36 }
  0xa5   :  { %54 = vst.msk [vmem:[%s105_s1] sm:$0xff] %vm53_vm0, %v65_v37 }
  0xa7   :  { %v67_v38 = vpop.eup %66 }
  0xa8   :  { %v69_v39 = vpop.eup %68  ;;  %57 = vst.msk [vmem:[%s105_s1 + $0x18] sm:$0xff] %vm53_vm0, %v67_v38 }
  0xa9   :  { %55 = vst.msk [vmem:[%s105_s1 + $0x8] sm:$0xff] %vm53_vm0, %v69_v39 }

// kernel: mistral_upsampler_forward.20
= control target key start
LH: loop header
LB: loop body
LE: loop exit
PB: predicated region body
PF: predicated region fallthrough
CT: control target
= control target key end

     0   :  { %s623_s12 = smov 0   ;;  %s625_s13 = smov 0   ;;  %s701_s0 = inlined_call_operand.vmem [shape: bf16[2,16,512], index: 0, kind: input, shape index: {}]   ;;  %s702_s1 = inlined_call_operand.vmem [shape: f32[16,128], index: 1, kind: input, shape index: {}]   ;;  %s703_s2 = inlined_call_operand.vmem [shape: f32[16,128], index: 2, kind: input, shape index: {}]   ;;  %s704_s3 = inlined_call_operand.vmem [shape: bf16[2,16,128], index: 3, kind: output, shape index: {}]  }
   0x1   :  { %s627_s14 = smov 0   ;;  %s629_s15 = smov 0  }
   0x2   :  { %s631_s16 = smov 0  }
   0x3 LB: > { %s32_s17 = sadd.s32 1, %s596_s15  ;;  %p52_p1 = scmp.ne.s32.totalorder %s588_s13, %s584_s12  ;;  %s600_s16 = sphi %s631_s16, %s13_s16   ;;  %s596_s15 = sphi %s629_s15, %s708_s15   ;;  %s592_s14 = sphi %s627_s14, %s707_s14   ;;  %s588_s13 = sphi %s625_s13, %s706_s13   ;;  %s584_s12 = sphi %s623_s12, %s705_s12  }
   0x4   : > { %p34_p0 = scmp.ge.s32.totalorder %s32_s17, 2  ;;  %p53_p2 = scmp.eq.s32.totalorder %s600_s16, 0 }
   0x5   : > { %s45_s19 = sadd.s32 1, %s588_s13  ;;  %p489_p5 = scmp.ge.s32.totalorder %s600_s16, 2 }
   0x6   : > { %s710_s17 = smov (%p34_p0, %s32_s17), 0  ;;  %p54_p3 = por %p53_p2, %p52_p1 }
   0x7   : > { %s38_s18 = ssub.s32 %s596_s15, %s710_s17  ;;  %178 = sbr.rel (%p489_p5) target bundleno = 17 (0x11), region = 24 }
   0x8   : > { %p43_p4 = scmp.eq.s32.totalorder %s38_s18, 0 }
   0xa   : > { %s658_s20 = scalar_select %p43_p4, %s588_s13, %s45_s19  }
   0xc   : > { %181 = sbr.rel (!%p54_p3) target bundleno = 17 (0x11), region = 28  ;;  %s183_s21 = sand.u32 (%p54_p3), 1, %s588_s13  }
   0xd   : > { %s503_s22 = sshll.u32 (%p54_p3), %s596_s15, 5  ;;  %s490_s23 = sshll.u32 (%p54_p3), %s183_s21, 3 }
   0xe   : > { %s396_s26 = scalar_lea.vmem (%p54_p3), %s701_s0, %s503_s22  ;;  %s185_s27 = scalar_lea.vmem (%p54_p3), [#allocation2], %s490_s23 }
   0xf   : > { %v493_v0 = vld [vmem:[%s396_s26 + $0x8] sm:$0xf] (%p54_p3)  ;;  %v494_v1 = vld [vmem:[%s396_s26 + $0x18] sm:$0xf] (%p54_p3) }
  0x10   : > { %211 = vst [vmem:[%s185_s27] sm:$0xf] (%p54_p3), %v493_v0  ;;  %213 = vst [vmem:[%s185_s27 + $0x4] sm:$0xf] (%p54_p3), %v494_v1 }
  0x11 PF: > { %p495_p6 = scmp.ge.s32.totalorder %s600_s16, 1  ;;  %p240_p7 = scmp.lt.s32.totalorder %s600_s16, 3 }
  0x13   : > { %p241_p8 = pnand %p495_p6, %p240_p7 }
  0x14   : > { %s247_s28 = sand.u32 (!%p241_p8), 1, %s584_s12   ;;  %s602_s4 = smov (!%p241_p8), 64  }
  0x15   : > { %244 = sbr.rel (%p241_p8) target bundleno = 158 (0x9e), region = 69  ;;  %s496_s29 = sshll.u32 (!%p241_p8), %s247_s28, 3 }
  0x16   : > { %s249_s30 = scalar_lea.vmem (!%p241_p8), [#allocation2], %s496_s29  ;;  %p302_p9 = scmp.lt.s32.totalorder (!%p241_p8), %s592_s14, 1 }
  0x1a   : > { %v508_v2 = vld [vmem:[%s249_s30] sm:$0xff]   ;;  %v326_v6 = vlaneseq  ;;  %s712_s14 = smov (!%p302_p9, %s592_s14), 1 }
  0x1b   : > { %v509_v3 = vunpack.c.l.bf16 %v508_v2  ;;  %v510_v4 = vunpack.c.h.bf16 %v508_v2  ;;  %v318_v9 = vld [vmem:[%s702_s1] sm:$0xff]  ;;  %v319_v10 = vld [vmem:[%s702_s1 + $0x8] sm:$0xff]  ;;  %s504_s18 = sshll.u32 %s712_s14, 3 }
  0x1c   : > { %v327_v7 = vand.u32 127, %v326_v6  ;;  %v320_v13 = vld [vmem:[%s703_s2] sm:$0xff]  ;;  %v321_v14 = vld [vmem:[%s703_s2 + $0x8] sm:$0xff]  ;;  %s312_s22 = scalar_lea.vmem %s704_s3, %s504_s18 }
  0x1d   : > { %v557_v5 = vpack.i.bf16 %v510_v4, %v509_v3  ;;  %v334_v17 = vmul.f32 %v510_v4, %v319_v10  ;;  %v333_v18 = vmul.f32 %v509_v3, %v318_v9 }
  0x1e   : > { %vm328_vm0 = vcmp.lt.s32.totalorder %v327_v7, 64 }
  0x1f   : > { %558 = vrot.lane.b32.xlu0 %v557_v5, %s602_s4 }
  0x91   : > { %v559_v8 = vpop.permute.xlu0 %558 }
  0x92   : > { %v561_v11 = vunpack.i.h.bf16 %v559_v8  ;;  %v560_v12 = vunpack.i.l.bf16 %v559_v8 }
  0x94   : > { %v330_v15 = vsub.f32 0.0, %v561_v11  ;;  %v329_v16 = vsub.f32 0.0, %v560_v12 }
  0x96   : > { %v332_v19 = vsel %vm328_vm0, %v330_v15, %v561_v11  ;;  %v331_v20 = vsel %vm328_vm0, %v329_v16, %v560_v12 }
  0x97   : > { %v336_v21 = vmul.f32 %v332_v19, %v321_v14  ;;  %v335_v22 = vmul.f32 %v331_v20, %v320_v13 }
  0x99   : > { %v338_v23 = vadd.f32 %v336_v21, %v334_v17  ;;  %v337_v24 = vadd.f32 %v335_v22, %v333_v18 }
  0x9b   : > { %v514_v25 = vpack.c.bf16 %v338_v23, %v337_v24 }
  0x9d   : > { %515 = vst [vmem:[%s312_s22] sm:$0xff] %v514_v25  }
  0x9e PF: > { %s13_s16 = sadd.s32 1, %s600_s16   ;;  %s705_s12 = smov %s588_s13 }
  0x9f   : > { %p10_p10 = scmp.ge.s32.totalorder %s13_s16, 4   ;;  %s706_s13 = smov %s658_s20 }
  0xa0   : > { %s707_s14 = smov %s596_s15  ;;  %s708_s15 = smov %s710_s17 }
  0xa1   :  { %12 = sbr.rel (!%p10_p10) target bundleno = 3 (0x3), region = 114 }

// kernel: mistral_upsampler_forward.19
= control target key start
LH: loop header
LB: loop body
LE: loop exit
PB: predicated region body
PF: predicated region fallthrough
CT: control target
= control target key end

     0   :  { %9 = vsyncpa [#allocation4], 0  ;;  %s950_s15 = smov [#allocation3]   ;;  %s1033_s0 = inlined_call_operand.vmem [shape: bf16[32,256], index: 0, kind: input, shape index: {}]   ;;  %s1034_s1 = inlined_call_operand.vmem [shape: f32[32,1], index: 1, kind: input, shape index: {}]   ;;  %s1035_s2 = inlined_call_operand.vmem [shape: bf16[1,256], index: 2, kind: input, shape index: {}]   ;;  %s1036_s3 = inlined_call_operand.hbm [shape: bf16[256,512], index: 3, kind: input, shape index: {}]   ;;  %s1037_s4 = inlined_call_operand.vmem [shape: bf16[32,512], index: 4, kind: output, shape index: {}]  }
   0x1   :  { %s21_s16 = sshll.u32 %s950_s15, 4  ;;  %s22_s16 = int_to_ptr.vmem [resolvable:$true] %s21_s16 }
   0x2   :  { %s936_s17 = scalar_lea.vmem %s22_s16, 8192  ;;  %p941_p1 = scmp.lt.s32.totalorder %s22_s16, %s22_s16 }
   0x3   :  { %p937_p0 = scmp.ne.s32.totalorder %s22_s16, %s936_s17  ;;  %p942_p2 = scmp.lt.s32.totalorder %s936_s17, %s936_s17 }
   0x5   :  { %p943_p3 = por %p942_p2, %p941_p1 }
   0x7   :  { %p944_p4 = pnand %p943_p3, %p937_p0 }
   0x9   :  { %947 = shalt.err (!%p944_p4)
}
   0xa   :  { %s951_s18 = smov 256   ;;  %s952_s19 = smov 16  }
   0xb   :  { %27 = dma.hbm_to_vmem [thread:$0]  %s1036_s3, 8192, %s22_s16, [#allocation4], %s951_s18, %s951_s18, %s952_s19  }
   0xc   :  { %948 = dma.done.wait [#allocation4], 8192  }
   0xd   :  { %949 = vsyncadd [#allocation4], 4294959104  ;;  %v953_v0 = vmov 0   ;;  %v63_v1 = vld [vmem:[%s1034_s1] sm:$0xff]  ;;  %v65_v2 = vld [vmem:[%s1034_s1 + $0x10] sm:$0xff] }
   0xe   :  { %830 = vset.pattern.permute.xlu0 %v953_v0  ;;  %831 = vset.pattern.permute.xlu1 %v953_v0  ;;  %v64_v3 = vld [vmem:[%s1034_s1 + $0x8] sm:$0xff]  ;;  %v66_v4 = vld [vmem:[%s1034_s1 + $0x18] sm:$0xff]  ;;  %v832_v5 = vld [vmem:[#allocation3 + $0xe4] ss:$16 sps:$4 sm:$0xff]  }
   0xf   :  { %69 = vperm.xlu0 %830, %v63_v1   ;;  %79 = vperm.xlu1 %831, %v65_v2   ;;  %v834_v6 = vld [vmem:[#allocation3 + $0xec] ss:$16 sps:$4 sm:$0xff]   ;;  %v836_v7 = vld [vmem:[#allocation3 + $0xe0] ss:$16 sps:$4 sm:$0xff]   ;;  %v837_v8 = vld [vmem:[#allocation3 + $0xe8] ss:$16 sps:$4 sm:$0xff]  }
  0x10   :  { %528 = vmatprep.subr.bf16.mxu0 %v832_v5  ;;  %v838_v9 = vld [vmem:[#allocation3 + $0xc4] ss:$16 sps:$4 sm:$0xff]   ;;  %v840_v10 = vld [vmem:[#allocation3 + $0xcc] ss:$16 sps:$4 sm:$0xff]   ;;  %581 = vmatprep.subr.bf16.mxu1 %v834_v6  ;;  %v842_v11 = vld [vmem:[#allocation3 + $0xc0] ss:$16 sps:$4 sm:$0xff]   ;;  %v98_v5 = vlaneseq }
  0x11   :  { %529 = vmatpush1.bf16.msra.mxu0 %v836_v7  ;;  %v843_v12 = vld [vmem:[#allocation3 + $0xc8] ss:$16 sps:$4 sm:$0xff]   ;;  %582 = vmatpush1.bf16.msra.mxu1 %v837_v8  ;;  %v844_v13 = vld [vmem:[#allocation3 + $0xa4] ss:$16 sps:$4 sm:$0xff]   ;;  %v846_v14 = vld [vmem:[#allocation3 + $0xac] ss:$16 sps:$4 sm:$0xff]  }
  0x12   :  { %530 = vmatprep.subr.bf16.mxu0 %v838_v9  ;;  %583 = vmatprep.subr.bf16.mxu1 %v840_v10  ;;  %v848_v15 = vld [vmem:[#allocation3 + $0xa0] ss:$16 sps:$4 sm:$0xff]   ;;  %v849_v16 = vld [vmem:[#allocation3 + $0xa8] ss:$16 sps:$4 sm:$0xff]   ;;  %v850_v17 = vld [vmem:[#allocation3 + $0x84] ss:$16 sps:$4 sm:$0xff]  }
  0x13   :  { %74 = vperm.xlu0 %830, %v64_v3   ;;  %84 = vperm.xlu1 %831, %v66_v4   ;;  %v852_v18 = vld [vmem:[#allocation3 + $0x8c] ss:$16 sps:$4 sm:$0xff]   ;;  %v854_v19 = vld [vmem:[#allocation3 + $0x80] ss:$16 sps:$4 sm:$0xff]   ;;  %v855_v20 = vld [vmem:[#allocation3 + $0x88] ss:$16 sps:$4 sm:$0xff]  }
  0x14   :  { %v856_v21 = vld [vmem:[#allocation3 + $0x64] ss:$16 sps:$4 sm:$0xff]   ;;  %v858_v22 = vld [vmem:[#allocation3 + $0x6c] ss:$16 sps:$4 sm:$0xff]   ;;  %v860_v23 = vld [vmem:[#allocation3 + $0x60] ss:$16 sps:$4 sm:$0xff]  }
  0x15   :  { %531 = vmatpush1.bf16.msra.mxu0 %v842_v11  ;;  %584 = vmatpush1.bf16.msra.mxu1 %v843_v12  ;;  %v861_v24 = vld [vmem:[#allocation3 + $0x68] ss:$16 sps:$4 sm:$0xff]   ;;  %v862_v25 = vld [vmem:[#allocation3 + $0x44] ss:$16 sps:$4 sm:$0xff]   ;;  %v864_v26 = vld [vmem:[#allocation3 + $0x4c] ss:$16 sps:$4 sm:$0xff]  }
  0x16   :  { %532 = vmatprep.subr.bf16.mxu0 %v844_v13  ;;  %585 = vmatprep.subr.bf16.mxu1 %v846_v14  ;;  %v866_v27 = vld [vmem:[#allocation3 + $0x40] ss:$16 sps:$4 sm:$0xff]   ;;  %v867_v28 = vld [vmem:[#allocation3 + $0x48] ss:$16 sps:$4 sm:$0xff]   ;;  %v868_v29 = vld [vmem:[#allocation3 + $0x24] ss:$16 sps:$4 sm:$0xff]  }
  0x17   :  { %v870_v30 = vld [vmem:[#allocation3 + $0x2c] ss:$16 sps:$4 sm:$0xff]   ;;  %v872_v31 = vld [vmem:[#allocation3 + $0x20] ss:$16 sps:$4 sm:$0xff]   ;;  %v873_v32 = vld [vmem:[#allocation3 + $0x28] ss:$16 sps:$4 sm:$0xff]  }
  0x18   :  { %v874_v33 = vld [vmem:[#allocation3 + $0x4] ss:$16 sps:$4 sm:$0xff]   ;;  %v876_v34 = vld [vmem:[#allocation3 + $0xc] ss:$16 sps:$4 sm:$0xff]   ;;  %v878_v35 = vld [vmem:[#allocation3] ss:$16 sps:$4 sm:$0xff]  }
  0x19   :  { %533 = vmatpush1.bf16.msra.mxu0 %v848_v15  ;;  %586 = vmatpush1.bf16.msra.mxu1 %v849_v16  ;;  %v879_v36 = vld [vmem:[#allocation3 + $0x8] ss:$16 sps:$4 sm:$0xff]   ;;  %v880_v37 = vld [vmem:[#allocation3 + $0x1e4] ss:$16 sps:$4 sm:$0xff]   ;;  %v882_v38 = vld [vmem:[#allocation3 + $0x1ec] ss:$16 sps:$4 sm:$0xff]  }
  0x1a   :  { %534 = vmatprep.subr.bf16.mxu0 %v850_v17  ;;  %587 = vmatprep.subr.bf16.mxu1 %v852_v18  ;;  %v884_v39 = vld [vmem:[#allocation3 + $0x1e0] ss:$16 sps:$4 sm:$0xff]   ;;  %v885_v40 = vld [vmem:[#allocation3 + $0x1e8] ss:$16 sps:$4 sm:$0xff]   ;;  %v886_v41 = vld [vmem:[#allocation3 + $0x1c4] ss:$16 sps:$4 sm:$0xff]  }
  0x1b   :  { %v888_v42 = vld [vmem:[#allocation3 + $0x1cc] ss:$16 sps:$4 sm:$0xff]   ;;  %v890_v43 = vld [vmem:[#allocation3 + $0x1c0] ss:$16 sps:$4 sm:$0xff]   ;;  %v891_v44 = vld [vmem:[#allocation3 + $0x1c8] ss:$16 sps:$4 sm:$0xff]  }
  0x1c   :  { %v892_v45 = vld [vmem:[#allocation3 + $0x1a4] ss:$16 sps:$4 sm:$0xff]   ;;  %v894_v46 = vld [vmem:[#allocation3 + $0x1ac] ss:$16 sps:$4 sm:$0xff]   ;;  %v896_v47 = vld [vmem:[#allocation3 + $0x1a0] ss:$16 sps:$4 sm:$0xff]  }
  0x1d   :  { %535 = vmatpush1.bf16.msra.mxu0 %v854_v19  ;;  %588 = vmatpush1.bf16.msra.mxu1 %v855_v20  ;;  %v897_v48 = vld [vmem:[#allocation3 + $0x1a8] ss:$16 sps:$4 sm:$0xff]   ;;  %v898_v49 = vld [vmem:[#allocation3 + $0x184] ss:$16 sps:$4 sm:$0xff]   ;;  %v900_v50 = vld [vmem:[#allocation3 + $0x18c] ss:$16 sps:$4 sm:$0xff]  }
  0x1e   :  { %536 = vmatprep.subr.bf16.mxu0 %v856_v21  ;;  %589 = vmatprep.subr.bf16.mxu1 %v858_v22  ;;  %v902_v51 = vld [vmem:[#allocation3 + $0x180] ss:$16 sps:$4 sm:$0xff]   ;;  %v903_v52 = vld [vmem:[#allocation3 + $0x188] ss:$16 sps:$4 sm:$0xff]   ;;  %v904_v53 = vld [vmem:[#allocation3 + $0x164] ss:$16 sps:$4 sm:$0xff]  }
  0x1f   :  { %v906_v54 = vld [vmem:[#allocation3 + $0x16c] ss:$16 sps:$4 sm:$0xff]   ;;  %v908_v55 = vld [vmem:[#allocation3 + $0x160] ss:$16 sps:$4 sm:$0xff]   ;;  %v909_v56 = vld [vmem:[#allocation3 + $0x168] ss:$16 sps:$4 sm:$0xff]  }
  0x20   :  { %v910_v57 = vld [vmem:[#allocation3 + $0x144] ss:$16 sps:$4 sm:$0xff]   ;;  %v912_v58 = vld [vmem:[#allocation3 + $0x14c] ss:$16 sps:$4 sm:$0xff]   ;;  %v914_v59 = vld [vmem:[#allocation3 + $0x140] ss:$16 sps:$4 sm:$0xff]  }
  0x21   :  { %537 = vmatpush1.bf16.msra.mxu0 %v860_v23  ;;  %590 = vmatpush1.bf16.msra.mxu1 %v861_v24  ;;  %v915_v60 = vld [vmem:[#allocation3 + $0x148] ss:$16 sps:$4 sm:$0xff]   ;;  %v916_v61 = vld [vmem:[#allocation3 + $0x124] ss:$16 sps:$4 sm:$0xff]   ;;  %v918_v62 = vld [vmem:[#allocation3 + $0x12c] ss:$16 sps:$4 sm:$0xff]  }
  0x22   :  { %538 = vmatprep.subr.bf16.mxu0 %v862_v25  ;;  %591 = vmatprep.subr.bf16.mxu1 %v864_v26  ;;  %v920_v63 = vld [vmem:[#allocation3 + $0x120] ss:$16 sps:$4 sm:$0xff]   ;;  %v921_v0 = vld [vmem:[#allocation3 + $0x128] ss:$16 sps:$4 sm:$0xff]   ;;  %v922_v1 = vld [vmem:[#allocation3 + $0x104] ss:$16 sps:$4 sm:$0xff]  }
  0x23   :  { %v924_v2 = vld [vmem:[#allocation3 + $0x10c] ss:$16 sps:$4 sm:$0xff]   ;;  %v926_v3 = vld [vmem:[#allocation3 + $0x100] ss:$16 sps:$4 sm:$0xff]   ;;  %v927_v4 = vld [vmem:[#allocation3 + $0x108] ss:$16 sps:$4 sm:$0xff]  }
  0x24   :  { %v99_v6 = vshrl.u32 %v98_v5, 7  ;;  %v95_v7 = vld [vmem:[%s1035_s2] sm:$0x3]  ;;  %v53_v10 = vld [vmem:[%s1033_s0 + $0x10] sm:$0xff]  ;;  %v52_v16 = vld [vmem:[%s1033_s0 + $0x8] sm:$0xff] }
  0x25   :  { %539 = vmatpush1.bf16.msra.mxu0 %v866_v27  ;;  %592 = vmatpush1.bf16.msra.mxu1 %v867_v28  ;;  %v96_v8 = vunpack.c.l.bf16 %v95_v7  ;;  %v51_v11 = vld [vmem:[%s1033_s0] sm:$0xff]  ;;  %v60_v13 = vunpack.c.h.bf16 %v53_v10  ;;  %v54_v17 = vld [vmem:[%s1033_s0 + $0x18] sm:$0xff]  ;;  %v57_v23 = vunpack.c.l.bf16 %v52_v16  ;;  %v58_v24 = vunpack.c.h.bf16 %v52_v16 }
  0x26   :  { %540 = vmatprep.subr.bf16.mxu0 %v868_v29  ;;  %593 = vmatprep.subr.bf16.mxu1 %v870_v30  ;;  %v100_v9 = vsub.s32 0, %v99_v6  ;;  %v104_v12 = vsub.s32 2, %v99_v6  ;;  %v55_v15 = vunpack.c.l.bf16 %v51_v11  ;;  %v56_v18 = vunpack.c.h.bf16 %v51_v11 }
  0x27   :  { %v62_v25 = vunpack.c.h.bf16 %v54_v17 }
  0x28   :  { %v101_v14 = vrot.slane %v96_v8, %v100_v9  ;;  %v105_v19 = vrot.slane %v96_v8, %v104_v12 }
  0x29   :  { %541 = vmatpush1.bf16.msra.mxu0 %v872_v31  ;;  %594 = vmatpush1.bf16.msra.mxu1 %v873_v32 }
  0x2a   :  { %542 = vmatprep.subr.bf16.mxu0 %v874_v33  ;;  %595 = vmatprep.subr.bf16.mxu1 %v876_v34  ;;  %v111_v26 = vrot.slane %v101_v14, %v100_v9  ;;  %v115_v29 = vrot.slane %v105_v19, %v100_v9 }
  0x2d   :  { %543 = vmatpush1.bf16.msra.mxu0 %v878_v35  ;;  %596 = vmatpush1.bf16.msra.mxu1 %v879_v36 }
  0x2e   :  { %544 = vmatprep.subr.bf16.mxu0 %v880_v37  ;;  %597 = vmatprep.subr.bf16.mxu1 %v882_v38  ;;  %v59_v37 = vunpack.c.l.bf16 %v53_v10  ;;  %v61_v38 = vunpack.c.l.bf16 %v54_v17 }
  0x31   :  { %545 = vmatpush2.bf16.msra.mxu0 %v884_v39  ;;  %598 = vmatpush2.bf16.msra.mxu1 %v885_v40 }
  0x32   :  { %546 = vmatprep.subr.bf16.mxu0 %v886_v41  ;;  %599 = vmatprep.subr.bf16.mxu1 %v888_v42 }
  0x35   :  { %547 = vmatpush2.bf16.msra.mxu0 %v890_v43  ;;  %600 = vmatpush2.bf16.msra.mxu1 %v891_v44 }
  0x36   :  { %548 = vmatprep.subr.bf16.mxu0 %v892_v45  ;;  %601 = vmatprep.subr.bf16.mxu1 %v894_v46 }
  0x39   :  { %549 = vmatpush2.bf16.msra.mxu0 %v896_v47  ;;  %602 = vmatpush2.bf16.msra.mxu1 %v897_v48 }
  0x3a   :  { %550 = vmatprep.subr.bf16.mxu0 %v898_v49  ;;  %603 = vmatprep.subr.bf16.mxu1 %v900_v50 }
  0x3d   :  { %551 = vmatpush2.bf16.msra.mxu0 %v902_v51  ;;  %604 = vmatpush2.bf16.msra.mxu1 %v903_v52 }
  0x3e   :  { %552 = vmatprep.subr.bf16.mxu0 %v904_v53  ;;  %605 = vmatprep.subr.bf16.mxu1 %v906_v54 }
  0x41   :  { %553 = vmatpush2.bf16.msra.mxu0 %v908_v55  ;;  %606 = vmatpush2.bf16.msra.mxu1 %v909_v56 }
  0x42   :  { %554 = vmatprep.subr.bf16.mxu0 %v910_v57  ;;  %607 = vmatprep.subr.bf16.mxu1 %v912_v58 }
  0x45   :  { %555 = vmatpush2.bf16.msra.mxu0 %v914_v59  ;;  %608 = vmatpush2.bf16.msra.mxu1 %v915_v60 }
  0x46   :  { %556 = vmatprep.subr.bf16.mxu0 %v916_v61  ;;  %609 = vmatprep.subr.bf16.mxu1 %v918_v62 }
  0x49   :  { %557 = vmatpush2.bf16.msra.mxu0 %v920_v63  ;;  %610 = vmatpush2.bf16.msra.mxu1 %v921_v0 }
  0x4a   :  { %558 = vmatprep.subr.bf16.mxu0 %v922_v1  ;;  %611 = vmatprep.subr.bf16.mxu1 %v924_v2 }
  0x4d   :  { %559 = vmatpush2.bf16.msra.mxu0 %v926_v3  ;;  %612 = vmatpush2.bf16.msra.mxu1 %v927_v4 }
  0x8a   :  { %v70_v20 = vpop.permute.xlu0 %69  ;;  %v80_v21 = vpop.permute.xlu1 %79 }
  0x8b   :  { %v92_v22 = vmul.f32 %v80_v21, %v60_v13  ;;  %v87_v27 = vmul.f32 %v70_v20, %v55_v15  ;;  %v88_v28 = vmul.f32 %v70_v20, %v56_v18  ;;  %v91_v46 = vmul.f32 %v80_v21, %v59_v37 }
  0x8d   :  { %v121_v32 = vmul.f32 %v115_v29, %v92_v22  ;;  %v116_v36 = vmul.f32 %v111_v26, %v87_v27  ;;  %v117_v42 = vmul.f32 %v115_v29, %v88_v28  ;;  %v120_v48 = vmul.f32 %v111_v26, %v91_v46 }
  0x8e   :  { %v75_v30 = vpop.permute.xlu0 %74  ;;  %v85_v31 = vpop.permute.xlu1 %84 }
  0x8f   :  { %v89_v33 = vmul.f32 %v75_v30, %v57_v23  ;;  %v90_v34 = vmul.f32 %v75_v30, %v58_v24  ;;  %v94_v35 = vmul.f32 %v85_v31, %v62_v25  ;;  %v93_v47 = vmul.f32 %v85_v31, %v61_v38 }
  0x91   :  { %v118_v39 = vmul.f32 %v111_v26, %v89_v33  ;;  %v119_v40 = vmul.f32 %v115_v29, %v90_v34  ;;  %v123_v41 = vmul.f32 %v115_v29, %v94_v35  ;;  %v122_v49 = vmul.f32 %v111_v26, %v93_v47 }
  0x93   :  { %v125_v43 = vpack.c.bf16 %v119_v40, %v117_v42  ;;  %v124_v44 = vpack.c.bf16 %v118_v39, %v116_v36  ;;  %v127_v45 = vpack.c.bf16 %v123_v41, %v121_v32  ;;  %v126_v50 = vpack.c.bf16 %v122_v49, %v120_v48 }
  0x95   :  { %560 = vmatprep.mubr.bf16.mxu0 %v125_v43  ;;  %613 = vmatprep.mubr.bf16.mxu1 %v125_v43 }
  0x96   :  { %561 = vmatmul.mubr.bf16.vlgmr.msra.gmra.mxu0 %v124_v44  ;;  %614 = vmatmul.mubr.bf16.vlgmr.msra.gmra.mxu1 %v124_v44 }
  0x97   :  { %570 = vmatprep.mubr.bf16.mxu0 %v127_v45  ;;  %623 = vmatprep.mubr.bf16.mxu1 %v127_v45 }
  0x9e   :  { %571 = vmatmul.mubr.bf16.gmra.mxu0 %v126_v50  ;;  %624 = vmatmul.mubr.bf16.gmra.mxu1 %v126_v50 }
 0x156   :  { %v562_v51 = vpop.f32.mrf.mxu0  ;;  %v615_v52 = vpop.f32.mrf.mxu1 }
 0x158   :  { %v564_v53 = vpop.f32.mrf.mxu0  ;;  %v617_v54 = vpop.f32.mrf.mxu1 }
 0x159   :  { %v818_v55 = vpack.c.bf16 %v564_v53, %v562_v51  ;;  %v819_v56 = vpack.c.bf16 %v617_v54, %v615_v52 }
 0x15a   :  { %v566_v57 = vpop.f32.mrf.mxu0  ;;  %v619_v58 = vpop.f32.mrf.mxu1 }
 0x15b   :  { %733 = vst [vmem:[%s1037_s4] sm:$0xff] %v818_v55  ;;  %734 = vst [vmem:[%s1037_s4 + $0x8] sm:$0xff] %v819_v56 }
 0x15c   :  { %v568_v59 = vpop.f32.mrf.mxu0  ;;  %v621_v60 = vpop.f32.mrf.mxu1 }
 0x15d   :  { %v820_v61 = vpack.c.bf16 %v568_v59, %v566_v57  ;;  %v821_v62 = vpack.c.bf16 %v621_v60, %v619_v58 }
 0x15e   :  { %v572_v63 = vpop.f32.mrf.mxu0  ;;  %v625_v0 = vpop.f32.mrf.mxu1 }
 0x15f   :  { %735 = vst [vmem:[%s1037_s4 + $0x10] sm:$0xff] %v820_v61  ;;  %736 = vst [vmem:[%s1037_s4 + $0x18] sm:$0xff] %v821_v62 }
 0x160   :  { %v574_v1 = vpop.f32.mrf.mxu0  ;;  %v627_v2 = vpop.f32.mrf.mxu1 }
 0x161   :  { %v822_v3 = vpack.c.bf16 %v574_v1, %v572_v63  ;;  %v823_v4 = vpack.c.bf16 %v627_v2, %v625_v0 }
 0x162   :  { %v576_v5 = vpop.f32.mrf.mxu0  ;;  %v629_v6 = vpop.f32.mrf.mxu1 }
 0x163   :  { %737 = vst [vmem:[%s1037_s4 + $0x20] sm:$0xff] %v822_v3  ;;  %738 = vst [vmem:[%s1037_s4 + $0x28] sm:$0xff] %v823_v4 }
 0x164   :  { %v578_v7 = vpop.f32.mrf.mxu0  ;;  %v631_v8 = vpop.f32.mrf.mxu1 }
 0x165   :  { %v824_v9 = vpack.c.bf16 %v578_v7, %v576_v5  ;;  %v825_v10 = vpack.c.bf16 %v631_v8, %v629_v6 }
 0x167   :  { %739 = vst [vmem:[%s1037_s4 + $0x30] sm:$0xff] %v824_v9  ;;  %740 = vst [vmem:[%s1037_s4 + $0x38] sm:$0xff] %v825_v10 }
 0x168   :  { %745 = vsyncpa [#allocation4], 1 }

// kernel: mistral_upsampler_forward.21
= control target key start
LH: loop header
LB: loop body
LE: loop exit
PB: predicated region body
PF: predicated region fallthrough
CT: control target
= control target key end

     0   :  { %s1300_s18 = smov 0   ;;  %s1302_s19 = smov 0   ;;  %s1476_s0 = inlined_call_operand.vmem [shape: bf16[2,16,512], index: 0, kind: input, shape index: {}, may-alias: {0,2}]   ;;  %s1477_s1 = inlined_call_operand.vmem [shape: bf16[2,16,128], index: 1, kind: input, shape index: {}]   ;;  %s1478_s2 = inlined_call_operand.vmem [shape: bf16[2,16,512], index: 2, kind: input, shape index: {}, may-alias: {0,2}]   ;;  %s1479_s3 = inlined_call_operand.vmem [shape: f32[16,128], index: 3, kind: input, shape index: {}]   ;;  %s1480_s4 = inlined_call_operand.vmem [shape: f32[16,128], index: 4, kind: input, shape index: {}]   ;;  %s1481_s5 = inlined_call_operand.vmem [shape: bf16[2,16,256], index: 5, kind: output, shape index: {}]  }
   0x1   :  { %s1304_s20 = smov 0   ;;  %s1306_s21 = smov 0  }
   0x2   :  { %s1308_s22 = smov 0   ;;  %s1310_s23 = smov 0  }
   0x3   :  { %s1312_s24 = smov 0   ;;  %s1314_s25 = smov 0  }
   0x4   :  { %s1316_s26 = smov 0  }
   0x5 LB: > { %s40_s27 = sadd.s32 1, %s1255_s24  ;;  %s48_s28 = sadd.s32 1, %s1259_s25  ;;  %s1263_s26 = sphi %s1316_s26, %s15_s26   ;;  %s1259_s25 = sphi %s1314_s25, %s1498_s25   ;;  %s1255_s24 = sphi %s1312_s24, %s1497_s24   ;;  %s1251_s23 = sphi %s1310_s23, %s1496_s23   ;;  %s1247_s22 = sphi %s1308_s22, %s1495_s22   ;;  %s1243_s21 = sphi %s1306_s21, %s1494_s21   ;;  %s1239_s20 = sphi %s1304_s20, %s1493_s20   ;;  %s1235_s19 = sphi %s1302_s19, %s1492_s19   ;;  %s1231_s18 = sphi %s1300_s18, %s1491_s18  }
   0x6   : > { %p42_p0 = scmp.ge.s32.totalorder %s40_s27, 2  ;;  %s1025_s29 = sadd.s32 4294967295, %s1263_s26  }
   0x7   : > { %p70_p1 = scmp.ne.s32.totalorder %s1243_s21, %s1239_s20  ;;  %s63_s30 = sadd.s32 1, %s1243_s21 }
   0x8   : > { %s1500_s27 = smov (%p42_p0, %s40_s27), 0  ;;  %s1502_s28 = smov (!%p42_p0, %s48_s28), %s1259_s25 }
   0x9   : > { %1484 = sst [smem:[#allocation9_spill]] %s1500_s27  ;;  %p71_p2 = scmp.eq.s32.totalorder %s1263_s26, 0 }
   0xa   : > { %p50_p3 = scmp.ge.s32.totalorder %s1502_s28, 2  ;;  %s59_s6 = ssub.s32 %s1255_s24, %s1500_s27 }
   0xb   : > { %p1360_p4 = por %p71_p2, %p70_p1  ;;  %p140_p5 = scmp.ne.s32.totalorder %s1235_s19, %s1231_s18 }
   0xc   : > { %s1504_s28 = smov (%p50_p3, %s1502_s28), 0  ;;  %p230_p7 = scmp.eq.s32.totalorder %s1025_s29, 3 }
   0xd   : > { %1486 = sst [smem:[#allocation10_spill]] %s1504_s28  ;;  %p1368_p6 = por %p140_p5, %p71_p2 }
   0xe   : > { %s56_s9 = ssub.s32 %s1259_s25, %s1504_s28  ;;  %s133_s10 = sadd.s32 1, %s1235_s19 }
   0xf   : > { %s60_s11 = sor.u32 %s59_s6, %s56_s9  ;;  %p131_p8 = scmp.eq.s32.totalorder %s56_s9, 0 }
  0x10   : > { %p61_p9 = scmp.eq.s32.totalorder %s60_s11, 0  ;;  %p1378_p10 = por %p230_p7, %p70_p1 }
  0x11   : > { %s1383_s13 = scalar_select %p131_p8, %s1235_s19, %s133_s10  }
  0x12   : > { %s1386_s14 = scalar_select %p61_p9, %s1243_s21, %s63_s30  }
  0x13   : > { %p1030_p11 = scmp.ge.s32.totalorder %s1263_s26, 4 }
  0x15   : > { %270 = sbr.rel (%p1030_p11) target bundleno = 38 (0x26), region = 24 }
  0x1a   : > { %273 = sbr.rel (!%p1360_p4) target bundleno = 33 (0x21), region = 28  ;;  %s275_s15 = sand.u32 (%p1360_p4), 1, %s1243_s21  }
  0x1b   : > { %s1032_s16 = sshll.u32 (%p1360_p4), %s1259_s25, 3  ;;  %s1031_s17 = sshll.u32 (%p1360_p4), %s275_s15, 3 }
  0x1c   : > { %s284_s29 = sadd.s32 (%p1360_p4), %s1255_s24, %s1032_s16  ;;  %s277_s30 = scalar_lea.vmem (%p1360_p4), [#allocation6], %s1031_s17 }
  0x1d   : > { %s1033_s6 = sshll.u32 (%p1360_p4), %s284_s29, 2 }
  0x1e   : > { %s286_s10 = scalar_lea.vmem (%p1360_p4), %s1476_s0, %s1033_s6 }
  0x1f   : > { %v303_v0 = vld [vmem:[%s286_s10] sm:$0xf]  ;;  %v305_v1 = vld [vmem:[%s286_s10 + $0x10] sm:$0xf] }
  0x20   : > { %304 = vst [vmem:[%s277_s30] sm:$0xf] %v303_v0  ;;  %306 = vst [vmem:[%s277_s30 + $0x4] sm:$0xf] %v305_v1 }
  0x21 PF: > { %354 = sbr.rel (!%p1368_p6) target bundleno = 38 (0x26), region = 73  ;;  %s356_s7 = sand.u32 (%p1368_p6), 1, %s1235_s19  }
  0x22   : > { %s1058_s28 = sshll.u32 (%p1368_p6), %s1259_s25, 5  ;;  %s1034_s15 = sshll.u32 (%p1368_p6), %s356_s7, 3 }
  0x23   : > { %s900_s27 = scalar_lea.vmem (%p1368_p6), %s1478_s2, %s1058_s28  ;;  %s358_s6 = scalar_lea.vmem (%p1368_p6), [#allocation7], %s1034_s15 }
  0x24   : > { %v1037_v2 = vld [vmem:[%s900_s27 + $0xc] sm:$0xf] (%p1368_p6)  ;;  %v1038_v3 = vld [vmem:[%s900_s27 + $0x1c] sm:$0xf] (%p1368_p6) }
  0x25   : > { %386 = vst [vmem:[%s358_s6] sm:$0xf] (%p1368_p6), %v1037_v2  ;;  %388 = vst [vmem:[%s358_s6 + $0x4] sm:$0xf] (%p1368_p6), %v1038_v3 }
  0x26 PF: > { %p1039_p12 = scmp.ge.s32.totalorder %s1263_s26, 1  ;;  %p415_p13 = scmp.lt.s32.totalorder %s1263_s26, 5 }
  0x28   : > { %p416_p0 = pnand %p1039_p12, %p415_p13 }
  0x29   : > { %s422_s8 = sand.u32 (!%p416_p0), 1, %s1239_s20   ;;  %p489_p1 = scmp.lt.s32.totalorder (!%p416_p0), %s1251_s23, 1 }
  0x2a   : > { %419 = sbr.rel (%p416_p0) target bundleno = 969 (0x3c9), region = 114  ;;  %s1407_s17 = sshll.u32 (!%p416_p0), %s422_s8, 3 }
  0x2b   : > { %s424_s27 = scalar_lea.vmem (!%p416_p0), [#allocation6], %s1407_s17  ;;  %s1265_s7 = smov (!%p416_p0), 64  }
  0x2f   : > { %v1065_v4 = vld [vmem:[%s424_s27] sm:$0xff]   ;;  %s490_s28 = scalar_select %p489_p1, %s1251_s23, 1  ;;  %v1266_v9 = vmov 0.0   ;;  %vm1267_vm0 = vmmov 0   ;;  %v539_v10 = vlaneseq  ;;  %v531_v13 = vld [vmem:[%s1479_s3] sm:$0xff]  ;;  %vm564_vm2 = vcmask 7168  }
  0x30   : > { %v1066_v5 = vunpack.c.l.bf16 %v1065_v4  ;;  %v1067_v6 = vunpack.c.h.bf16 %v1065_v4  ;;  %1082 = vmatprep.subr.bf16.mxu0 %v1266_v9  ;;  %1088 = vmatprep.subr.bf16.mxu1 %v1266_v9  ;;  %v532_v14 = vld [vmem:[%s1479_s3 + $0x8] sm:$0xff]  ;;  %v533_v17 = vld [vmem:[%s1480_s4] sm:$0xff]  ;;  %v1268_v33 = vmov -inf   ;;  %567 = vst.msk [vmem:[#allocation4] sm:$0xff] %vm564_vm2, %v1266_v9  ;;  %568 = vst.msk [vmem:[#allocation4 + $0x8] sm:$0xff] %vm564_vm2, %v1266_v9  ;;  %vm651_vm4 = vcmask 130048  }
  0x31   : > { %s1059_s9 = sshll.u32 %s490_s28, 3  ;;  %1084 = vmatprep.mubr.msk.bf16.mxu0 %vm1267_vm0, %v1266_v9  ;;  %1090 = vmatprep.mubr.msk.bf16.mxu1 %vm1267_vm0, %v1266_v9  ;;  %v540_v11 = vand.u32 127, %v539_v10  ;;  %v534_v18 = vld [vmem:[%s1480_s4 + $0x8] sm:$0xff]  ;;  %565 = vst.msk [vmem:[#allocation3] sm:$0xff] %vm564_vm2, %v1268_v33  ;;  %566 = vst.msk [vmem:[#allocation3 + $0x8] sm:$0xff] %vm564_vm2, %v1268_v33  ;;  %v636_v34 = vshrl.u32 %v539_v10, 7 }
  0x32   : > { %v1171_v7 = vpack.i.bf16 %v1067_v6, %v1066_v5  ;;  %s499_s30 = scalar_lea.vmem %s1477_s1, %s1059_s9  ;;  %v547_v21 = vmul.f32 %v1067_v6, %v532_v14  ;;  %v546_v22 = vmul.f32 %v1066_v5, %v531_v13  ;;  %v1269_v44 = vmov 0   ;;  %s429_s9 = sand.u32 1, %s1231_s18  }
  0x33   : > { %v1178_v8 = vld [vmem:[%s499_s30] sm:$0xff]   ;;  %vm541_vm1 = vcmp.lt.s32.totalorder %v540_v11, 64  ;;  %vm645_vm3 = vcmp.ge.s32.totalorder %v636_v34, %v540_v11  ;;  %v637_v35 = vadd.s32 8, %v636_v34  ;;  %1176 = vset.pattern.permute.xlu1 %v1269_v44  ;;  %1177 = vset.pattern.permute.xlu0 %v1269_v44  ;;  %s1041_s11 = sshll.u32 %s429_s9, 3  ;;  %s482_s18 = scalar_lea.vmem [#allocation8], %s1407_s17 }
  0x34   : > { %1172 = vrot.lane.b32.xlu0 %v1171_v7, %s1265_s7  ;;  %1083 = vmatpush3.bf16.xpose.msra.mxu0 %v1178_v8  ;;  %s431_s10 = scalar_lea.vmem [#allocation7], %s1041_s11  ;;  %s1054_s30 = sshll.u32 (%p1378_p10), %s1251_s23, 2 }
  0x35   : > { %vm646_vm5 = vcmp.ge.s32.totalorder %v637_v35, %v540_v11  ;;  %v1180_v53 = vld [vmem:[%s431_s10] sm:$0xff]   ;;  %s814_s7 = sadd.s32 (%p1378_p10), %s1247_s22, %s1054_s30 }
  0x36   : > { %1089 = vmatpush3.bf16.msra.mxu1 %v1180_v53  ;;  %s1055_s20 = sshll.u32 (%p1378_p10), %s814_s7, 2 }
  0x37   : > { %v682_v5 = vld [vmem:[#allocation4] sm:$0xff]  ;;  %v683_v8 = vld [vmem:[#allocation4 + $0x8] sm:$0xff]  ;;  %s816_s29 = scalar_lea.vmem (%p1378_p10), %s1481_s5, %s1055_s20 }
  0x38   : > { %v649_v45 = vld [vmem:[#allocation3] sm:$0xff]  ;;  %v650_v48 = vld [vmem:[#allocation3 + $0x8] sm:$0xff] }
  0xa6   : > { %v1173_v12 = vpop.permute.xlu0 %1172 }
  0xa7   : > { %v1175_v15 = vunpack.i.h.bf16 %v1173_v12  ;;  %v1174_v16 = vunpack.i.l.bf16 %v1173_v12 }
  0xa9   : > { %v543_v19 = vsub.f32 0.0, %v1175_v15  ;;  %v542_v20 = vsub.f32 0.0, %v1174_v16 }
  0xab   : > { %v545_v23 = vsel %vm541_vm1, %v543_v19, %v1175_v15  ;;  %v544_v24 = vsel %vm541_vm1, %v542_v20, %v1174_v16 }
  0xac   : > { %v549_v25 = vmul.f32 %v545_v23, %v534_v18  ;;  %v548_v26 = vmul.f32 %v544_v24, %v533_v17 }
  0xae   : > { %v551_v27 = vadd.f32 %v549_v25, %v547_v21  ;;  %v550_v28 = vadd.f32 %v548_v26, %v546_v22 }
  0xb0   : > { %v553_v29 = vmul.f32 0.088388346, %v551_v27  ;;  %v552_v30 = vmul.f32 0.088388346, %v550_v28 }
  0xb2   : > { %v1071_v31 = vpack.c.bf16 %v553_v29, %v552_v30 }
  0xb4   : > { %1072 = vst [vmem:[#allocation2] sm:$0xff] %v1071_v31  }
  0xbb   : > { %v1179_v32 = vld [vmem:[#allocation2] sm:$0xff]  }
  0xbc   : > { %1085 = vmatmul.mubr.bf16.vlgmr.msra.gmra.mxu0 %v1179_v32 }
 0x17c   : > { %v628_v36 = vpop.f32.mrf.mxu0 }
 0x17d   : > { %v647_v37 = vsel %vm645_vm3, %v628_v36, -1e+30 }
 0x17e   : > { %v1086_v38 = vpop.f32.mrf.mxu0  ;;  %v652_v39 = vsel %vm651_vm4, %v647_v37, -inf }
 0x17f   : > { %653 = vmax.xlane.f32.xlu0 %v652_v39 }
 0x180   : > { %v631_v40 = vpop.f32.mrf.mxu0 }
 0x181   : > { %v648_v41 = vsel %vm646_vm5, %v631_v40, -1e+30 }
 0x182   : > { %v1087_v42 = vpop.f32.mrf.mxu0  ;;  %v655_v43 = vsel %vm651_vm4, %v648_v41, -inf }
 0x183   : > { %656 = vmax.xlane.f32.xlu1 %v655_v43 }
 0x208   : > { %v654_v46 = vpop.xlane.xlu0 %653 }
 0x209   : > { %v658_v47 = vmax.f32 %v649_v45, %v654_v46 }
 0x20b   : > { %v660_v49 = vsub.f32 %v649_v45, %v658_v47  ;;  %768 = vst.msk [vmem:[#allocation3] sm:$0xff] %vm564_vm2, %v658_v47  ;;  %668 = vperm.xlu1 %1176, %v658_v47  }
 0x20c   : > { %v657_v50 = vpop.xlane.xlu1 %656 }
 0x20d   : > { %v659_v51 = vmax.f32 %v650_v48, %v657_v50  ;;  %v662_v2 = vmul.f32 1.442695, %v660_v49 }
 0x20f   : > { %v661_v52 = vsub.f32 %v650_v48, %v659_v51  ;;  %769 = vst.msk [vmem:[#allocation3 + $0x8] sm:$0xff] %vm564_vm2, %v659_v51  ;;  %673 = vperm.xlu1 %1176, %v659_v51  }
 0x211   : > { %v664_v61 = vmul.f32 1.442695, %v661_v52 }
 0x286   : > { %v669_v54 = vpop.permute.xlu1 %668 }
 0x287   : > { %v676_v55 = vsub.f32 %v647_v37, %v669_v54 }
 0x289   : > { %v678_v56 = vmul.f32 1.442695, %v676_v55 }
 0x28a   : > { %v674_v57 = vpop.permute.xlu1 %673 }
 0x28b   : > { %1181 = vpow2.f32 %v678_v56  ;;  %v677_v58 = vsub.f32 %v648_v41, %v674_v57 }
 0x28d   : > { %v680_v59 = vmul.f32 1.442695, %v677_v58 }
 0x28f   : > { %1183 = vpow2.f32 %v680_v59 }
 0x290   : > { %1185 = vpow2.f32 %v664_v61 }
 0x291   : > { %1187 = vpow2.f32 %v662_v2 }
 0x298   : > { %v1182_v60 = vpop.eup %1181 }
 0x299   : > { %v686_v62 = vsel %vm651_vm4, %v1182_v60, 0.0 }
 0x29a   : > { %687 = vadd.xlane.f32.xlu1 %v686_v62 }
 0x29c   : > { %v1184_v63 = vpop.eup %1183 }
 0x29d   : > { %v689_v0 = vsel %vm651_vm4, %v1184_v63, 0.0  ;;  %v711_v1 = vpack.c.bf16 %v1184_v63, %v1182_v60  ;;  %v1186_v3 = vpop.eup %1185 }
 0x29e   : > { %690 = vadd.xlane.f32.xlu0 %v689_v0  ;;  %v1188_v4 = vpop.eup %1187  ;;  %v685_v10 = vmul.f32 %v1186_v3, %v683_v8 }
 0x29f   : > { %1091 = vmatmul.mubr.msk.bf16.vlgmr.msra.gmra.mxu1 %vm651_vm4, %v711_v1  ;;  %v684_v6 = vmul.f32 %v1188_v4, %v682_v5 }
 0x2ab   : > { %706 = vperm.xlu1 %1176, %v1186_v3  }
 0x2b4   : > { %701 = vperm.xlu0 %1177, %v1188_v4  }
 0x323   : > { %v688_v7 = vpop.xlane.xlu1 %687 }
 0x324   : > { %v692_v9 = vadd.f32 %v688_v7, %v684_v6 }
 0x326   : > { %695 = vst.msk [vmem:[#allocation4] sm:$0xff] %vm564_vm2, %v692_v9 }
 0x327   : > { %v691_v11 = vpop.xlane.xlu0 %690  ;;  %v707_v21 = vpop.permute.xlu1 %706 }
 0x328   : > { %v693_v12 = vadd.f32 %v691_v11, %v685_v10  ;;  %v710_v24 = vmul.f32 0.0, %v707_v21 }
 0x32a   : > { %696 = vst.msk [vmem:[#allocation4 + $0x8] sm:$0xff] %vm564_vm2, %v693_v12 }
 0x32d   : > { %v775_v13 = vld [vmem:[#allocation4] sm:$0xff] }
 0x32e   : > { %1189 = vrcp.f32 %v775_v13 }
 0x32f   : > { %v702_v22 = vpop.permute.xlu0 %701 }
 0x330   : > { %v709_v25 = vmul.f32 0.0, %v702_v22 }
 0x331   : > { %v776_v14 = vld [vmem:[#allocation4 + $0x8] sm:$0xff] }
 0x332   : > { %1191 = vrcp.f32 %v776_v14 }
 0x33b   : > { %v1190_v15 = vpop.eup %1189 }
 0x33c   : > { %781 = vperm.xlu1 %1176, %v1190_v15  }
 0x33f   : > { %v1192_v16 = vpop.eup %1191 }
 0x340   : > { %786 = vperm.xlu1 %1176, %v1192_v16  }
 0x35f   : > { %v757_v17 = vpop.f32.mrf.mxu1 }
 0x360   : > { %v764_v26 = vadd.f32 %v757_v17, %v709_v25 }
 0x361   : > { %v1092_v18 = vpop.f32.mrf.mxu1 }
 0x363   : > { %v760_v19 = vpop.f32.mrf.mxu1 }
 0x364   : > { %v765_v27 = vadd.f32 %v760_v19, %v710_v24 }
 0x365   : > { %v1093_v20 = vpop.f32.mrf.mxu1 }
 0x3b7   : > { %v782_v23 = vpop.permute.xlu1 %781 }
 0x3b8   : > { %v789_v29 = vmul.f32 %v782_v23, %v764_v26 }
 0x3bb   : > { %v787_v28 = vpop.permute.xlu1 %786 }
 0x3bc   : > { %v790_v30 = vmul.f32 %v787_v28, %v765_v27  ;;  %807 = sbr.rel (!%p1378_p10) target bundleno = 969 (0x3c9), region = 138 }
 0x3be   : > { %v1076_v31 = vpack.c.bf16 %v790_v30, %v789_v29 }
 0x3c0   : > { %1077 = vst [vmem:[%s482_s18] sm:$0xff] %v1076_v31  }
 0x3c7   : > { %v833_v32 = vld [vmem:[%s482_s18] sm:$0xf]  ;;  %v835_v33 = vld [vmem:[%s482_s18 + $0x4] sm:$0xf] }
 0x3c8   : > { %834 = vst [vmem:[%s816_s29] sm:$0xf] %v833_v32  ;;  %836 = vst [vmem:[%s816_s29 + $0x8] sm:$0xf] %v835_v33 }
 0x3c9 PF: > { %s15_s26 = sadd.s32 1, %s1263_s26   ;;  %s1489_s12 = sld [smem:[#allocation9_spill]] }
 0x3ca   : > { %p12_p2 = scmp.ge.s32.totalorder %s15_s26, 6   ;;  %s1490_s17 = sld [smem:[#allocation10_spill]] }
 0x3cb   : > { %s1491_s18 = smov %s1235_s19  ;;  %s1492_s19 = smov %s1383_s13 }
 0x3cc   : > { %s1493_s20 = smov %s1243_s21  ;;  %s1494_s21 = smov %s1386_s14 }
 0x3cd   : > { %s1495_s22 = smov %s1255_s24  ;;  %s1496_s23 = smov %s1259_s25 }
 0x3ce   :  { %14 = sbr.rel (!%p12_p2) target bundleno = 5 (0x5), region = 227 }
 0x3cf   : > { %s1497_s24 = smov %s1489_s12 }
 0x3d0   : > { %s1498_s25 = smov %s1490_s17 }

// kernel: mistral_upsampler_forward.22
= control target key start
LH: loop header
LB: loop body
LE: loop exit
PB: predicated region body
PF: predicated region fallthrough
CT: control target
= control target key end

     0   :  { %s664_s1 = inlined_call_operand.vmem [shape: bf16[256,256], index: 1, kind: input, shape index: {}]   ;;  %s665_s0 = inlined_call_operand.vmem [shape: bf16[32,256], index: 0, kind: input, shape index: {}]   ;;  %s666_s2 = inlined_call_operand.vmem [shape: bf16[32,256], index: 2, kind: input, shape index: {}]   ;;  %s667_s3 = inlined_call_operand.vmem [shape: bf16[32,256], index: 3, kind: output, shape index: {}]  }
   0x1   :  { %v458_v0 = vld [vmem:[%s664_s1 + $0x74] ss:$8 sps:$4 sm:$0xff]   ;;  %v460_v1 = vld [vmem:[%s664_s1 + $0x70] ss:$8 sps:$4 sm:$0xff]   ;;  %v461_v2 = vld [vmem:[%s664_s1 + $0x64] ss:$8 sps:$4 sm:$0xff]  }
   0x2   :  { %250 = vmatprep.subr.bf16.mxu0 %v458_v0  ;;  %426 = vmatprep.subr.bf16.mxu1 %v458_v0  ;;  %v463_v3 = vld [vmem:[%s664_s1 + $0x60] ss:$8 sps:$4 sm:$0xff]   ;;  %v464_v4 = vld [vmem:[%s664_s1 + $0x54] ss:$8 sps:$4 sm:$0xff]   ;;  %v466_v5 = vld [vmem:[%s664_s1 + $0x50] ss:$8 sps:$4 sm:$0xff]  }
   0x3   :  { %251 = vmatpush1.bf16.msra.mxu0 %v460_v1  ;;  %442 = vmatpush1.bf16.msra.mxu1 %v460_v1  ;;  %v467_v6 = vld [vmem:[%s664_s1 + $0x44] ss:$8 sps:$4 sm:$0xff]   ;;  %v469_v7 = vld [vmem:[%s664_s1 + $0x40] ss:$8 sps:$4 sm:$0xff]   ;;  %v470_v8 = vld [vmem:[%s664_s1 + $0x34] ss:$8 sps:$4 sm:$0xff]  }
   0x4   :  { %252 = vmatprep.subr.bf16.mxu0 %v461_v2  ;;  %427 = vmatprep.subr.bf16.mxu1 %v461_v2  ;;  %v472_v9 = vld [vmem:[%s664_s1 + $0x30] ss:$8 sps:$4 sm:$0xff]   ;;  %v473_v10 = vld [vmem:[%s664_s1 + $0x24] ss:$8 sps:$4 sm:$0xff]   ;;  %v475_v11 = vld [vmem:[%s664_s1 + $0x20] ss:$8 sps:$4 sm:$0xff]  }
   0x5   :  { %v476_v12 = vld [vmem:[%s664_s1 + $0x14] ss:$8 sps:$4 sm:$0xff]   ;;  %v508_v13 = vld [vmem:[%s665_s0 + $0x4] ss:$8 sps:$4 sm:$0xff]   ;;  %v478_v14 = vld [vmem:[%s664_s1 + $0x10] ss:$8 sps:$4 sm:$0xff]  }
   0x6   :  { %v511_v15 = vld [vmem:[%s665_s0 + $0x14] ss:$8 sps:$4 sm:$0xff]   ;;  %v479_v16 = vld [vmem:[%s664_s1 + $0x4] ss:$8 sps:$4 sm:$0xff]   ;;  %282 = vmatprep.mubr.bf16.mxu0 %v508_v13  ;;  %v481_v17 = vld [vmem:[%s664_s1] ss:$8 sps:$4 sm:$0xff]  }
   0x7   :  { %253 = vmatpush1.bf16.msra.mxu0 %v463_v3  ;;  %443 = vmatpush1.bf16.msra.mxu1 %v463_v3  ;;  %v482_v18 = vld [vmem:[%s664_s1 + $0xf4] ss:$8 sps:$4 sm:$0xff]   ;;  %v484_v19 = vld [vmem:[%s664_s1 + $0xf0] ss:$8 sps:$4 sm:$0xff]   ;;  %v485_v20 = vld [vmem:[%s664_s1 + $0xe4] ss:$8 sps:$4 sm:$0xff]  }
   0x8   :  { %254 = vmatprep.subr.bf16.mxu0 %v464_v4  ;;  %428 = vmatprep.subr.bf16.mxu1 %v464_v4  ;;  %v487_v21 = vld [vmem:[%s664_s1 + $0xe0] ss:$8 sps:$4 sm:$0xff]   ;;  %v488_v22 = vld [vmem:[%s664_s1 + $0xd4] ss:$8 sps:$4 sm:$0xff]   ;;  %v490_v23 = vld [vmem:[%s664_s1 + $0xd0] ss:$8 sps:$4 sm:$0xff]  }
   0x9   :  { %292 = vmatprep.mubr.bf16.mxu1 %v511_v15  ;;  %v491_v24 = vld [vmem:[%s664_s1 + $0xc4] ss:$8 sps:$4 sm:$0xff]   ;;  %v493_v25 = vld [vmem:[%s664_s1 + $0xc0] ss:$8 sps:$4 sm:$0xff]   ;;  %v494_v26 = vld [vmem:[%s664_s1 + $0xb4] ss:$8 sps:$4 sm:$0xff]  }
   0xa   :  { %v496_v27 = vld [vmem:[%s664_s1 + $0xb0] ss:$8 sps:$4 sm:$0xff]   ;;  %v497_v28 = vld [vmem:[%s664_s1 + $0xa4] ss:$8 sps:$4 sm:$0xff]   ;;  %v499_v29 = vld [vmem:[%s664_s1 + $0xa0] ss:$8 sps:$4 sm:$0xff]  }
   0xb   :  { %255 = vmatpush1.bf16.msra.mxu0 %v466_v5  ;;  %444 = vmatpush1.bf16.msra.mxu1 %v466_v5  ;;  %v500_v30 = vld [vmem:[%s664_s1 + $0x94] ss:$8 sps:$4 sm:$0xff]   ;;  %v502_v31 = vld [vmem:[%s664_s1 + $0x90] ss:$8 sps:$4 sm:$0xff]   ;;  %v503_v32 = vld [vmem:[%s664_s1 + $0x84] ss:$8 sps:$4 sm:$0xff]  }
   0xc   :  { %256 = vmatprep.subr.bf16.mxu0 %v467_v6  ;;  %429 = vmatprep.subr.bf16.mxu1 %v467_v6  ;;  %v505_v33 = vld [vmem:[%s664_s1 + $0x80] ss:$8 sps:$4 sm:$0xff]   ;;  %v509_v35 = vld [vmem:[%s665_s0 + $0x10] ss:$8 sps:$4 sm:$0xff]  }
   0xd   :  { %v506_v34 = vld [vmem:[%s665_s0] ss:$8 sps:$4 sm:$0xff]   ;;  %v332_v37 = vld [vmem:[%s666_s2 + $0x10] sm:$0xff]  ;;  %v333_v43 = vld [vmem:[%s666_s2 + $0x18] sm:$0xff] }
   0xe   :  { %v330_v36 = vld [vmem:[%s666_s2] sm:$0xff]  ;;  %v338_v39 = vunpack.c.l.bf16 %v332_v37  ;;  %v339_v41 = vunpack.c.h.bf16 %v332_v37  ;;  %v331_v42 = vld [vmem:[%s666_s2 + $0x8] sm:$0xff]  ;;  %v340_v49 = vunpack.c.l.bf16 %v333_v43  ;;  %v341_v51 = vunpack.c.h.bf16 %v333_v43 }
   0xf   :  { %257 = vmatpush1.bf16.msra.mxu0 %v469_v7  ;;  %445 = vmatpush1.bf16.msra.mxu1 %v469_v7  ;;  %v334_v38 = vunpack.c.l.bf16 %v330_v36  ;;  %v335_v40 = vunpack.c.h.bf16 %v330_v36  ;;  %v336_v48 = vunpack.c.l.bf16 %v331_v42  ;;  %v337_v50 = vunpack.c.h.bf16 %v331_v42 }
  0x10   :  { %258 = vmatprep.subr.bf16.mxu0 %v470_v8  ;;  %430 = vmatprep.subr.bf16.mxu1 %v470_v8 }
  0x13   :  { %259 = vmatpush1.bf16.msra.mxu0 %v472_v9  ;;  %446 = vmatpush1.bf16.msra.mxu1 %v472_v9 }
  0x14   :  { %260 = vmatprep.subr.bf16.mxu0 %v473_v10  ;;  %431 = vmatprep.subr.bf16.mxu1 %v473_v10 }
  0x17   :  { %261 = vmatpush1.bf16.msra.mxu0 %v475_v11  ;;  %447 = vmatpush1.bf16.msra.mxu1 %v475_v11 }
  0x18   :  { %262 = vmatprep.subr.bf16.mxu0 %v476_v12  ;;  %432 = vmatprep.subr.bf16.mxu1 %v476_v12 }
  0x1b   :  { %263 = vmatpush1.bf16.msra.mxu0 %v478_v14  ;;  %448 = vmatpush1.bf16.msra.mxu1 %v478_v14 }
  0x1c   :  { %264 = vmatprep.subr.bf16.mxu0 %v479_v16  ;;  %433 = vmatprep.subr.bf16.mxu1 %v479_v16 }
  0x1f   :  { %265 = vmatpush1.bf16.msra.mxu0 %v481_v17  ;;  %449 = vmatpush1.bf16.msra.mxu1 %v481_v17 }
  0x20   :  { %266 = vmatprep.subr.bf16.mxu0 %v482_v18  ;;  %434 = vmatprep.subr.bf16.mxu1 %v482_v18 }
  0x23   :  { %267 = vmatpush2.bf16.msra.mxu0 %v484_v19  ;;  %450 = vmatpush2.bf16.msra.mxu1 %v484_v19 }
  0x24   :  { %268 = vmatprep.subr.bf16.mxu0 %v485_v20  ;;  %435 = vmatprep.subr.bf16.mxu1 %v485_v20 }
  0x27   :  { %269 = vmatpush2.bf16.msra.mxu0 %v487_v21  ;;  %451 = vmatpush2.bf16.msra.mxu1 %v487_v21 }
  0x28   :  { %270 = vmatprep.subr.bf16.mxu0 %v488_v22  ;;  %436 = vmatprep.subr.bf16.mxu1 %v488_v22 }
  0x2b   :  { %271 = vmatpush2.bf16.msra.mxu0 %v490_v23  ;;  %452 = vmatpush2.bf16.msra.mxu1 %v490_v23 }
  0x2c   :  { %272 = vmatprep.subr.bf16.mxu0 %v491_v24  ;;  %437 = vmatprep.subr.bf16.mxu1 %v491_v24 }
  0x2f   :  { %273 = vmatpush2.bf16.msra.mxu0 %v493_v25  ;;  %453 = vmatpush2.bf16.msra.mxu1 %v493_v25 }
  0x30   :  { %274 = vmatprep.subr.bf16.mxu0 %v494_v26  ;;  %438 = vmatprep.subr.bf16.mxu1 %v494_v26 }
  0x33   :  { %275 = vmatpush2.bf16.msra.mxu0 %v496_v27  ;;  %454 = vmatpush2.bf16.msra.mxu1 %v496_v27 }
  0x34   :  { %276 = vmatprep.subr.bf16.mxu0 %v497_v28  ;;  %439 = vmatprep.subr.bf16.mxu1 %v497_v28 }
  0x37   :  { %277 = vmatpush2.bf16.msra.mxu0 %v499_v29  ;;  %455 = vmatpush2.bf16.msra.mxu1 %v499_v29 }
  0x38   :  { %278 = vmatprep.subr.bf16.mxu0 %v500_v30  ;;  %440 = vmatprep.subr.bf16.mxu1 %v500_v30 }
  0x3b   :  { %279 = vmatpush2.bf16.msra.mxu0 %v502_v31  ;;  %456 = vmatpush2.bf16.msra.mxu1 %v502_v31 }
  0x3c   :  { %280 = vmatprep.subr.bf16.mxu0 %v503_v32  ;;  %441 = vmatprep.subr.bf16.mxu1 %v503_v32 }
  0x3f   :  { %281 = vmatpush2.bf16.msra.mxu0 %v505_v33  ;;  %457 = vmatpush2.bf16.msra.mxu1 %v505_v33 }
  0x42   :  { %283 = vmatmul.mubr.bf16.vlgmr.msra.gmra.mxu0 %v506_v34  ;;  %293 = vmatmul.mubr.bf16.vlgmr.msra.gmra.mxu1 %v509_v35 }
 0x102   :  { %v284_v44 = vpop.f32.mrf.mxu0  ;;  %v294_v45 = vpop.f32.mrf.mxu1 }
 0x103   :  { %v342_v52 = vadd.f32 %v334_v38, %v284_v44  ;;  %v346_v53 = vadd.f32 %v338_v39, %v294_v45 }
 0x104   :  { %v286_v46 = vpop.f32.mrf.mxu0  ;;  %v296_v47 = vpop.f32.mrf.mxu1 }
 0x105   :  { %v343_v54 = vadd.f32 %v335_v40, %v286_v46  ;;  %v347_v55 = vadd.f32 %v339_v41, %v296_v47 }
 0x106   :  { %v288_v56 = vpop.f32.mrf.mxu0  ;;  %v298_v57 = vpop.f32.mrf.mxu1 }
 0x107   :  { %v422_v58 = vpack.c.bf16 %v343_v54, %v342_v52  ;;  %v424_v59 = vpack.c.bf16 %v347_v55, %v346_v53  ;;  %v344_v62 = vadd.f32 %v336_v48, %v288_v56  ;;  %v348_v63 = vadd.f32 %v340_v49, %v298_v57 }
 0x108   :  { %v290_v60 = vpop.f32.mrf.mxu0  ;;  %v300_v61 = vpop.f32.mrf.mxu1 }
 0x109   :  { %374 = vst [vmem:[%s667_s3] sm:$0xff] %v422_v58  ;;  %376 = vst [vmem:[%s667_s3 + $0x10] sm:$0xff] %v424_v59  ;;  %v345_v0 = vadd.f32 %v337_v50, %v290_v60  ;;  %v349_v1 = vadd.f32 %v341_v51, %v300_v61 }
 0x10b   :  { %v423_v2 = vpack.c.bf16 %v345_v0, %v344_v62  ;;  %v425_v3 = vpack.c.bf16 %v349_v1, %v348_v63 }
 0x10d   :  { %375 = vst [vmem:[%s667_s3 + $0x8] sm:$0xff] %v423_v2  ;;  %377 = vst [vmem:[%s667_s3 + $0x18] sm:$0xff] %v425_v3 }

// kernel: mistral_upsampler_forward.25
= control target key start
LH: loop header
LB: loop body
LE: loop exit
PB: predicated region body
PF: predicated region fallthrough
CT: control target
= control target key end

     0   :  { %s1099_s1 = inlined_call_operand.vmem [shape: bf16[512,256], index: 1, kind: input, shape index: {}]   ;;  %s1100_s0 = inlined_call_operand.vmem [shape: bf16[32,512], index: 0, kind: input, shape index: {}]   ;;  %s1101_s2 = inlined_call_operand.vmem [shape: bf16[32,256], index: 2, kind: input, shape index: {}]   ;;  %s1102_s3 = inlined_call_operand.vmem [shape: bf16[32,256], index: 3, kind: output, shape index: {}]  }
   0x1   :  { %v731_v0 = vld [vmem:[%s1099_s1 + $0x74] ss:$8 sps:$4 sm:$0xff]   ;;  %v735_v2 = vld [vmem:[%s1099_s1 + $0x70] ss:$8 sps:$4 sm:$0xff]   ;;  %v737_v4 = vld [vmem:[%s1099_s1 + $0x64] ss:$8 sps:$4 sm:$0xff]  }
   0x2   :  { %v733_v1 = vld [vmem:[%s1099_s1 + $0x174] ss:$8 sps:$4 sm:$0xff]   ;;  %466 = vmatprep.subr.bf16.mxu0 %v731_v0  ;;  %v736_v3 = vld [vmem:[%s1099_s1 + $0x170] ss:$8 sps:$4 sm:$0xff]   ;;  %v739_v5 = vld [vmem:[%s1099_s1 + $0x164] ss:$8 sps:$4 sm:$0xff]  }
   0x3   :  { %519 = vmatprep.subr.bf16.mxu1 %v733_v1  ;;  %467 = vmatpush1.bf16.msra.mxu0 %v735_v2  ;;  %v741_v6 = vld [vmem:[%s1099_s1 + $0x60] ss:$8 sps:$4 sm:$0xff]   ;;  %v743_v8 = vld [vmem:[%s1099_s1 + $0x54] ss:$8 sps:$4 sm:$0xff]   ;;  %v747_v10 = vld [vmem:[%s1099_s1 + $0x50] ss:$8 sps:$4 sm:$0xff]  }
   0x4   :  { %520 = vmatpush1.bf16.msra.mxu1 %v736_v3  ;;  %468 = vmatprep.subr.bf16.mxu0 %v737_v4  ;;  %v742_v7 = vld [vmem:[%s1099_s1 + $0x160] ss:$8 sps:$4 sm:$0xff]   ;;  %v745_v9 = vld [vmem:[%s1099_s1 + $0x154] ss:$8 sps:$4 sm:$0xff]   ;;  %v748_v11 = vld [vmem:[%s1099_s1 + $0x150] ss:$8 sps:$4 sm:$0xff]  }
   0x5   :  { %521 = vmatprep.subr.bf16.mxu1 %v739_v5  ;;  %v749_v12 = vld [vmem:[%s1099_s1 + $0x44] ss:$8 sps:$4 sm:$0xff]   ;;  %v753_v14 = vld [vmem:[%s1099_s1 + $0x40] ss:$8 sps:$4 sm:$0xff]   ;;  %v755_v16 = vld [vmem:[%s1099_s1 + $0x34] ss:$8 sps:$4 sm:$0xff]  }
   0x6   :  { %v751_v13 = vld [vmem:[%s1099_s1 + $0x144] ss:$8 sps:$4 sm:$0xff]   ;;  %v754_v15 = vld [vmem:[%s1099_s1 + $0x140] ss:$8 sps:$4 sm:$0xff]   ;;  %v757_v17 = vld [vmem:[%s1099_s1 + $0x134] ss:$8 sps:$4 sm:$0xff]  }
   0x7   :  { %469 = vmatpush1.bf16.msra.mxu0 %v741_v6  ;;  %v759_v18 = vld [vmem:[%s1099_s1 + $0x30] ss:$8 sps:$4 sm:$0xff]   ;;  %v761_v20 = vld [vmem:[%s1099_s1 + $0x24] ss:$8 sps:$4 sm:$0xff]   ;;  %v765_v22 = vld [vmem:[%s1099_s1 + $0x20] ss:$8 sps:$4 sm:$0xff]  }
   0x8   :  { %522 = vmatpush1.bf16.msra.mxu1 %v742_v7  ;;  %470 = vmatprep.subr.bf16.mxu0 %v743_v8  ;;  %v760_v19 = vld [vmem:[%s1099_s1 + $0x130] ss:$8 sps:$4 sm:$0xff]   ;;  %v763_v21 = vld [vmem:[%s1099_s1 + $0x124] ss:$8 sps:$4 sm:$0xff]   ;;  %v766_v23 = vld [vmem:[%s1099_s1 + $0x120] ss:$8 sps:$4 sm:$0xff]  }
   0x9   :  { %523 = vmatprep.subr.bf16.mxu1 %v745_v9  ;;  %v767_v24 = vld [vmem:[%s1099_s1 + $0x14] ss:$8 sps:$4 sm:$0xff]   ;;  %v771_v26 = vld [vmem:[%s1099_s1 + $0x10] ss:$8 sps:$4 sm:$0xff]   ;;  %v773_v28 = vld [vmem:[%s1099_s1 + $0x4] ss:$8 sps:$4 sm:$0xff]  }
   0xa   :  { %v769_v25 = vld [vmem:[%s1099_s1 + $0x114] ss:$8 sps:$4 sm:$0xff]   ;;  %v772_v27 = vld [vmem:[%s1099_s1 + $0x110] ss:$8 sps:$4 sm:$0xff]   ;;  %v775_v29 = vld [vmem:[%s1099_s1 + $0x104] ss:$8 sps:$4 sm:$0xff]  }
   0xb   :  { %471 = vmatpush1.bf16.msra.mxu0 %v747_v10  ;;  %v777_v30 = vld [vmem:[%s1099_s1] ss:$8 sps:$4 sm:$0xff]   ;;  %v779_v32 = vld [vmem:[%s1099_s1 + $0xf4] ss:$8 sps:$4 sm:$0xff]   ;;  %v783_v34 = vld [vmem:[%s1099_s1 + $0xf0] ss:$8 sps:$4 sm:$0xff]  }
   0xc   :  { %524 = vmatpush1.bf16.msra.mxu1 %v748_v11  ;;  %472 = vmatprep.subr.bf16.mxu0 %v749_v12  ;;  %v778_v31 = vld [vmem:[%s1099_s1 + $0x100] ss:$8 sps:$4 sm:$0xff]   ;;  %v781_v33 = vld [vmem:[%s1099_s1 + $0x1f4] ss:$8 sps:$4 sm:$0xff]   ;;  %v784_v35 = vld [vmem:[%s1099_s1 + $0x1f0] ss:$8 sps:$4 sm:$0xff]  }
   0xd   :  { %525 = vmatprep.subr.bf16.mxu1 %v751_v13  ;;  %v785_v36 = vld [vmem:[%s1099_s1 + $0xe4] ss:$8 sps:$4 sm:$0xff]   ;;  %v789_v38 = vld [vmem:[%s1099_s1 + $0xe0] ss:$8 sps:$4 sm:$0xff]   ;;  %v791_v40 = vld [vmem:[%s1099_s1 + $0xd4] ss:$8 sps:$4 sm:$0xff]  }
   0xe   :  { %v787_v37 = vld [vmem:[%s1099_s1 + $0x1e4] ss:$8 sps:$4 sm:$0xff]   ;;  %v790_v39 = vld [vmem:[%s1099_s1 + $0x1e0] ss:$8 sps:$4 sm:$0xff]   ;;  %v793_v41 = vld [vmem:[%s1099_s1 + $0x1d4] ss:$8 sps:$4 sm:$0xff]  }
   0xf   :  { %473 = vmatpush1.bf16.msra.mxu0 %v753_v14  ;;  %v795_v42 = vld [vmem:[%s1099_s1 + $0xd0] ss:$8 sps:$4 sm:$0xff]   ;;  %v797_v44 = vld [vmem:[%s1099_s1 + $0xc4] ss:$8 sps:$4 sm:$0xff]   ;;  %v801_v46 = vld [vmem:[%s1099_s1 + $0xc0] ss:$8 sps:$4 sm:$0xff]  }
  0x10   :  { %526 = vmatpush1.bf16.msra.mxu1 %v754_v15  ;;  %474 = vmatprep.subr.bf16.mxu0 %v755_v16  ;;  %v796_v43 = vld [vmem:[%s1099_s1 + $0x1d0] ss:$8 sps:$4 sm:$0xff]   ;;  %v799_v45 = vld [vmem:[%s1099_s1 + $0x1c4] ss:$8 sps:$4 sm:$0xff]   ;;  %v802_v47 = vld [vmem:[%s1099_s1 + $0x1c0] ss:$8 sps:$4 sm:$0xff]  }
  0x11   :  { %527 = vmatprep.subr.bf16.mxu1 %v757_v17  ;;  %v803_v48 = vld [vmem:[%s1099_s1 + $0xb4] ss:$8 sps:$4 sm:$0xff]   ;;  %v807_v52 = vld [vmem:[%s1099_s1 + $0xb0] ss:$8 sps:$4 sm:$0xff]   ;;  %v809_v54 = vld [vmem:[%s1099_s1 + $0xa4] ss:$8 sps:$4 sm:$0xff]  }
  0x12   :  { %v829_v49 = vld [vmem:[%s1100_s0 + $0x4] ss:$16 sps:$4 sm:$0xff]   ;;  %v832_v51 = vld [vmem:[%s1100_s0 + $0xc] ss:$16 sps:$4 sm:$0xff]   ;;  %v808_v53 = vld [vmem:[%s1099_s1 + $0x1b0] ss:$8 sps:$4 sm:$0xff]  }
  0x13   :  { %475 = vmatpush1.bf16.msra.mxu0 %v759_v18  ;;  %v805_v50 = vld [vmem:[%s1099_s1 + $0x1b4] ss:$8 sps:$4 sm:$0xff]   ;;  %498 = vmatprep.mubr.bf16.mxu0 %v829_v49  ;;  %v811_v55 = vld [vmem:[%s1099_s1 + $0x1a4] ss:$8 sps:$4 sm:$0xff]   ;;  %v813_v56 = vld [vmem:[%s1099_s1 + $0xa0] ss:$8 sps:$4 sm:$0xff]  }
  0x14   :  { %528 = vmatpush1.bf16.msra.mxu1 %v760_v19  ;;  %476 = vmatprep.subr.bf16.mxu0 %v761_v20  ;;  %v814_v57 = vld [vmem:[%s1099_s1 + $0x1a0] ss:$8 sps:$4 sm:$0xff]   ;;  %v815_v58 = vld [vmem:[%s1099_s1 + $0x94] ss:$8 sps:$4 sm:$0xff]   ;;  %v819_v60 = vld [vmem:[%s1099_s1 + $0x90] ss:$8 sps:$4 sm:$0xff]  }
  0x15   :  { %529 = vmatprep.subr.bf16.mxu1 %v763_v21  ;;  %551 = vmatprep.mubr.bf16.mxu1 %v832_v51  ;;  %v817_v59 = vld [vmem:[%s1099_s1 + $0x194] ss:$8 sps:$4 sm:$0xff]   ;;  %v820_v61 = vld [vmem:[%s1099_s1 + $0x190] ss:$8 sps:$4 sm:$0xff]   ;;  %v821_v62 = vld [vmem:[%s1099_s1 + $0x84] ss:$8 sps:$4 sm:$0xff]  }
  0x16   :  { %v823_v63 = vld [vmem:[%s1099_s1 + $0x184] ss:$8 sps:$4 sm:$0xff]   ;;  %v825_v0 = vld [vmem:[%s1099_s1 + $0x80] ss:$8 sps:$4 sm:$0xff]  }
  0x17   :  { %477 = vmatpush1.bf16.msra.mxu0 %v765_v22  ;;  %v826_v1 = vld [vmem:[%s1099_s1 + $0x180] ss:$8 sps:$4 sm:$0xff]   ;;  %v833_v4 = vld [vmem:[%s1100_s0 + $0x24] ss:$16 sps:$4 sm:$0xff]   ;;  %v835_v5 = vld [vmem:[%s1100_s0 + $0x2c] ss:$16 sps:$4 sm:$0xff]  }
  0x18   :  { %530 = vmatpush1.bf16.msra.mxu1 %v766_v23  ;;  %478 = vmatprep.subr.bf16.mxu0 %v767_v24  ;;  %v827_v2 = vld [vmem:[%s1100_s0] ss:$16 sps:$4 sm:$0xff]   ;;  %v830_v3 = vld [vmem:[%s1100_s0 + $0x8] ss:$16 sps:$4 sm:$0xff]  }
  0x19   :  { %531 = vmatprep.subr.bf16.mxu1 %v769_v25  ;;  %v837_v6 = vld [vmem:[%s1100_s0 + $0x20] ss:$16 sps:$4 sm:$0xff]   ;;  %v838_v7 = vld [vmem:[%s1100_s0 + $0x28] ss:$16 sps:$4 sm:$0xff]  }
  0x1a   :  { %v599_v8 = vld [vmem:[%s1101_s2] sm:$0xff]  ;;  %v600_v14 = vld [vmem:[%s1101_s2 + $0x8] sm:$0xff]  ;;  %v601_v25 = vld [vmem:[%s1101_s2 + $0x10] sm:$0xff] }
  0x1b   :  { %479 = vmatpush1.bf16.msra.mxu0 %v771_v26  ;;  %v603_v12 = vunpack.c.l.bf16 %v599_v8  ;;  %v604_v13 = vunpack.c.h.bf16 %v599_v8  ;;  %v605_v20 = vunpack.c.l.bf16 %v600_v14  ;;  %v606_v24 = vunpack.c.h.bf16 %v600_v14 }
  0x1c   :  { %532 = vmatpush1.bf16.msra.mxu1 %v772_v27  ;;  %480 = vmatprep.subr.bf16.mxu0 %v773_v28 }
  0x1d   :  { %533 = vmatprep.subr.bf16.mxu1 %v775_v29 }
  0x1f   :  { %481 = vmatpush1.bf16.msra.mxu0 %v777_v30 }
  0x20   :  { %534 = vmatpush1.bf16.msra.mxu1 %v778_v31  ;;  %482 = vmatprep.subr.bf16.mxu0 %v779_v32  ;;  %v607_v32 = vunpack.c.l.bf16 %v601_v25 }
  0x21   :  { %535 = vmatprep.subr.bf16.mxu1 %v781_v33 }
  0x23   :  { %483 = vmatpush2.bf16.msra.mxu0 %v783_v34 }
  0x24   :  { %536 = vmatpush2.bf16.msra.mxu1 %v784_v35  ;;  %484 = vmatprep.subr.bf16.mxu0 %v785_v36  ;;  %v608_v36 = vunpack.c.h.bf16 %v601_v25 }
  0x25   :  { %537 = vmatprep.subr.bf16.mxu1 %v787_v37  ;;  %v602_v37 = vld [vmem:[%s1101_s2 + $0x18] sm:$0xff] }
  0x27   :  { %485 = vmatpush2.bf16.msra.mxu0 %v789_v38 }
  0x28   :  { %538 = vmatpush2.bf16.msra.mxu1 %v790_v39  ;;  %486 = vmatprep.subr.bf16.mxu0 %v791_v40 }
  0x29   :  { %539 = vmatprep.subr.bf16.mxu1 %v793_v41 }
  0x2b   :  { %487 = vmatpush2.bf16.msra.mxu0 %v795_v42 }
  0x2c   :  { %540 = vmatpush2.bf16.msra.mxu1 %v796_v43  ;;  %488 = vmatprep.subr.bf16.mxu0 %v797_v44  ;;  %v609_v44 = vunpack.c.l.bf16 %v602_v37 }
  0x2d   :  { %541 = vmatprep.subr.bf16.mxu1 %v799_v45 }
  0x2f   :  { %489 = vmatpush2.bf16.msra.mxu0 %v801_v46 }
  0x30   :  { %542 = vmatpush2.bf16.msra.mxu1 %v802_v47  ;;  %490 = vmatprep.subr.bf16.mxu0 %v803_v48  ;;  %v610_v48 = vunpack.c.h.bf16 %v602_v37 }
  0x31   :  { %543 = vmatprep.subr.bf16.mxu1 %v805_v50 }
  0x33   :  { %491 = vmatpush2.bf16.msra.mxu0 %v807_v52 }
  0x34   :  { %544 = vmatpush2.bf16.msra.mxu1 %v808_v53  ;;  %492 = vmatprep.subr.bf16.mxu0 %v809_v54 }
  0x35   :  { %545 = vmatprep.subr.bf16.mxu1 %v811_v55 }
  0x37   :  { %493 = vmatpush2.bf16.msra.mxu0 %v813_v56 }
  0x38   :  { %546 = vmatpush2.bf16.msra.mxu1 %v814_v57  ;;  %494 = vmatprep.subr.bf16.mxu0 %v815_v58 }
  0x39   :  { %547 = vmatprep.subr.bf16.mxu1 %v817_v59 }
  0x3b   :  { %495 = vmatpush2.bf16.msra.mxu0 %v819_v60 }
  0x3c   :  { %548 = vmatpush2.bf16.msra.mxu1 %v820_v61  ;;  %496 = vmatprep.subr.bf16.mxu0 %v821_v62 }
  0x3d   :  { %549 = vmatprep.subr.bf16.mxu1 %v823_v63 }
  0x3f   :  { %497 = vmatpush2.bf16.msra.mxu0 %v825_v0 }
  0x40   :  { %550 = vmatpush2.bf16.msra.mxu1 %v826_v1 }
  0x42   :  { %499 = vmatmul.mubr.bf16.vlgmr.msra.gmra.mxu0 %v827_v2 }
  0x43   :  { %552 = vmatmul.mubr.bf16.vlgmr.msra.gmra.mxu1 %v830_v3  ;;  %508 = vmatprep.mubr.bf16.mxu0 %v833_v4 }
  0x44   :  { %561 = vmatprep.mubr.bf16.mxu1 %v835_v5 }
  0x4a   :  { %509 = vmatmul.mubr.bf16.gmra.mxu0 %v837_v6 }
  0x4b   :  { %562 = vmatmul.mubr.bf16.gmra.mxu1 %v838_v7 }
 0x102   :  { %v500_v9 = vpop.f32.mrf.mxu0 }
 0x103   :  { %v553_v10 = vpop.f32.mrf.mxu1 }
 0x104   :  { %v554_v11 = vadd.f32 %v553_v10, %v500_v9  ;;  %v502_v15 = vpop.f32.mrf.mxu0 }
 0x105   :  { %v555_v16 = vpop.f32.mrf.mxu1 }
 0x106   :  { %v556_v17 = vadd.f32 %v555_v16, %v502_v15  ;;  %v504_v18 = vpop.f32.mrf.mxu0  ;;  %v611_v21 = vadd.f32 %v603_v12, %v554_v11 }
 0x107   :  { %v557_v19 = vpop.f32.mrf.mxu1 }
 0x108   :  { %v612_v22 = vadd.f32 %v604_v13, %v556_v17  ;;  %v558_v23 = vadd.f32 %v557_v19, %v504_v18  ;;  %v506_v26 = vpop.f32.mrf.mxu0 }
 0x109   :  { %v559_v27 = vpop.f32.mrf.mxu1 }
 0x10a   :  { %v727_v28 = vpack.c.bf16 %v612_v22, %v611_v21  ;;  %v560_v29 = vadd.f32 %v559_v27, %v506_v26  ;;  %v510_v30 = vpop.f32.mrf.mxu0  ;;  %v613_v33 = vadd.f32 %v605_v20, %v558_v23 }
 0x10b   :  { %v563_v31 = vpop.f32.mrf.mxu1 }
 0x10c   :  { %643 = vst [vmem:[%s1102_s3] sm:$0xff] %v727_v28  ;;  %v614_v34 = vadd.f32 %v606_v24, %v560_v29  ;;  %v564_v35 = vadd.f32 %v563_v31, %v510_v30  ;;  %v512_v38 = vpop.f32.mrf.mxu0 }
 0x10d   :  { %v565_v39 = vpop.f32.mrf.mxu1 }
 0x10e   :  { %v728_v40 = vpack.c.bf16 %v614_v34, %v613_v33  ;;  %v566_v41 = vadd.f32 %v565_v39, %v512_v38  ;;  %v514_v42 = vpop.f32.mrf.mxu0  ;;  %v615_v45 = vadd.f32 %v607_v32, %v564_v35 }
 0x10f   :  { %v567_v43 = vpop.f32.mrf.mxu1 }
 0x110   :  { %644 = vst [vmem:[%s1102_s3 + $0x8] sm:$0xff] %v728_v40  ;;  %v616_v46 = vadd.f32 %v608_v36, %v566_v41  ;;  %v568_v47 = vadd.f32 %v567_v43, %v514_v42  ;;  %v516_v49 = vpop.f32.mrf.mxu0 }
 0x111   :  { %v569_v50 = vpop.f32.mrf.mxu1 }
 0x112   :  { %v729_v51 = vpack.c.bf16 %v616_v46, %v615_v45  ;;  %v570_v52 = vadd.f32 %v569_v50, %v516_v49  ;;  %v617_v53 = vadd.f32 %v609_v44, %v568_v47 }
 0x114   :  { %645 = vst [vmem:[%s1102_s3 + $0x10] sm:$0xff] %v729_v51  ;;  %v618_v54 = vadd.f32 %v610_v48, %v570_v52 }
 0x116   :  { %v730_v55 = vpack.c.bf16 %v618_v54, %v617_v53 }
 0x118   :  { %646 = vst [vmem:[%s1102_s3 + $0x18] sm:$0xff] %v730_v55 }

// kernel: mistral_upsampler_forward.27
= control target key start
LH: loop header
LB: loop body
LE: loop exit
PB: predicated region body
PF: predicated region fallthrough
CT: control target
= control target key end

     0   :  { %v910_v0 = vmov 0   ;;  %s1179_s1 = inlined_call_operand.vmem [shape: f32[32,1], index: 1, kind: input, shape index: {}]   ;;  %s1180_s3 = inlined_call_operand.vmem [shape: bf16[256,512], index: 3, kind: input, shape index: {}]   ;;  %s1181_s2 = inlined_call_operand.vmem [shape: bf16[1,256], index: 2, kind: input, shape index: {}]   ;;  %s1182_s0 = inlined_call_operand.vmem [shape: bf16[32,256], index: 0, kind: input, shape index: {}]   ;;  %s1183_s4 = inlined_call_operand.vmem [shape: bf16[32,512], index: 4, kind: output, shape index: {}]  }
   0x1   :  { %812 = vset.pattern.permute.xlu0 %v910_v0  ;;  %v49_v1 = vld [vmem:[%s1179_s1] sm:$0xff]  ;;  %813 = vset.pattern.permute.xlu1 %v910_v0  ;;  %v51_v2 = vld [vmem:[%s1179_s1 + $0x10] sm:$0xff]  ;;  %v50_v3 = vld [vmem:[%s1179_s1 + $0x8] sm:$0xff] }
   0x2   :  { %55 = vperm.xlu0 %812, %v49_v1   ;;  %65 = vperm.xlu1 %813, %v51_v2   ;;  %v52_v4 = vld [vmem:[%s1179_s1 + $0x18] sm:$0xff]  ;;  %v814_v5 = vld [vmem:[%s1180_s3 + $0xe4] ss:$16 sps:$4 sm:$0xff]   ;;  %v818_v7 = vld [vmem:[%s1180_s3 + $0xe0] ss:$16 sps:$4 sm:$0xff]  }
   0x3   :  { %v816_v6 = vld [vmem:[%s1180_s3 + $0xec] ss:$16 sps:$4 sm:$0xff]   ;;  %v819_v8 = vld [vmem:[%s1180_s3 + $0xe8] ss:$16 sps:$4 sm:$0xff]   ;;  %514 = vmatprep.subr.bf16.mxu0 %v814_v5  ;;  %v820_v9 = vld [vmem:[%s1180_s3 + $0xc4] ss:$16 sps:$4 sm:$0xff]   ;;  %v84_v5 = vlaneseq }
   0x4   :  { %v822_v10 = vld [vmem:[%s1180_s3 + $0xcc] ss:$16 sps:$4 sm:$0xff]   ;;  %567 = vmatprep.subr.bf16.mxu1 %v816_v6  ;;  %515 = vmatpush1.bf16.msra.mxu0 %v818_v7  ;;  %v824_v11 = vld [vmem:[%s1180_s3 + $0xc0] ss:$16 sps:$4 sm:$0xff]   ;;  %v825_v12 = vld [vmem:[%s1180_s3 + $0xc8] ss:$16 sps:$4 sm:$0xff]  }
   0x5   :  { %568 = vmatpush1.bf16.msra.mxu1 %v819_v8  ;;  %516 = vmatprep.subr.bf16.mxu0 %v820_v9  ;;  %v826_v13 = vld [vmem:[%s1180_s3 + $0xa4] ss:$16 sps:$4 sm:$0xff]   ;;  %v828_v14 = vld [vmem:[%s1180_s3 + $0xac] ss:$16 sps:$4 sm:$0xff]   ;;  %v830_v15 = vld [vmem:[%s1180_s3 + $0xa0] ss:$16 sps:$4 sm:$0xff]  }
   0x6   :  { %60 = vperm.xlu0 %812, %v50_v3   ;;  %70 = vperm.xlu1 %813, %v52_v4   ;;  %v831_v16 = vld [vmem:[%s1180_s3 + $0xa8] ss:$16 sps:$4 sm:$0xff]   ;;  %v832_v17 = vld [vmem:[%s1180_s3 + $0x84] ss:$16 sps:$4 sm:$0xff]   ;;  %v834_v18 = vld [vmem:[%s1180_s3 + $0x8c] ss:$16 sps:$4 sm:$0xff]  }
   0x7   :  { %569 = vmatprep.subr.bf16.mxu1 %v822_v10  ;;  %v836_v19 = vld [vmem:[%s1180_s3 + $0x80] ss:$16 sps:$4 sm:$0xff]   ;;  %v837_v20 = vld [vmem:[%s1180_s3 + $0x88] ss:$16 sps:$4 sm:$0xff]   ;;  %v838_v21 = vld [vmem:[%s1180_s3 + $0x64] ss:$16 sps:$4 sm:$0xff]  }
   0x8   :  { %517 = vmatpush1.bf16.msra.mxu0 %v824_v11  ;;  %v840_v22 = vld [vmem:[%s1180_s3 + $0x6c] ss:$16 sps:$4 sm:$0xff]   ;;  %v842_v23 = vld [vmem:[%s1180_s3 + $0x60] ss:$16 sps:$4 sm:$0xff]   ;;  %v843_v24 = vld [vmem:[%s1180_s3 + $0x68] ss:$16 sps:$4 sm:$0xff]  }
   0x9   :  { %570 = vmatpush1.bf16.msra.mxu1 %v825_v12  ;;  %518 = vmatprep.subr.bf16.mxu0 %v826_v13  ;;  %v844_v25 = vld [vmem:[%s1180_s3 + $0x44] ss:$16 sps:$4 sm:$0xff]   ;;  %v846_v26 = vld [vmem:[%s1180_s3 + $0x4c] ss:$16 sps:$4 sm:$0xff]   ;;  %v848_v27 = vld [vmem:[%s1180_s3 + $0x40] ss:$16 sps:$4 sm:$0xff]  }
   0xa   :  { %571 = vmatprep.subr.bf16.mxu1 %v828_v14  ;;  %v849_v28 = vld [vmem:[%s1180_s3 + $0x48] ss:$16 sps:$4 sm:$0xff]   ;;  %v850_v29 = vld [vmem:[%s1180_s3 + $0x24] ss:$16 sps:$4 sm:$0xff]   ;;  %v852_v30 = vld [vmem:[%s1180_s3 + $0x2c] ss:$16 sps:$4 sm:$0xff]  }
   0xb   :  { %v854_v31 = vld [vmem:[%s1180_s3 + $0x20] ss:$16 sps:$4 sm:$0xff]   ;;  %v855_v32 = vld [vmem:[%s1180_s3 + $0x28] ss:$16 sps:$4 sm:$0xff]   ;;  %v856_v33 = vld [vmem:[%s1180_s3 + $0x4] ss:$16 sps:$4 sm:$0xff]  }
   0xc   :  { %519 = vmatpush1.bf16.msra.mxu0 %v830_v15  ;;  %v858_v34 = vld [vmem:[%s1180_s3 + $0xc] ss:$16 sps:$4 sm:$0xff]   ;;  %v860_v35 = vld [vmem:[%s1180_s3] ss:$16 sps:$4 sm:$0xff]   ;;  %v861_v36 = vld [vmem:[%s1180_s3 + $0x8] ss:$16 sps:$4 sm:$0xff]  }
   0xd   :  { %572 = vmatpush1.bf16.msra.mxu1 %v831_v16  ;;  %520 = vmatprep.subr.bf16.mxu0 %v832_v17  ;;  %v862_v37 = vld [vmem:[%s1180_s3 + $0x1e4] ss:$16 sps:$4 sm:$0xff]   ;;  %v864_v38 = vld [vmem:[%s1180_s3 + $0x1ec] ss:$16 sps:$4 sm:$0xff]   ;;  %v866_v39 = vld [vmem:[%s1180_s3 + $0x1e0] ss:$16 sps:$4 sm:$0xff]  }
   0xe   :  { %573 = vmatprep.subr.bf16.mxu1 %v834_v18  ;;  %v867_v40 = vld [vmem:[%s1180_s3 + $0x1e8] ss:$16 sps:$4 sm:$0xff]   ;;  %v868_v41 = vld [vmem:[%s1180_s3 + $0x1c4] ss:$16 sps:$4 sm:$0xff]   ;;  %v870_v42 = vld [vmem:[%s1180_s3 + $0x1cc] ss:$16 sps:$4 sm:$0xff]  }
   0xf   :  { %v872_v43 = vld [vmem:[%s1180_s3 + $0x1c0] ss:$16 sps:$4 sm:$0xff]   ;;  %v873_v44 = vld [vmem:[%s1180_s3 + $0x1c8] ss:$16 sps:$4 sm:$0xff]   ;;  %v874_v45 = vld [vmem:[%s1180_s3 + $0x1a4] ss:$16 sps:$4 sm:$0xff]  }
  0x10   :  { %521 = vmatpush1.bf16.msra.mxu0 %v836_v19  ;;  %v876_v46 = vld [vmem:[%s1180_s3 + $0x1ac] ss:$16 sps:$4 sm:$0xff]   ;;  %v878_v47 = vld [vmem:[%s1180_s3 + $0x1a0] ss:$16 sps:$4 sm:$0xff]   ;;  %v879_v48 = vld [vmem:[%s1180_s3 + $0x1a8] ss:$16 sps:$4 sm:$0xff]  }
  0x11   :  { %574 = vmatpush1.bf16.msra.mxu1 %v837_v20  ;;  %522 = vmatprep.subr.bf16.mxu0 %v838_v21  ;;  %v880_v49 = vld [vmem:[%s1180_s3 + $0x184] ss:$16 sps:$4 sm:$0xff]   ;;  %v882_v50 = vld [vmem:[%s1180_s3 + $0x18c] ss:$16 sps:$4 sm:$0xff]   ;;  %v884_v51 = vld [vmem:[%s1180_s3 + $0x180] ss:$16 sps:$4 sm:$0xff]  }
  0x12   :  { %575 = vmatprep.subr.bf16.mxu1 %v840_v22  ;;  %v885_v52 = vld [vmem:[%s1180_s3 + $0x188] ss:$16 sps:$4 sm:$0xff]   ;;  %v886_v53 = vld [vmem:[%s1180_s3 + $0x164] ss:$16 sps:$4 sm:$0xff]   ;;  %v888_v54 = vld [vmem:[%s1180_s3 + $0x16c] ss:$16 sps:$4 sm:$0xff]  }
  0x13   :  { %v890_v55 = vld [vmem:[%s1180_s3 + $0x160] ss:$16 sps:$4 sm:$0xff]   ;;  %v891_v56 = vld [vmem:[%s1180_s3 + $0x168] ss:$16 sps:$4 sm:$0xff]   ;;  %v892_v57 = vld [vmem:[%s1180_s3 + $0x144] ss:$16 sps:$4 sm:$0xff]  }
  0x14   :  { %523 = vmatpush1.bf16.msra.mxu0 %v842_v23  ;;  %v894_v58 = vld [vmem:[%s1180_s3 + $0x14c] ss:$16 sps:$4 sm:$0xff]   ;;  %v896_v59 = vld [vmem:[%s1180_s3 + $0x140] ss:$16 sps:$4 sm:$0xff]   ;;  %v897_v60 = vld [vmem:[%s1180_s3 + $0x148] ss:$16 sps:$4 sm:$0xff]  }
  0x15   :  { %576 = vmatpush1.bf16.msra.mxu1 %v843_v24  ;;  %524 = vmatprep.subr.bf16.mxu0 %v844_v25  ;;  %v898_v61 = vld [vmem:[%s1180_s3 + $0x124] ss:$16 sps:$4 sm:$0xff]   ;;  %v900_v62 = vld [vmem:[%s1180_s3 + $0x12c] ss:$16 sps:$4 sm:$0xff]   ;;  %v902_v63 = vld [vmem:[%s1180_s3 + $0x120] ss:$16 sps:$4 sm:$0xff]  }
  0x16   :  { %577 = vmatprep.subr.bf16.mxu1 %v846_v26  ;;  %v903_v0 = vld [vmem:[%s1180_s3 + $0x128] ss:$16 sps:$4 sm:$0xff]   ;;  %v904_v1 = vld [vmem:[%s1180_s3 + $0x104] ss:$16 sps:$4 sm:$0xff]   ;;  %v906_v2 = vld [vmem:[%s1180_s3 + $0x10c] ss:$16 sps:$4 sm:$0xff]  }
  0x17   :  { %v908_v3 = vld [vmem:[%s1180_s3 + $0x100] ss:$16 sps:$4 sm:$0xff]   ;;  %v909_v4 = vld [vmem:[%s1180_s3 + $0x108] ss:$16 sps:$4 sm:$0xff]   ;;  %v85_v6 = vshrl.u32 %v84_v5, 7 }
  0x18   :  { %525 = vmatpush1.bf16.msra.mxu0 %v848_v27  ;;  %v81_v7 = vld [vmem:[%s1181_s2] sm:$0x3]  ;;  %v39_v10 = vld [vmem:[%s1182_s0 + $0x10] sm:$0xff]  ;;  %v38_v16 = vld [vmem:[%s1182_s0 + $0x8] sm:$0xff] }
  0x19   :  { %578 = vmatpush1.bf16.msra.mxu1 %v849_v28  ;;  %526 = vmatprep.subr.bf16.mxu0 %v850_v29  ;;  %v82_v8 = vunpack.c.l.bf16 %v81_v7  ;;  %v86_v9 = vsub.s32 0, %v85_v6  ;;  %v37_v11 = vld [vmem:[%s1182_s0] sm:$0xff]  ;;  %v90_v12 = vsub.s32 2, %v85_v6  ;;  %v46_v13 = vunpack.c.h.bf16 %v39_v10  ;;  %v40_v17 = vld [vmem:[%s1182_s0 + $0x18] sm:$0xff] }
  0x1a   :  { %579 = vmatprep.subr.bf16.mxu1 %v852_v30  ;;  %v41_v15 = vunpack.c.l.bf16 %v37_v11  ;;  %v42_v18 = vunpack.c.h.bf16 %v37_v11  ;;  %v43_v23 = vunpack.c.l.bf16 %v38_v16  ;;  %v44_v24 = vunpack.c.h.bf16 %v38_v16 }
  0x1b   :  { %v87_v14 = vrot.slane %v82_v8, %v86_v9  ;;  %v91_v19 = vrot.slane %v82_v8, %v90_v12  ;;  %v48_v25 = vunpack.c.h.bf16 %v40_v17 }
  0x1c   :  { %527 = vmatpush1.bf16.msra.mxu0 %v854_v31 }
  0x1d   :  { %580 = vmatpush1.bf16.msra.mxu1 %v855_v32  ;;  %528 = vmatprep.subr.bf16.mxu0 %v856_v33  ;;  %v97_v26 = vrot.slane %v87_v14, %v86_v9  ;;  %v101_v29 = vrot.slane %v91_v19, %v86_v9 }
  0x1e   :  { %581 = vmatprep.subr.bf16.mxu1 %v858_v34 }
  0x20   :  { %529 = vmatpush1.bf16.msra.mxu0 %v860_v35 }
  0x21   :  { %582 = vmatpush1.bf16.msra.mxu1 %v861_v36  ;;  %530 = vmatprep.subr.bf16.mxu0 %v862_v37  ;;  %v45_v37 = vunpack.c.l.bf16 %v39_v10 }
  0x22   :  { %583 = vmatprep.subr.bf16.mxu1 %v864_v38  ;;  %v47_v38 = vunpack.c.l.bf16 %v40_v17 }
  0x24   :  { %531 = vmatpush2.bf16.msra.mxu0 %v866_v39 }
  0x25   :  { %584 = vmatpush2.bf16.msra.mxu1 %v867_v40  ;;  %532 = vmatprep.subr.bf16.mxu0 %v868_v41 }
  0x26   :  { %585 = vmatprep.subr.bf16.mxu1 %v870_v42 }
  0x28   :  { %533 = vmatpush2.bf16.msra.mxu0 %v872_v43 }
  0x29   :  { %586 = vmatpush2.bf16.msra.mxu1 %v873_v44  ;;  %534 = vmatprep.subr.bf16.mxu0 %v874_v45 }
  0x2a   :  { %587 = vmatprep.subr.bf16.mxu1 %v876_v46 }
  0x2c   :  { %535 = vmatpush2.bf16.msra.mxu0 %v878_v47 }
  0x2d   :  { %588 = vmatpush2.bf16.msra.mxu1 %v879_v48  ;;  %536 = vmatprep.subr.bf16.mxu0 %v880_v49 }
  0x2e   :  { %589 = vmatprep.subr.bf16.mxu1 %v882_v50 }
  0x30   :  { %537 = vmatpush2.bf16.msra.mxu0 %v884_v51 }
  0x31   :  { %590 = vmatpush2.bf16.msra.mxu1 %v885_v52  ;;  %538 = vmatprep.subr.bf16.mxu0 %v886_v53 }
  0x32   :  { %591 = vmatprep.subr.bf16.mxu1 %v888_v54 }
  0x34   :  { %539 = vmatpush2.bf16.msra.mxu0 %v890_v55 }
  0x35   :  { %592 = vmatpush2.bf16.msra.mxu1 %v891_v56  ;;  %540 = vmatprep.subr.bf16.mxu0 %v892_v57 }
  0x36   :  { %593 = vmatprep.subr.bf16.mxu1 %v894_v58 }
  0x38   :  { %541 = vmatpush2.bf16.msra.mxu0 %v896_v59 }
  0x39   :  { %594 = vmatpush2.bf16.msra.mxu1 %v897_v60  ;;  %542 = vmatprep.subr.bf16.mxu0 %v898_v61 }
  0x3a   :  { %595 = vmatprep.subr.bf16.mxu1 %v900_v62 }
  0x3c   :  { %543 = vmatpush2.bf16.msra.mxu0 %v902_v63 }
  0x3d   :  { %596 = vmatpush2.bf16.msra.mxu1 %v903_v0  ;;  %544 = vmatprep.subr.bf16.mxu0 %v904_v1 }
  0x3e   :  { %597 = vmatprep.subr.bf16.mxu1 %v906_v2 }
  0x40   :  { %545 = vmatpush2.bf16.msra.mxu0 %v908_v3 }
  0x41   :  { %598 = vmatpush2.bf16.msra.mxu1 %v909_v4 }
  0x7d   :  { %v56_v20 = vpop.permute.xlu0 %55  ;;  %v66_v21 = vpop.permute.xlu1 %65 }
  0x7e   :  { %v78_v22 = vmul.f32 %v66_v21, %v46_v13  ;;  %v73_v27 = vmul.f32 %v56_v20, %v41_v15  ;;  %v74_v28 = vmul.f32 %v56_v20, %v42_v18  ;;  %v77_v46 = vmul.f32 %v66_v21, %v45_v37 }
  0x80   :  { %v107_v32 = vmul.f32 %v101_v29, %v78_v22  ;;  %v102_v36 = vmul.f32 %v97_v26, %v73_v27  ;;  %v103_v42 = vmul.f32 %v101_v29, %v74_v28  ;;  %v106_v48 = vmul.f32 %v97_v26, %v77_v46 }
  0x81   :  { %v61_v30 = vpop.permute.xlu0 %60  ;;  %v71_v31 = vpop.permute.xlu1 %70 }
  0x82   :  { %v75_v33 = vmul.f32 %v61_v30, %v43_v23  ;;  %v76_v34 = vmul.f32 %v61_v30, %v44_v24  ;;  %v80_v35 = vmul.f32 %v71_v31, %v48_v25  ;;  %v79_v47 = vmul.f32 %v71_v31, %v47_v38 }
  0x84   :  { %v104_v39 = vmul.f32 %v97_v26, %v75_v33  ;;  %v105_v40 = vmul.f32 %v101_v29, %v76_v34  ;;  %v109_v41 = vmul.f32 %v101_v29, %v80_v35  ;;  %v108_v49 = vmul.f32 %v97_v26, %v79_v47 }
  0x86   :  { %v111_v43 = vpack.c.bf16 %v105_v40, %v103_v42  ;;  %v110_v44 = vpack.c.bf16 %v104_v39, %v102_v36  ;;  %v113_v45 = vpack.c.bf16 %v109_v41, %v107_v32  ;;  %v112_v50 = vpack.c.bf16 %v108_v49, %v106_v48 }
  0x88   :  { %546 = vmatprep.mubr.bf16.mxu0 %v111_v43  ;;  %599 = vmatprep.mubr.bf16.mxu1 %v111_v43 }
  0x89   :  { %547 = vmatmul.mubr.bf16.vlgmr.msra.gmra.mxu0 %v110_v44  ;;  %600 = vmatmul.mubr.bf16.vlgmr.msra.gmra.mxu1 %v110_v44 }
  0x8a   :  { %556 = vmatprep.mubr.bf16.mxu0 %v113_v45  ;;  %609 = vmatprep.mubr.bf16.mxu1 %v113_v45 }
  0x91   :  { %557 = vmatmul.mubr.bf16.gmra.mxu0 %v112_v50  ;;  %610 = vmatmul.mubr.bf16.gmra.mxu1 %v112_v50 }
 0x149   :  { %v548_v51 = vpop.f32.mrf.mxu0  ;;  %v601_v52 = vpop.f32.mrf.mxu1 }
 0x14b   :  { %v550_v53 = vpop.f32.mrf.mxu0  ;;  %v603_v54 = vpop.f32.mrf.mxu1 }
 0x14c   :  { %v803_v55 = vpack.c.bf16 %v550_v53, %v548_v51  ;;  %v804_v56 = vpack.c.bf16 %v603_v54, %v601_v52 }
 0x14d   :  { %v552_v57 = vpop.f32.mrf.mxu0  ;;  %v605_v58 = vpop.f32.mrf.mxu1 }
 0x14e   :  { %719 = vst [vmem:[%s1183_s4] sm:$0xff] %v803_v55  ;;  %720 = vst [vmem:[%s1183_s4 + $0x8] sm:$0xff] %v804_v56 }
 0x14f   :  { %v554_v59 = vpop.f32.mrf.mxu0  ;;  %v607_v60 = vpop.f32.mrf.mxu1 }
 0x150   :  { %v805_v61 = vpack.c.bf16 %v554_v59, %v552_v57  ;;  %v806_v62 = vpack.c.bf16 %v607_v60, %v605_v58 }
 0x151   :  { %v558_v63 = vpop.f32.mrf.mxu0  ;;  %v611_v0 = vpop.f32.mrf.mxu1 }
 0x152   :  { %721 = vst [vmem:[%s1183_s4 + $0x10] sm:$0xff] %v805_v61  ;;  %722 = vst [vmem:[%s1183_s4 + $0x18] sm:$0xff] %v806_v62 }
 0x153   :  { %v560_v1 = vpop.f32.mrf.mxu0  ;;  %v613_v2 = vpop.f32.mrf.mxu1 }
 0x154   :  { %v807_v3 = vpack.c.bf16 %v560_v1, %v558_v63  ;;  %v808_v4 = vpack.c.bf16 %v613_v2, %v611_v0 }
 0x155   :  { %v562_v5 = vpop.f32.mrf.mxu0  ;;  %v615_v6 = vpop.f32.mrf.mxu1 }
 0x156   :  { %723 = vst [vmem:[%s1183_s4 + $0x20] sm:$0xff] %v807_v3  ;;  %724 = vst [vmem:[%s1183_s4 + $0x28] sm:$0xff] %v808_v4 }
 0x157   :  { %v564_v7 = vpop.f32.mrf.mxu0  ;;  %v617_v8 = vpop.f32.mrf.mxu1 }
 0x158   :  { %v809_v9 = vpack.c.bf16 %v564_v7, %v562_v5  ;;  %v810_v10 = vpack.c.bf16 %v617_v8, %v615_v6 }
 0x15a   :  { %725 = vst [vmem:[%s1183_s4 + $0x30] sm:$0xff] %v809_v9  ;;  %726 = vst [vmem:[%s1183_s4 + $0x38] sm:$0xff] %v810_v10 }

// kernel: mistral_upsampler_forward.24
= control target key start
LH: loop header
LB: loop body
LE: loop exit
PB: predicated region body
PF: predicated region fallthrough
CT: control target
= control target key end

     0   :  { %v1851_v0 = vmov 0   ;;  %s2399_s1 = inlined_call_operand.vmem [shape: f32[32,1], index: 1, kind: input, shape index: {}]   ;;  %s2400_s3 = inlined_call_operand.vmem [shape: bf16[256,512], index: 3, kind: input, shape index: {}]   ;;  %s2401_s4 = inlined_call_operand.vmem [shape: bf16[256,512], index: 4, kind: input, shape index: {}]   ;;  %s2402_s2 = inlined_call_operand.vmem [shape: bf16[1,256], index: 2, kind: input, shape index: {}]   ;;  %s2403_s0 = inlined_call_operand.vmem [shape: bf16[32,256], index: 0, kind: input, shape index: {}]   ;;  %s2404_s5 = inlined_call_operand.vmem [shape: bf16[32,512], index: 5, kind: output, shape index: {}]  }
   0x1   :  { %1593 = vset.pattern.permute.xlu0 %v1851_v0  ;;  %v68_v1 = vld [vmem:[%s2399_s1] sm:$0xff]  ;;  %v69_v2 = vld [vmem:[%s2399_s1 + $0x8] sm:$0xff]  ;;  %1594 = vset.pattern.permute.xlu1 %v1851_v0  ;;  %v70_v3 = vld [vmem:[%s2399_s1 + $0x10] sm:$0xff] }
   0x2   :  { %74 = vperm.xlu0 %1593, %v68_v1   ;;  %84 = vperm.xlu1 %1594, %v70_v3   ;;  %v71_v4 = vld [vmem:[%s2399_s1 + $0x18] sm:$0xff]  ;;  %v1595_v5 = vld [vmem:[%s2400_s3 + $0xe4] ss:$16 sps:$4 sm:$0xff]   ;;  %v1599_v7 = vld [vmem:[%s2400_s3 + $0xe0] ss:$16 sps:$4 sm:$0xff]  }
   0x3   :  { %v1597_v6 = vld [vmem:[%s2400_s3 + $0xec] ss:$16 sps:$4 sm:$0xff]   ;;  %v1600_v8 = vld [vmem:[%s2400_s3 + $0xe8] ss:$16 sps:$4 sm:$0xff]   ;;  %533 = vmatprep.subr.bf16.mxu0 %v1595_v5  ;;  %v1601_v9 = vld [vmem:[%s2400_s3 + $0xc4] ss:$16 sps:$4 sm:$0xff]  }
   0x4   :  { %v1603_v10 = vld [vmem:[%s2400_s3 + $0xcc] ss:$16 sps:$4 sm:$0xff]   ;;  %586 = vmatprep.subr.bf16.mxu1 %v1597_v6  ;;  %534 = vmatpush1.bf16.msra.mxu0 %v1599_v7  ;;  %v1605_v11 = vld [vmem:[%s2400_s3 + $0xc0] ss:$16 sps:$4 sm:$0xff]   ;;  %v1606_v12 = vld [vmem:[%s2400_s3 + $0xc8] ss:$16 sps:$4 sm:$0xff]   ;;  %v103_v7 = vlaneseq }
   0x5   :  { %587 = vmatpush1.bf16.msra.mxu1 %v1600_v8  ;;  %535 = vmatprep.subr.bf16.mxu0 %v1601_v9  ;;  %v1607_v13 = vld [vmem:[%s2400_s3 + $0xa4] ss:$16 sps:$4 sm:$0xff]   ;;  %v1609_v14 = vld [vmem:[%s2400_s3 + $0xac] ss:$16 sps:$4 sm:$0xff]   ;;  %v1611_v15 = vld [vmem:[%s2400_s3 + $0xa0] ss:$16 sps:$4 sm:$0xff]  }
   0x6   :  { %79 = vperm.xlu0 %1593, %v69_v2   ;;  %89 = vperm.xlu1 %1594, %v71_v4   ;;  %v1612_v16 = vld [vmem:[%s2400_s3 + $0xa8] ss:$16 sps:$4 sm:$0xff]   ;;  %v1613_v17 = vld [vmem:[%s2400_s3 + $0x84] ss:$16 sps:$4 sm:$0xff]   ;;  %v1615_v18 = vld [vmem:[%s2400_s3 + $0x8c] ss:$16 sps:$4 sm:$0xff]  }
   0x7   :  { %588 = vmatprep.subr.bf16.mxu1 %v1603_v10  ;;  %v1617_v19 = vld [vmem:[%s2400_s3 + $0x80] ss:$16 sps:$4 sm:$0xff]   ;;  %v1618_v20 = vld [vmem:[%s2400_s3 + $0x88] ss:$16 sps:$4 sm:$0xff]   ;;  %v1619_v21 = vld [vmem:[%s2400_s3 + $0x64] ss:$16 sps:$4 sm:$0xff]  }
   0x8   :  { %536 = vmatpush1.bf16.msra.mxu0 %v1605_v11  ;;  %v1621_v22 = vld [vmem:[%s2400_s3 + $0x6c] ss:$16 sps:$4 sm:$0xff]   ;;  %v1623_v23 = vld [vmem:[%s2400_s3 + $0x60] ss:$16 sps:$4 sm:$0xff]   ;;  %v1624_v24 = vld [vmem:[%s2400_s3 + $0x68] ss:$16 sps:$4 sm:$0xff]  }
   0x9   :  { %589 = vmatpush1.bf16.msra.mxu1 %v1606_v12  ;;  %537 = vmatprep.subr.bf16.mxu0 %v1607_v13  ;;  %v1625_v25 = vld [vmem:[%s2400_s3 + $0x44] ss:$16 sps:$4 sm:$0xff]   ;;  %v1627_v26 = vld [vmem:[%s2400_s3 + $0x4c] ss:$16 sps:$4 sm:$0xff]   ;;  %v1629_v27 = vld [vmem:[%s2400_s3 + $0x40] ss:$16 sps:$4 sm:$0xff]  }
   0xa   :  { %590 = vmatprep.subr.bf16.mxu1 %v1609_v14  ;;  %v1630_v28 = vld [vmem:[%s2400_s3 + $0x48] ss:$16 sps:$4 sm:$0xff]   ;;  %v1631_v29 = vld [vmem:[%s2400_s3 + $0x24] ss:$16 sps:$4 sm:$0xff]   ;;  %v1633_v30 = vld [vmem:[%s2400_s3 + $0x2c] ss:$16 sps:$4 sm:$0xff]  }
   0xb   :  { %v1635_v31 = vld [vmem:[%s2400_s3 + $0x20] ss:$16 sps:$4 sm:$0xff]   ;;  %v1636_v32 = vld [vmem:[%s2400_s3 + $0x28] ss:$16 sps:$4 sm:$0xff]   ;;  %v1637_v33 = vld [vmem:[%s2400_s3 + $0x4] ss:$16 sps:$4 sm:$0xff]  }
   0xc   :  { %538 = vmatpush1.bf16.msra.mxu0 %v1611_v15  ;;  %v1639_v34 = vld [vmem:[%s2400_s3 + $0xc] ss:$16 sps:$4 sm:$0xff]   ;;  %v1641_v35 = vld [vmem:[%s2400_s3] ss:$16 sps:$4 sm:$0xff]   ;;  %v1642_v36 = vld [vmem:[%s2400_s3 + $0x8] ss:$16 sps:$4 sm:$0xff]  }
   0xd   :  { %591 = vmatpush1.bf16.msra.mxu1 %v1612_v16  ;;  %539 = vmatprep.subr.bf16.mxu0 %v1613_v17  ;;  %v1643_v37 = vld [vmem:[%s2400_s3 + $0x1e4] ss:$16 sps:$4 sm:$0xff]   ;;  %v1645_v38 = vld [vmem:[%s2400_s3 + $0x1ec] ss:$16 sps:$4 sm:$0xff]   ;;  %v1647_v39 = vld [vmem:[%s2400_s3 + $0x1e0] ss:$16 sps:$4 sm:$0xff]  }
   0xe   :  { %592 = vmatprep.subr.bf16.mxu1 %v1615_v18  ;;  %v1648_v40 = vld [vmem:[%s2400_s3 + $0x1e8] ss:$16 sps:$4 sm:$0xff]   ;;  %v1649_v41 = vld [vmem:[%s2400_s3 + $0x1c4] ss:$16 sps:$4 sm:$0xff]   ;;  %v1651_v42 = vld [vmem:[%s2400_s3 + $0x1cc] ss:$16 sps:$4 sm:$0xff]  }
   0xf   :  { %v1653_v43 = vld [vmem:[%s2400_s3 + $0x1c0] ss:$16 sps:$4 sm:$0xff]   ;;  %v1654_v44 = vld [vmem:[%s2400_s3 + $0x1c8] ss:$16 sps:$4 sm:$0xff]   ;;  %v1655_v45 = vld [vmem:[%s2400_s3 + $0x1a4] ss:$16 sps:$4 sm:$0xff]  }
  0x10   :  { %540 = vmatpush1.bf16.msra.mxu0 %v1617_v19  ;;  %v1657_v46 = vld [vmem:[%s2400_s3 + $0x1ac] ss:$16 sps:$4 sm:$0xff]   ;;  %v1659_v47 = vld [vmem:[%s2400_s3 + $0x1a0] ss:$16 sps:$4 sm:$0xff]   ;;  %v1660_v48 = vld [vmem:[%s2400_s3 + $0x1a8] ss:$16 sps:$4 sm:$0xff]  }
  0x11   :  { %593 = vmatpush1.bf16.msra.mxu1 %v1618_v20  ;;  %541 = vmatprep.subr.bf16.mxu0 %v1619_v21  ;;  %v1661_v49 = vld [vmem:[%s2400_s3 + $0x184] ss:$16 sps:$4 sm:$0xff]   ;;  %v1663_v50 = vld [vmem:[%s2400_s3 + $0x18c] ss:$16 sps:$4 sm:$0xff]   ;;  %v1665_v51 = vld [vmem:[%s2400_s3 + $0x180] ss:$16 sps:$4 sm:$0xff]  }
  0x12   :  { %594 = vmatprep.subr.bf16.mxu1 %v1621_v22  ;;  %v1666_v52 = vld [vmem:[%s2400_s3 + $0x188] ss:$16 sps:$4 sm:$0xff]   ;;  %v1667_v53 = vld [vmem:[%s2400_s3 + $0x164] ss:$16 sps:$4 sm:$0xff]   ;;  %v1669_v54 = vld [vmem:[%s2400_s3 + $0x16c] ss:$16 sps:$4 sm:$0xff]  }
  0x13   :  { %v1671_v55 = vld [vmem:[%s2400_s3 + $0x160] ss:$16 sps:$4 sm:$0xff]   ;;  %v1672_v56 = vld [vmem:[%s2400_s3 + $0x168] ss:$16 sps:$4 sm:$0xff]   ;;  %v1673_v57 = vld [vmem:[%s2400_s3 + $0x144] ss:$16 sps:$4 sm:$0xff]  }
  0x14   :  { %542 = vmatpush1.bf16.msra.mxu0 %v1623_v23  ;;  %v1675_v58 = vld [vmem:[%s2400_s3 + $0x14c] ss:$16 sps:$4 sm:$0xff]   ;;  %v1677_v59 = vld [vmem:[%s2400_s3 + $0x140] ss:$16 sps:$4 sm:$0xff]   ;;  %v1678_v60 = vld [vmem:[%s2400_s3 + $0x148] ss:$16 sps:$4 sm:$0xff]  }
  0x15   :  { %595 = vmatpush1.bf16.msra.mxu1 %v1624_v24  ;;  %543 = vmatprep.subr.bf16.mxu0 %v1625_v25  ;;  %v1679_v61 = vld [vmem:[%s2400_s3 + $0x124] ss:$16 sps:$4 sm:$0xff]   ;;  %v1681_v62 = vld [vmem:[%s2400_s3 + $0x12c] ss:$16 sps:$4 sm:$0xff]   ;;  %v1683_v63 = vld [vmem:[%s2400_s3 + $0x120] ss:$16 sps:$4 sm:$0xff]  }
  0x16   :  { %596 = vmatprep.subr.bf16.mxu1 %v1627_v26  ;;  %v1684_v0 = vld [vmem:[%s2400_s3 + $0x128] ss:$16 sps:$4 sm:$0xff]   ;;  %v1685_v1 = vld [vmem:[%s2400_s3 + $0x104] ss:$16 sps:$4 sm:$0xff]   ;;  %v1687_v2 = vld [vmem:[%s2400_s3 + $0x10c] ss:$16 sps:$4 sm:$0xff]  }
  0x17   :  { %v1689_v3 = vld [vmem:[%s2400_s3 + $0x100] ss:$16 sps:$4 sm:$0xff]   ;;  %v1690_v4 = vld [vmem:[%s2400_s3 + $0x108] ss:$16 sps:$4 sm:$0xff]   ;;  %v1693_v5 = vld [vmem:[%s2401_s4 + $0xe4] ss:$16 sps:$4 sm:$0xff]  }
  0x18   :  { %544 = vmatpush1.bf16.msra.mxu0 %v1629_v27  ;;  %v1696_v6 = vld [vmem:[%s2401_s4 + $0xec] ss:$16 sps:$4 sm:$0xff]   ;;  %v104_v8 = vshrl.u32 %v103_v7, 7  ;;  %v100_v9 = vld [vmem:[%s2402_s2] sm:$0x3]  ;;  %v58_v14 = vld [vmem:[%s2403_s0 + $0x10] sm:$0xff] }
  0x19   :  { %597 = vmatpush1.bf16.msra.mxu1 %v1630_v28  ;;  %545 = vmatprep.subr.bf16.mxu0 %v1631_v29  ;;  %v101_v10 = vunpack.c.l.bf16 %v100_v9  ;;  %v56_v13 = vld [vmem:[%s2403_s0] sm:$0xff]  ;;  %v57_v19 = vld [vmem:[%s2403_s0 + $0x8] sm:$0xff]  ;;  %v59_v20 = vld [vmem:[%s2403_s0 + $0x18] sm:$0xff]  ;;  %v65_v21 = vunpack.c.h.bf16 %v58_v14 }
  0x1a   :  { %598 = vmatprep.subr.bf16.mxu1 %v1633_v30  ;;  %v105_v11 = vsub.s32 0, %v104_v8  ;;  %v109_v12 = vsub.s32 2, %v104_v8  ;;  %v60_v17 = vunpack.c.l.bf16 %v56_v13  ;;  %v61_v18 = vunpack.c.h.bf16 %v56_v13  ;;  %v1723_v7 = vld [vmem:[%s2401_s4 + $0x44] ss:$16 sps:$4 sm:$0xff]   ;;  %v1726_v8 = vld [vmem:[%s2401_s4 + $0x4c] ss:$16 sps:$4 sm:$0xff]  }
  0x1b   :  { %v62_v24 = vunpack.c.l.bf16 %v57_v19  ;;  %v63_v25 = vunpack.c.h.bf16 %v57_v19  ;;  %v67_v26 = vunpack.c.h.bf16 %v59_v20  ;;  %v1721_v9 = vld [vmem:[%s2401_s4 + $0x40] ss:$16 sps:$4 sm:$0xff]   ;;  %v1741_v19 = vld [vmem:[%s2401_s4 + $0x1e4] ss:$16 sps:$4 sm:$0xff]  }
  0x1c   :  { %546 = vmatpush1.bf16.msra.mxu0 %v1635_v31  ;;  %v106_v15 = vrot.slane %v101_v10, %v105_v11  ;;  %v110_v16 = vrot.slane %v101_v10, %v109_v12  ;;  %v1724_v10 = vld [vmem:[%s2401_s4 + $0x48] ss:$16 sps:$4 sm:$0xff]   ;;  %v1732_v12 = vld [vmem:[%s2401_s4 + $0x2c] ss:$16 sps:$4 sm:$0xff]   ;;  %v1727_v13 = vld [vmem:[%s2401_s4 + $0x20] ss:$16 sps:$4 sm:$0xff]  }
  0x1d   :  { %599 = vmatpush1.bf16.msra.mxu1 %v1636_v32  ;;  %547 = vmatprep.subr.bf16.mxu0 %v1637_v33  ;;  %v64_v33 = vunpack.c.l.bf16 %v58_v14  ;;  %v1730_v14 = vld [vmem:[%s2401_s4 + $0x28] ss:$16 sps:$4 sm:$0xff]  }
  0x1e   :  { %600 = vmatprep.subr.bf16.mxu1 %v1639_v34  ;;  %v116_v27 = vrot.slane %v106_v15, %v105_v11  ;;  %v120_v28 = vrot.slane %v110_v16, %v105_v11  ;;  %v1729_v11 = vld [vmem:[%s2401_s4 + $0x24] ss:$16 sps:$4 sm:$0xff]   ;;  %v1738_v16 = vld [vmem:[%s2401_s4 + $0xc] ss:$16 sps:$4 sm:$0xff]  }
  0x1f   :  { %v1735_v15 = vld [vmem:[%s2401_s4 + $0x4] ss:$16 sps:$4 sm:$0xff]  }
  0x20   :  { %548 = vmatpush1.bf16.msra.mxu0 %v1641_v35  ;;  %v66_v35 = vunpack.c.l.bf16 %v59_v20  ;;  %v1744_v20 = vld [vmem:[%s2401_s4 + $0x1ec] ss:$16 sps:$4 sm:$0xff]  }
  0x21   :  { %601 = vmatpush1.bf16.msra.mxu1 %v1642_v36  ;;  %549 = vmatprep.subr.bf16.mxu0 %v1643_v37 }
  0x22   :  { %602 = vmatprep.subr.bf16.mxu1 %v1645_v38 }
  0x24   :  { %550 = vmatpush2.bf16.msra.mxu0 %v1647_v39 }
  0x25   :  { %603 = vmatpush2.bf16.msra.mxu1 %v1648_v40  ;;  %551 = vmatprep.subr.bf16.mxu0 %v1649_v41 }
  0x26   :  { %604 = vmatprep.subr.bf16.mxu1 %v1651_v42 }
  0x28   :  { %552 = vmatpush2.bf16.msra.mxu0 %v1653_v43 }
  0x29   :  { %605 = vmatpush2.bf16.msra.mxu1 %v1654_v44  ;;  %553 = vmatprep.subr.bf16.mxu0 %v1655_v45 }
  0x2a   :  { %606 = vmatprep.subr.bf16.mxu1 %v1657_v46 }
  0x2c   :  { %554 = vmatpush2.bf16.msra.mxu0 %v1659_v47 }
  0x2d   :  { %607 = vmatpush2.bf16.msra.mxu1 %v1660_v48  ;;  %555 = vmatprep.subr.bf16.mxu0 %v1661_v49  ;;  %v1691_v49 = vld [vmem:[%s2401_s4 + $0xe0] ss:$16 sps:$4 sm:$0xff]  }
  0x2e   :  { %608 = vmatprep.subr.bf16.mxu1 %v1663_v50  ;;  %v1694_v50 = vld [vmem:[%s2401_s4 + $0xe8] ss:$16 sps:$4 sm:$0xff]  }
  0x30   :  { %556 = vmatpush2.bf16.msra.mxu0 %v1665_v51  ;;  %v1699_v51 = vld [vmem:[%s2401_s4 + $0xc4] ss:$16 sps:$4 sm:$0xff]  }
  0x31   :  { %609 = vmatpush2.bf16.msra.mxu1 %v1666_v52  ;;  %557 = vmatprep.subr.bf16.mxu0 %v1667_v53  ;;  %v1702_v52 = vld [vmem:[%s2401_s4 + $0xcc] ss:$16 sps:$4 sm:$0xff]  }
  0x32   :  { %610 = vmatprep.subr.bf16.mxu1 %v1669_v54 }
  0x34   :  { %558 = vmatpush2.bf16.msra.mxu0 %v1671_v55 }
  0x35   :  { %611 = vmatpush2.bf16.msra.mxu1 %v1672_v56  ;;  %559 = vmatprep.subr.bf16.mxu0 %v1673_v57  ;;  %v1697_v56 = vld [vmem:[%s2401_s4 + $0xc0] ss:$16 sps:$4 sm:$0xff]   ;;  %v1700_v57 = vld [vmem:[%s2401_s4 + $0xc8] ss:$16 sps:$4 sm:$0xff]  }
  0x36   :  { %612 = vmatprep.subr.bf16.mxu1 %v1675_v58  ;;  %v1705_v58 = vld [vmem:[%s2401_s4 + $0xa4] ss:$16 sps:$4 sm:$0xff]  }
  0x38   :  { %560 = vmatpush2.bf16.msra.mxu0 %v1677_v59  ;;  %v1708_v59 = vld [vmem:[%s2401_s4 + $0xac] ss:$16 sps:$4 sm:$0xff]  }
  0x39   :  { %613 = vmatpush2.bf16.msra.mxu1 %v1678_v60  ;;  %561 = vmatprep.subr.bf16.mxu0 %v1679_v61  ;;  %v1703_v61 = vld [vmem:[%s2401_s4 + $0xa0] ss:$16 sps:$4 sm:$0xff]  }
  0x3a   :  { %614 = vmatprep.subr.bf16.mxu1 %v1681_v62  ;;  %v1706_v62 = vld [vmem:[%s2401_s4 + $0xa8] ss:$16 sps:$4 sm:$0xff]  }
  0x3c   :  { %562 = vmatpush2.bf16.msra.mxu0 %v1683_v63  ;;  %v1711_v63 = vld [vmem:[%s2401_s4 + $0x84] ss:$16 sps:$4 sm:$0xff]  }
  0x3d   :  { %615 = vmatpush2.bf16.msra.mxu1 %v1684_v0  ;;  %563 = vmatprep.subr.bf16.mxu0 %v1685_v1  ;;  %v1714_v0 = vld [vmem:[%s2401_s4 + $0x8c] ss:$16 sps:$4 sm:$0xff]   ;;  %v1709_v1 = vld [vmem:[%s2401_s4 + $0x80] ss:$16 sps:$4 sm:$0xff]  }
  0x3e   :  { %616 = vmatprep.subr.bf16.mxu1 %v1687_v2  ;;  %v1712_v2 = vld [vmem:[%s2401_s4 + $0x88] ss:$16 sps:$4 sm:$0xff]  }
  0x40   :  { %564 = vmatpush2.bf16.msra.mxu0 %v1689_v3  ;;  %v1717_v3 = vld [vmem:[%s2401_s4 + $0x64] ss:$16 sps:$4 sm:$0xff]  }
  0x41   :  { %617 = vmatpush2.bf16.msra.mxu1 %v1690_v4  ;;  %1071 = vmatprep.subr.bf16.mxu0 %v1693_v5  ;;  %v1720_v4 = vld [vmem:[%s2401_s4 + $0x6c] ss:$16 sps:$4 sm:$0xff]   ;;  %v1715_v5 = vld [vmem:[%s2401_s4 + $0x60] ss:$16 sps:$4 sm:$0xff]  }
  0x42   :  { %1124 = vmatprep.subr.bf16.mxu1 %v1696_v6  ;;  %v1718_v6 = vld [vmem:[%s2401_s4 + $0x68] ss:$16 sps:$4 sm:$0xff]  }
  0x7d   :  { %v75_v22 = vpop.permute.xlu0 %74  ;;  %v85_v23 = vpop.permute.xlu1 %84 }
  0x7e   :  { %v92_v29 = vmul.f32 %v75_v22, %v60_v17  ;;  %v93_v30 = vmul.f32 %v75_v22, %v61_v18  ;;  %v97_v31 = vmul.f32 %v85_v23, %v65_v21  ;;  %v96_v45 = vmul.f32 %v85_v23, %v64_v33  ;;  %v1733_v17 = vld [vmem:[%s2401_s4] ss:$16 sps:$4 sm:$0xff]   ;;  %v1736_v18 = vld [vmem:[%s2401_s4 + $0x8] ss:$16 sps:$4 sm:$0xff]   ;;  %v1747_v23 = vld [vmem:[%s2401_s4 + $0x1c4] ss:$16 sps:$4 sm:$0xff]  }
  0x7f   :  { %v1739_v21 = vld [vmem:[%s2401_s4 + $0x1e0] ss:$16 sps:$4 sm:$0xff]   ;;  %v1742_v22 = vld [vmem:[%s2401_s4 + $0x1e8] ss:$16 sps:$4 sm:$0xff]  }
  0x80   :  { %v121_v39 = vmul.f32 %v116_v27, %v92_v29  ;;  %v122_v40 = vmul.f32 %v120_v28, %v93_v30  ;;  %v126_v43 = vmul.f32 %v120_v28, %v97_v31  ;;  %v125_v54 = vmul.f32 %v116_v27, %v96_v45  ;;  %v1751_v29 = vld [vmem:[%s2401_s4 + $0x1a0] ss:$16 sps:$4 sm:$0xff]   ;;  %v1754_v30 = vld [vmem:[%s2401_s4 + $0x1a8] ss:$16 sps:$4 sm:$0xff]   ;;  %v1759_v31 = vld [vmem:[%s2401_s4 + $0x184] ss:$16 sps:$4 sm:$0xff]  }
  0x81   :  { %v80_v32 = vpop.permute.xlu0 %79  ;;  %v90_v34 = vpop.permute.xlu1 %89  ;;  %v1757_v33 = vld [vmem:[%s2401_s4 + $0x180] ss:$16 sps:$4 sm:$0xff]  }
  0x82   :  { %v94_v36 = vmul.f32 %v80_v32, %v62_v24  ;;  %v95_v37 = vmul.f32 %v80_v32, %v63_v25  ;;  %v99_v38 = vmul.f32 %v90_v34, %v67_v26  ;;  %v98_v46 = vmul.f32 %v90_v34, %v66_v35  ;;  %v1750_v24 = vld [vmem:[%s2401_s4 + $0x1cc] ss:$16 sps:$4 sm:$0xff]   ;;  %v1745_v25 = vld [vmem:[%s2401_s4 + $0x1c0] ss:$16 sps:$4 sm:$0xff]   ;;  %v1748_v26 = vld [vmem:[%s2401_s4 + $0x1c8] ss:$16 sps:$4 sm:$0xff]  }
  0x83   :  { %v1762_v32 = vld [vmem:[%s2401_s4 + $0x18c] ss:$16 sps:$4 sm:$0xff]   ;;  %v1760_v34 = vld [vmem:[%s2401_s4 + $0x188] ss:$16 sps:$4 sm:$0xff]   ;;  %v1765_v35 = vld [vmem:[%s2401_s4 + $0x164] ss:$16 sps:$4 sm:$0xff]  }
  0x84   :  { %v123_v41 = vmul.f32 %v116_v27, %v94_v36  ;;  %v124_v42 = vmul.f32 %v120_v28, %v95_v37  ;;  %v128_v44 = vmul.f32 %v120_v28, %v99_v38  ;;  %v127_v55 = vmul.f32 %v116_v27, %v98_v46  ;;  %v1753_v27 = vld [vmem:[%s2401_s4 + $0x1a4] ss:$16 sps:$4 sm:$0xff]   ;;  %v1756_v28 = vld [vmem:[%s2401_s4 + $0x1ac] ss:$16 sps:$4 sm:$0xff]   ;;  %v1763_v37 = vld [vmem:[%s2401_s4 + $0x160] ss:$16 sps:$4 sm:$0xff]  }
  0x85   :  { %v1768_v36 = vld [vmem:[%s2401_s4 + $0x16c] ss:$16 sps:$4 sm:$0xff]   ;;  %v1766_v38 = vld [vmem:[%s2401_s4 + $0x168] ss:$16 sps:$4 sm:$0xff]   ;;  %v1775_v45 = vld [vmem:[%s2401_s4 + $0x120] ss:$16 sps:$4 sm:$0xff]  }
  0x86   :  { %v2107_v47 = vpack.c.bf16 %v123_v41, %v121_v39  ;;  %v130_v48 = vpack.c.bf16 %v124_v42, %v122_v40  ;;  %v2121_v53 = vpack.c.bf16 %v128_v44, %v126_v43  ;;  %v2139_v60 = vpack.c.bf16 %v127_v55, %v125_v54  ;;  %v1771_v39 = vld [vmem:[%s2401_s4 + $0x144] ss:$16 sps:$4 sm:$0xff]   ;;  %v1774_v40 = vld [vmem:[%s2401_s4 + $0x14c] ss:$16 sps:$4 sm:$0xff]   ;;  %v1769_v41 = vld [vmem:[%s2401_s4 + $0x140] ss:$16 sps:$4 sm:$0xff]  }
  0x87   :  { %v1772_v42 = vld [vmem:[%s2401_s4 + $0x148] ss:$16 sps:$4 sm:$0xff]   ;;  %v1777_v43 = vld [vmem:[%s2401_s4 + $0x124] ss:$16 sps:$4 sm:$0xff]   ;;  %v1780_v44 = vld [vmem:[%s2401_s4 + $0x12c] ss:$16 sps:$4 sm:$0xff]  }
  0x88   :  { %565 = vmatprep.mubr.bf16.mxu0 %v130_v48  ;;  %618 = vmatprep.mubr.bf16.mxu1 %v130_v48  ;;  %v1778_v46 = vld [vmem:[%s2401_s4 + $0x128] ss:$16 sps:$4 sm:$0xff]  }
  0x89   :  { %566 = vmatmul.mubr.bf16.vlgmr.msra.gmra.mxu0 %v2107_v47  ;;  %619 = vmatmul.mubr.bf16.vlgmr.msra.gmra.mxu1 %v2107_v47 }
  0x8a   :  { %1072 = vmatpush1.bf16.msra.mxu0 %v1691_v49  ;;  %1125 = vmatpush1.bf16.msra.mxu1 %v1694_v50  ;;  %v1786_v49 = vld [vmem:[%s2401_s4 + $0x10c] ss:$16 sps:$4 sm:$0xff]   ;;  %v1781_v50 = vld [vmem:[%s2401_s4 + $0x100] ss:$16 sps:$4 sm:$0xff]  }
  0x8b   :  { %1073 = vmatprep.subr.bf16.mxu0 %v1699_v51  ;;  %1126 = vmatprep.subr.bf16.mxu1 %v1702_v52  ;;  %v1784_v51 = vld [vmem:[%s2401_s4 + $0x108] ss:$16 sps:$4 sm:$0xff]  }
  0x8c   :  { %575 = vmatprep.mubr.bf16.mxu0 %v2121_v53  ;;  %628 = vmatprep.mubr.bf16.mxu1 %v2121_v53 }
  0x8e   :  { %1074 = vmatpush1.bf16.msra.mxu0 %v1697_v56  ;;  %1127 = vmatpush1.bf16.msra.mxu1 %v1700_v57 }
  0x8f   :  { %1075 = vmatprep.subr.bf16.mxu0 %v1705_v58  ;;  %1128 = vmatprep.subr.bf16.mxu1 %v1708_v59 }
  0x91   :  { %576 = vmatmul.mubr.bf16.gmra.mxu0 %v2139_v60  ;;  %629 = vmatmul.mubr.bf16.gmra.mxu1 %v2139_v60 }
  0x92   :  { %1076 = vmatpush1.bf16.msra.mxu0 %v1703_v61  ;;  %1129 = vmatpush1.bf16.msra.mxu1 %v1706_v62 }
  0x93   :  { %1103 = vmatprep.mubr.bf16.mxu0 %v130_v48  ;;  %1156 = vmatprep.mubr.bf16.mxu1 %v130_v48  ;;  %v1783_v48 = vld [vmem:[%s2401_s4 + $0x104] ss:$16 sps:$4 sm:$0xff]  }
  0x94   :  { %1077 = vmatprep.subr.bf16.mxu0 %v1711_v63  ;;  %1130 = vmatprep.subr.bf16.mxu1 %v1714_v0 }
  0x96   :  { %1078 = vmatpush1.bf16.msra.mxu0 %v1709_v1  ;;  %1131 = vmatpush1.bf16.msra.mxu1 %v1712_v2 }
  0x97   :  { %1079 = vmatprep.subr.bf16.mxu0 %v1717_v3  ;;  %1132 = vmatprep.subr.bf16.mxu1 %v1720_v4 }
  0x9a   :  { %1080 = vmatpush1.bf16.msra.mxu0 %v1715_v5  ;;  %1133 = vmatpush1.bf16.msra.mxu1 %v1718_v6 }
  0x9b   :  { %1081 = vmatprep.subr.bf16.mxu0 %v1723_v7  ;;  %1134 = vmatprep.subr.bf16.mxu1 %v1726_v8 }
  0x9e   :  { %1082 = vmatpush1.bf16.msra.mxu0 %v1721_v9  ;;  %1135 = vmatpush1.bf16.msra.mxu1 %v1724_v10 }
  0x9f   :  { %1083 = vmatprep.subr.bf16.mxu0 %v1729_v11  ;;  %1136 = vmatprep.subr.bf16.mxu1 %v1732_v12 }
  0xa2   :  { %1084 = vmatpush1.bf16.msra.mxu0 %v1727_v13  ;;  %1137 = vmatpush1.bf16.msra.mxu1 %v1730_v14 }
  0xa3   :  { %1085 = vmatprep.subr.bf16.mxu0 %v1735_v15  ;;  %1138 = vmatprep.subr.bf16.mxu1 %v1738_v16 }
  0xa6   :  { %1086 = vmatpush1.bf16.msra.mxu0 %v1733_v17  ;;  %1139 = vmatpush1.bf16.msra.mxu1 %v1736_v18 }
  0xa7   :  { %1087 = vmatprep.subr.bf16.mxu0 %v1741_v19  ;;  %1140 = vmatprep.subr.bf16.mxu1 %v1744_v20 }
  0xaa   :  { %1088 = vmatpush2.bf16.msra.mxu0 %v1739_v21  ;;  %1141 = vmatpush2.bf16.msra.mxu1 %v1742_v22 }
  0xab   :  { %1089 = vmatprep.subr.bf16.mxu0 %v1747_v23  ;;  %1142 = vmatprep.subr.bf16.mxu1 %v1750_v24 }
  0xae   :  { %1090 = vmatpush2.bf16.msra.mxu0 %v1745_v25  ;;  %1143 = vmatpush2.bf16.msra.mxu1 %v1748_v26 }
  0xaf   :  { %1091 = vmatprep.subr.bf16.mxu0 %v1753_v27  ;;  %1144 = vmatprep.subr.bf16.mxu1 %v1756_v28 }
  0xb2   :  { %1092 = vmatpush2.bf16.msra.mxu0 %v1751_v29  ;;  %1145 = vmatpush2.bf16.msra.mxu1 %v1754_v30 }
  0xb3   :  { %1093 = vmatprep.subr.bf16.mxu0 %v1759_v31  ;;  %1146 = vmatprep.subr.bf16.mxu1 %v1762_v32 }
  0xb6   :  { %1094 = vmatpush2.bf16.msra.mxu0 %v1757_v33  ;;  %1147 = vmatpush2.bf16.msra.mxu1 %v1760_v34 }
  0xb7   :  { %1095 = vmatprep.subr.bf16.mxu0 %v1765_v35  ;;  %1148 = vmatprep.subr.bf16.mxu1 %v1768_v36 }
  0xba   :  { %1096 = vmatpush2.bf16.msra.mxu0 %v1763_v37  ;;  %1149 = vmatpush2.bf16.msra.mxu1 %v1766_v38 }
  0xbb   :  { %1097 = vmatprep.subr.bf16.mxu0 %v1771_v39  ;;  %1150 = vmatprep.subr.bf16.mxu1 %v1774_v40 }
  0xbe   :  { %1098 = vmatpush2.bf16.msra.mxu0 %v1769_v41  ;;  %1151 = vmatpush2.bf16.msra.mxu1 %v1772_v42 }
  0xbf   :  { %1099 = vmatprep.subr.bf16.mxu0 %v1777_v43  ;;  %1152 = vmatprep.subr.bf16.mxu1 %v1780_v44 }
  0xc2   :  { %1100 = vmatpush2.bf16.msra.mxu0 %v1775_v45  ;;  %1153 = vmatpush2.bf16.msra.mxu1 %v1778_v46 }
  0xc3   :  { %1101 = vmatprep.subr.bf16.mxu0 %v1783_v48  ;;  %1154 = vmatprep.subr.bf16.mxu1 %v1786_v49 }
  0xc6   :  { %1102 = vmatpush2.bf16.msra.mxu0 %v1781_v50  ;;  %1155 = vmatpush2.bf16.msra.mxu1 %v1784_v51 }
  0xc9   :  { %1104 = vmatmul.mubr.bf16.vlgmr.msra.gmra.mxu0 %v2107_v47  ;;  %1157 = vmatmul.mubr.bf16.vlgmr.msra.gmra.mxu1 %v2107_v47 }
  0xca   :  { %1113 = vmatprep.mubr.bf16.mxu0 %v2121_v53  ;;  %1166 = vmatprep.mubr.bf16.mxu1 %v2121_v53 }
  0xd1   :  { %1114 = vmatmul.mubr.bf16.gmra.mxu0 %v2139_v60  ;;  %1167 = vmatmul.mubr.bf16.gmra.mxu1 %v2139_v60 }
 0x149   :  { %v2311_v52 = vpop.f32.mrf.mxu0  ;;  %v2313_v54 = vpop.f32.mrf.mxu1 }
 0x14a   :  { %v1560_v60 = vmul.f32 -1.442695, %v2311_v52  ;;  %v1562_v62 = vmul.f32 -1.442695, %v2313_v54 }
 0x14b   :  { %v2315_v55 = vpop.f32.mrf.mxu0  ;;  %v2317_v56 = vpop.f32.mrf.mxu1 }
 0x14c   :  { %v1561_v63 = vmul.f32 -1.442695, %v2315_v55  ;;  %v1563_v0 = vmul.f32 -1.442695, %v2317_v56  ;;  %1787 = vpow2.f32 %v1560_v60 }
 0x14d   :  { %v2319_v57 = vpop.f32.mrf.mxu0  ;;  %v2321_v58 = vpop.f32.mrf.mxu1  ;;  %1789 = vpow2.f32 %v1562_v62 }
 0x14e   :  { %v1564_v2 = vmul.f32 -1.442695, %v2319_v57  ;;  %v1566_v4 = vmul.f32 -1.442695, %v2321_v58  ;;  %1791 = vpow2.f32 %v1561_v63 }
 0x14f   :  { %v2323_v47 = vpop.f32.mrf.mxu0  ;;  %v2325_v59 = vpop.f32.mrf.mxu1  ;;  %1793 = vpow2.f32 %v1563_v0 }
 0x150   :  { %v1565_v5 = vmul.f32 -1.442695, %v2323_v47  ;;  %v1567_v6 = vmul.f32 -1.442695, %v2325_v59  ;;  %1795 = vpow2.f32 %v1564_v2 }
 0x151   :  { %v2327_v53 = vpop.f32.mrf.mxu0  ;;  %v2330_v61 = vpop.f32.mrf.mxu1  ;;  %1797 = vpow2.f32 %v1566_v4 }
 0x152   :  { %v1568_v8 = vmul.f32 -1.442695, %v2327_v53  ;;  %v1570_v10 = vmul.f32 -1.442695, %v2330_v61  ;;  %1799 = vpow2.f32 %v1565_v5 }
 0x153   :  { %v2335_v1 = vpop.f32.mrf.mxu0  ;;  %v2338_v3 = vpop.f32.mrf.mxu1  ;;  %1801 = vpow2.f32 %v1567_v6 }
 0x154   :  { %v1569_v11 = vmul.f32 -1.442695, %v2335_v1  ;;  %v1571_v12 = vmul.f32 -1.442695, %v2338_v3  ;;  %1803 = vpow2.f32 %v1568_v8 }
 0x155   :  { %v2343_v7 = vpop.f32.mrf.mxu0  ;;  %v2346_v9 = vpop.f32.mrf.mxu1  ;;  %1805 = vpow2.f32 %v1570_v10 }
 0x156   :  { %v1572_v14 = vmul.f32 -1.442695, %v2343_v7  ;;  %v1574_v16 = vmul.f32 -1.442695, %v2346_v9  ;;  %1807 = vpow2.f32 %v1569_v11 }
 0x157   :  { %v2351_v13 = vpop.f32.mrf.mxu0  ;;  %v2354_v15 = vpop.f32.mrf.mxu1  ;;  %1809 = vpow2.f32 %v1571_v12 }
 0x158   :  { %v1573_v17 = vmul.f32 -1.442695, %v2351_v13  ;;  %v1575_v18 = vmul.f32 -1.442695, %v2354_v15  ;;  %1811 = vpow2.f32 %v1572_v14 }
 0x159   :  { %v1788_v19 = vpop.eup %1787  ;;  %1813 = vpow2.f32 %v1574_v16 }
 0x15a   :  { %v1790_v20 = vpop.eup %1789  ;;  %1815 = vpow2.f32 %v1573_v17  ;;  %v1276_v23 = vadd.f32 1.0, %v1788_v19 }
 0x15b   :  { %v1792_v21 = vpop.eup %1791  ;;  %1817 = vpow2.f32 %v1575_v18  ;;  %v1278_v25 = vadd.f32 1.0, %v1790_v20 }
 0x15c   :  { %v1794_v22 = vpop.eup %1793  ;;  %v1277_v27 = vadd.f32 1.0, %v1792_v21  ;;  %1819 = vrcp.f32 %v1276_v23 }
 0x15d   :  { %v1796_v24 = vpop.eup %1795  ;;  %v1279_v29 = vadd.f32 1.0, %v1794_v22  ;;  %1821 = vrcp.f32 %v1278_v25 }
 0x15e   :  { %v1798_v26 = vpop.eup %1797  ;;  %v1280_v31 = vadd.f32 1.0, %v1796_v24  ;;  %1823 = vrcp.f32 %v1277_v27 }
 0x15f   :  { %v1800_v28 = vpop.eup %1799  ;;  %v1282_v33 = vadd.f32 1.0, %v1798_v26  ;;  %1825 = vrcp.f32 %v1279_v29 }
 0x160   :  { %v1802_v30 = vpop.eup %1801  ;;  %v1281_v35 = vadd.f32 1.0, %v1800_v28  ;;  %1827 = vrcp.f32 %v1280_v31 }
 0x161   :  { %v1804_v32 = vpop.eup %1803  ;;  %v1283_v37 = vadd.f32 1.0, %v1802_v30  ;;  %1829 = vrcp.f32 %v1282_v33 }
 0x162   :  { %v1806_v34 = vpop.eup %1805  ;;  %v1284_v39 = vadd.f32 1.0, %v1804_v32  ;;  %1831 = vrcp.f32 %v1281_v35 }
 0x163   :  { %v1808_v36 = vpop.eup %1807  ;;  %v1286_v41 = vadd.f32 1.0, %v1806_v34  ;;  %1833 = vrcp.f32 %v1283_v37 }
 0x164   :  { %v1810_v38 = vpop.eup %1809  ;;  %v1285_v43 = vadd.f32 1.0, %v1808_v36  ;;  %1835 = vrcp.f32 %v1284_v39 }
 0x165   :  { %v1812_v40 = vpop.eup %1811  ;;  %v1287_v45 = vadd.f32 1.0, %v1810_v38  ;;  %1837 = vrcp.f32 %v1286_v41 }
 0x166   :  { %v1814_v42 = vpop.eup %1813  ;;  %v1288_v48 = vadd.f32 1.0, %v1812_v40  ;;  %1839 = vrcp.f32 %v1285_v43 }
 0x167   :  { %v1816_v44 = vpop.eup %1815  ;;  %v1290_v49 = vadd.f32 1.0, %v1814_v42  ;;  %1841 = vrcp.f32 %v1287_v45 }
 0x168   :  { %v1818_v46 = vpop.eup %1817  ;;  %v1289_v50 = vadd.f32 1.0, %v1816_v44  ;;  %1843 = vrcp.f32 %v1288_v48 }
 0x169   :  { %v1291_v51 = vadd.f32 1.0, %v1818_v46  ;;  %v1820_v60 = vpop.eup %1819  ;;  %1845 = vrcp.f32 %v1290_v49 }
 0x16a   :  { %v1822_v62 = vpop.eup %1821  ;;  %1847 = vrcp.f32 %v1289_v50  ;;  %v1324_v10 = vmul.f32 %v1820_v60, %v2311_v52 }
 0x16b   :  { %v1824_v63 = vpop.eup %1823  ;;  %1849 = vrcp.f32 %v1291_v51  ;;  %v1326_v11 = vmul.f32 %v1822_v62, %v2313_v54 }
 0x16c   :  { %v1826_v0 = vpop.eup %1825  ;;  %v1325_v12 = vmul.f32 %v1824_v63, %v2315_v55 }
 0x16d   :  { %v1828_v2 = vpop.eup %1827  ;;  %v1327_v14 = vmul.f32 %v1826_v0, %v2317_v56 }
 0x16e   :  { %v1830_v4 = vpop.eup %1829  ;;  %v1328_v25 = vmul.f32 %v1828_v2, %v2319_v57 }
 0x16f   :  { %v1832_v8 = vpop.eup %1831  ;;  %v1330_v26 = vmul.f32 %v1830_v4, %v2321_v58 }
 0x170   :  { %v1834_v16 = vpop.eup %1833  ;;  %v1329_v55 = vmul.f32 %v1832_v8, %v2323_v47 }
 0x171   :  { %v1836_v19 = vpop.eup %1835  ;;  %v1331_v56 = vmul.f32 %v1834_v16, %v2325_v59 }
 0x172   :  { %v1838_v24 = vpop.eup %1837  ;;  %v1332_v59 = vmul.f32 %v1836_v19, %v2327_v53 }
 0x173   :  { %v1840_v54 = vpop.eup %1839  ;;  %v1334_v36 = vmul.f32 %v1838_v24, %v2330_v61 }
 0x174   :  { %v1842_v30 = vpop.eup %1841  ;;  %v1333_v40 = vmul.f32 %v1840_v54, %v2335_v1 }
 0x175   :  { %v1844_v33 = vpop.eup %1843  ;;  %v1335_v41 = vmul.f32 %v1842_v30, %v2338_v3 }
 0x176   :  { %v1846_v35 = vpop.eup %1845  ;;  %v1336_v1 = vmul.f32 %v1844_v33, %v2343_v7 }
 0x177   :  { %v1848_v39 = vpop.eup %1847  ;;  %v1338_v3 = vmul.f32 %v1846_v35, %v2346_v9 }
 0x178   :  { %v1850_v44 = vpop.eup %1849  ;;  %v1337_v60 = vmul.f32 %v1848_v39, %v2351_v13 }
 0x179   :  { %v1339_v62 = vmul.f32 %v1850_v44, %v2354_v15 }
 0x189   :  { %v1105_v5 = vpop.f32.mrf.mxu0  ;;  %v1158_v6 = vpop.f32.mrf.mxu1 }
 0x18a   :  { %v1356_v20 = vmul.f32 %v1324_v10, %v1105_v5  ;;  %v1358_v21 = vmul.f32 %v1326_v11, %v1158_v6 }
 0x18b   :  { %v1107_v17 = vpop.f32.mrf.mxu0  ;;  %v1160_v18 = vpop.f32.mrf.mxu1 }
 0x18c   :  { %v1357_v22 = vmul.f32 %v1325_v12, %v1107_v17  ;;  %v1359_v23 = vmul.f32 %v1327_v14, %v1160_v18 }
 0x18d   :  { %v1109_v52 = vpop.f32.mrf.mxu0  ;;  %v1162_v27 = vpop.f32.mrf.mxu1 }
 0x18e   :  { %v1584_v28 = vpack.c.bf16 %v1357_v22, %v1356_v20  ;;  %v1585_v29 = vpack.c.bf16 %v1359_v23, %v1358_v21  ;;  %v1360_v57 = vmul.f32 %v1328_v25, %v1109_v52  ;;  %v1362_v58 = vmul.f32 %v1330_v26, %v1162_v27 }
 0x18f   :  { %v1111_v31 = vpop.f32.mrf.mxu0  ;;  %v1164_v32 = vpop.f32.mrf.mxu1 }
 0x190   :  { %1420 = vst [vmem:[%s2404_s5] sm:$0xff] %v1584_v28  ;;  %1421 = vst [vmem:[%s2404_s5 + $0x8] sm:$0xff] %v1585_v29  ;;  %v1361_v34 = vmul.f32 %v1329_v55, %v1111_v31  ;;  %v1363_v47 = vmul.f32 %v1331_v56, %v1164_v32 }
 0x191   :  { %v1115_v37 = vpop.f32.mrf.mxu0  ;;  %v1168_v38 = vpop.f32.mrf.mxu1 }
 0x192   :  { %v1586_v42 = vpack.c.bf16 %v1361_v34, %v1360_v57  ;;  %v1587_v43 = vpack.c.bf16 %v1363_v47, %v1362_v58  ;;  %v1364_v53 = vmul.f32 %v1332_v59, %v1115_v37  ;;  %v1366_v61 = vmul.f32 %v1334_v36, %v1168_v38 }
 0x193   :  { %v1117_v45 = vpop.f32.mrf.mxu0  ;;  %v1170_v46 = vpop.f32.mrf.mxu1 }
 0x194   :  { %1422 = vst [vmem:[%s2404_s5 + $0x10] sm:$0xff] %v1586_v42  ;;  %1423 = vst [vmem:[%s2404_s5 + $0x18] sm:$0xff] %v1587_v43  ;;  %v1365_v48 = vmul.f32 %v1333_v40, %v1117_v45  ;;  %v1367_v49 = vmul.f32 %v1335_v41, %v1170_v46 }
 0x195   :  { %v1119_v50 = vpop.f32.mrf.mxu0  ;;  %v1172_v51 = vpop.f32.mrf.mxu1 }
 0x196   :  { %v1588_v63 = vpack.c.bf16 %v1365_v48, %v1364_v53  ;;  %v1589_v0 = vpack.c.bf16 %v1367_v49, %v1366_v61  ;;  %v1368_v7 = vmul.f32 %v1336_v1, %v1119_v50  ;;  %v1370_v9 = vmul.f32 %v1338_v3, %v1172_v51 }
 0x197   :  { %v1121_v2 = vpop.f32.mrf.mxu0  ;;  %v1174_v4 = vpop.f32.mrf.mxu1 }
 0x198   :  { %1424 = vst [vmem:[%s2404_s5 + $0x20] sm:$0xff] %v1588_v63  ;;  %1425 = vst [vmem:[%s2404_s5 + $0x28] sm:$0xff] %v1589_v0  ;;  %v1369_v5 = vmul.f32 %v1337_v60, %v1121_v2  ;;  %v1371_v6 = vmul.f32 %v1339_v62, %v1174_v4 }
 0x19a   :  { %v1590_v8 = vpack.c.bf16 %v1369_v5, %v1368_v7  ;;  %v1591_v13 = vpack.c.bf16 %v1371_v6, %v1370_v9 }
 0x19c   :  { %1426 = vst [vmem:[%s2404_s5 + $0x30] sm:$0xff] %v1590_v8  ;;  %1427 = vst [vmem:[%s2404_s5 + $0x38] sm:$0xff] %v1591_v13 }

// kernel: mistral_upsampler_forward.35
= control target key start
LH: loop header
LB: loop body
LE: loop exit
PB: predicated region body
PF: predicated region fallthrough
CT: control target
= control target key end

     0   :  { %v892_v2 = vmov 0   ;;  %s1143_s0 = inlined_call_operand.vmem [shape: bf16[32,256], index: 0, kind: input, shape index: {}]   ;;  %s1144_s1 = inlined_call_operand.vmem [shape: f32[32,1], index: 1, kind: input, shape index: {}]   ;;  %s1145_s2 = inlined_call_operand.vmem [shape: bf16[1,256], index: 2, kind: input, shape index: {}]   ;;  %s1146_s3 = inlined_call_operand.vmem [shape: bf16[256,512], index: 3, kind: input, shape index: {}]   ;;  %s1147_s4 = inlined_call_operand.hbm [shape: f32[32,512], index: 4, kind: output, shape index: {}]  }
   0x1   :  { %v50_v0 = vld [vmem:[%s1144_s1] sm:$0xff]  ;;  %v52_v1 = vld [vmem:[%s1144_s1 + $0x10] sm:$0xff]  ;;  %772 = vset.pattern.permute.xlu0 %v892_v2  ;;  %773 = vset.pattern.permute.xlu1 %v892_v2  ;;  %v51_v3 = vld [vmem:[%s1144_s1 + $0x8] sm:$0xff] }
   0x2   :  { %v53_v4 = vld [vmem:[%s1144_s1 + $0x18] sm:$0xff]  ;;  %56 = vperm.xlu0 %772, %v50_v0   ;;  %66 = vperm.xlu1 %773, %v52_v1   ;;  %v774_v5 = vld [vmem:[%s1146_s3 + $0xe4] ss:$16 sps:$4 sm:$0xff]   ;;  %v778_v7 = vld [vmem:[%s1146_s3 + $0xe0] ss:$16 sps:$4 sm:$0xff]  }
   0x3   :  { %v776_v6 = vld [vmem:[%s1146_s3 + $0xec] ss:$16 sps:$4 sm:$0xff]   ;;  %v779_v8 = vld [vmem:[%s1146_s3 + $0xe8] ss:$16 sps:$4 sm:$0xff]   ;;  %515 = vmatprep.subr.bf16.mxu0 %v774_v5  ;;  %v780_v9 = vld [vmem:[%s1146_s3 + $0xc4] ss:$16 sps:$4 sm:$0xff]  }
   0x4   :  { %568 = vmatprep.subr.bf16.mxu1 %v776_v6  ;;  %516 = vmatpush1.bf16.msra.mxu0 %v778_v7  ;;  %v782_v10 = vld [vmem:[%s1146_s3 + $0xcc] ss:$16 sps:$4 sm:$0xff]   ;;  %v784_v11 = vld [vmem:[%s1146_s3 + $0xc0] ss:$16 sps:$4 sm:$0xff]   ;;  %v785_v12 = vld [vmem:[%s1146_s3 + $0xc8] ss:$16 sps:$4 sm:$0xff]  }
   0x5   :  { %569 = vmatpush1.bf16.msra.mxu1 %v779_v8  ;;  %517 = vmatprep.subr.bf16.mxu0 %v780_v9  ;;  %v786_v13 = vld [vmem:[%s1146_s3 + $0xa4] ss:$16 sps:$4 sm:$0xff]   ;;  %v788_v14 = vld [vmem:[%s1146_s3 + $0xac] ss:$16 sps:$4 sm:$0xff]   ;;  %v790_v15 = vld [vmem:[%s1146_s3 + $0xa0] ss:$16 sps:$4 sm:$0xff]  }
   0x6   :  { %61 = vperm.xlu0 %772, %v51_v3   ;;  %71 = vperm.xlu1 %773, %v53_v4   ;;  %v792_v16 = vld [vmem:[%s1146_s3 + $0x84] ss:$16 sps:$4 sm:$0xff]   ;;  %v791_v17 = vld [vmem:[%s1146_s3 + $0xa8] ss:$16 sps:$4 sm:$0xff]   ;;  %v794_v18 = vld [vmem:[%s1146_s3 + $0x8c] ss:$16 sps:$4 sm:$0xff]  }
   0x7   :  { %570 = vmatprep.subr.bf16.mxu1 %v782_v10  ;;  %v796_v19 = vld [vmem:[%s1146_s3 + $0x80] ss:$16 sps:$4 sm:$0xff]   ;;  %v798_v20 = vld [vmem:[%s1146_s3 + $0x64] ss:$16 sps:$4 sm:$0xff]   ;;  %v797_v21 = vld [vmem:[%s1146_s3 + $0x88] ss:$16 sps:$4 sm:$0xff]  }
   0x8   :  { %518 = vmatpush1.bf16.msra.mxu0 %v784_v11  ;;  %v800_v22 = vld [vmem:[%s1146_s3 + $0x6c] ss:$16 sps:$4 sm:$0xff]   ;;  %v802_v23 = vld [vmem:[%s1146_s3 + $0x60] ss:$16 sps:$4 sm:$0xff]   ;;  %v804_v24 = vld [vmem:[%s1146_s3 + $0x44] ss:$16 sps:$4 sm:$0xff]  }
   0x9   :  { %519 = vmatprep.subr.bf16.mxu0 %v786_v13  ;;  %571 = vmatpush1.bf16.msra.mxu1 %v785_v12  ;;  %v803_v25 = vld [vmem:[%s1146_s3 + $0x68] ss:$16 sps:$4 sm:$0xff]   ;;  %v806_v26 = vld [vmem:[%s1146_s3 + $0x4c] ss:$16 sps:$4 sm:$0xff]   ;;  %v808_v27 = vld [vmem:[%s1146_s3 + $0x40] ss:$16 sps:$4 sm:$0xff]  }
   0xa   :  { %572 = vmatprep.subr.bf16.mxu1 %v788_v14  ;;  %v810_v28 = vld [vmem:[%s1146_s3 + $0x24] ss:$16 sps:$4 sm:$0xff]   ;;  %v809_v29 = vld [vmem:[%s1146_s3 + $0x48] ss:$16 sps:$4 sm:$0xff]   ;;  %v812_v30 = vld [vmem:[%s1146_s3 + $0x2c] ss:$16 sps:$4 sm:$0xff]  }
   0xb   :  { %v814_v31 = vld [vmem:[%s1146_s3 + $0x20] ss:$16 sps:$4 sm:$0xff]   ;;  %v816_v32 = vld [vmem:[%s1146_s3 + $0x4] ss:$16 sps:$4 sm:$0xff]   ;;  %v815_v33 = vld [vmem:[%s1146_s3 + $0x28] ss:$16 sps:$4 sm:$0xff]  }
   0xc   :  { %520 = vmatpush1.bf16.msra.mxu0 %v790_v15  ;;  %v818_v34 = vld [vmem:[%s1146_s3 + $0xc] ss:$16 sps:$4 sm:$0xff]   ;;  %v820_v35 = vld [vmem:[%s1146_s3] ss:$16 sps:$4 sm:$0xff]   ;;  %v822_v36 = vld [vmem:[%s1146_s3 + $0x1e4] ss:$16 sps:$4 sm:$0xff]  }
   0xd   :  { %521 = vmatprep.subr.bf16.mxu0 %v792_v16  ;;  %573 = vmatpush1.bf16.msra.mxu1 %v791_v17  ;;  %v821_v37 = vld [vmem:[%s1146_s3 + $0x8] ss:$16 sps:$4 sm:$0xff]   ;;  %v824_v38 = vld [vmem:[%s1146_s3 + $0x1ec] ss:$16 sps:$4 sm:$0xff]   ;;  %v826_v39 = vld [vmem:[%s1146_s3 + $0x1e0] ss:$16 sps:$4 sm:$0xff]  }
   0xe   :  { %574 = vmatprep.subr.bf16.mxu1 %v794_v18  ;;  %v828_v40 = vld [vmem:[%s1146_s3 + $0x1c4] ss:$16 sps:$4 sm:$0xff]   ;;  %v827_v41 = vld [vmem:[%s1146_s3 + $0x1e8] ss:$16 sps:$4 sm:$0xff]   ;;  %v830_v42 = vld [vmem:[%s1146_s3 + $0x1cc] ss:$16 sps:$4 sm:$0xff]  }
   0xf   :  { %v832_v43 = vld [vmem:[%s1146_s3 + $0x1c0] ss:$16 sps:$4 sm:$0xff]   ;;  %v834_v44 = vld [vmem:[%s1146_s3 + $0x1a4] ss:$16 sps:$4 sm:$0xff]   ;;  %v833_v45 = vld [vmem:[%s1146_s3 + $0x1c8] ss:$16 sps:$4 sm:$0xff]  }
  0x10   :  { %522 = vmatpush1.bf16.msra.mxu0 %v796_v19  ;;  %v836_v46 = vld [vmem:[%s1146_s3 + $0x1ac] ss:$16 sps:$4 sm:$0xff]   ;;  %v838_v47 = vld [vmem:[%s1146_s3 + $0x1a0] ss:$16 sps:$4 sm:$0xff]   ;;  %v840_v48 = vld [vmem:[%s1146_s3 + $0x184] ss:$16 sps:$4 sm:$0xff]  }
  0x11   :  { %523 = vmatprep.subr.bf16.mxu0 %v798_v20  ;;  %575 = vmatpush1.bf16.msra.mxu1 %v797_v21  ;;  %v839_v49 = vld [vmem:[%s1146_s3 + $0x1a8] ss:$16 sps:$4 sm:$0xff]   ;;  %v842_v50 = vld [vmem:[%s1146_s3 + $0x18c] ss:$16 sps:$4 sm:$0xff]   ;;  %v844_v51 = vld [vmem:[%s1146_s3 + $0x180] ss:$16 sps:$4 sm:$0xff]  }
  0x12   :  { %576 = vmatprep.subr.bf16.mxu1 %v800_v22 }
  0x14   :  { %524 = vmatpush1.bf16.msra.mxu0 %v802_v23 }
  0x15   :  { %525 = vmatprep.subr.bf16.mxu0 %v804_v24  ;;  %577 = vmatpush1.bf16.msra.mxu1 %v803_v25 }
  0x16   :  { %578 = vmatprep.subr.bf16.mxu1 %v806_v26 }
  0x18   :  { %526 = vmatpush1.bf16.msra.mxu0 %v808_v27 }
  0x19   :  { %527 = vmatprep.subr.bf16.mxu0 %v810_v28  ;;  %579 = vmatpush1.bf16.msra.mxu1 %v809_v29 }
  0x1a   :  { %580 = vmatprep.subr.bf16.mxu1 %v812_v30 }
  0x1c   :  { %528 = vmatpush1.bf16.msra.mxu0 %v814_v31 }
  0x1d   :  { %529 = vmatprep.subr.bf16.mxu0 %v816_v32  ;;  %581 = vmatpush1.bf16.msra.mxu1 %v815_v33 }
  0x1e   :  { %582 = vmatprep.subr.bf16.mxu1 %v818_v34 }
  0x20   :  { %530 = vmatpush1.bf16.msra.mxu0 %v820_v35 }
  0x21   :  { %531 = vmatprep.subr.bf16.mxu0 %v822_v36  ;;  %583 = vmatpush1.bf16.msra.mxu1 %v821_v37 }
  0x22   :  { %584 = vmatprep.subr.bf16.mxu1 %v824_v38 }
  0x24   :  { %532 = vmatpush2.bf16.msra.mxu0 %v826_v39 }
  0x25   :  { %533 = vmatprep.subr.bf16.mxu0 %v828_v40  ;;  %585 = vmatpush2.bf16.msra.mxu1 %v827_v41 }
  0x26   :  { %586 = vmatprep.subr.bf16.mxu1 %v830_v42 }
  0x28   :  { %534 = vmatpush2.bf16.msra.mxu0 %v832_v43 }
  0x29   :  { %535 = vmatprep.subr.bf16.mxu0 %v834_v44  ;;  %587 = vmatpush2.bf16.msra.mxu1 %v833_v45 }
  0x2a   :  { %588 = vmatprep.subr.bf16.mxu1 %v836_v46 }
  0x2c   :  { %536 = vmatpush2.bf16.msra.mxu0 %v838_v47 }
  0x2d   :  { %9 = vsyncpa [#allocation4], 0  ;;  %537 = vmatprep.subr.bf16.mxu0 %v840_v48  ;;  %v846_v52 = vld [vmem:[%s1146_s3 + $0x164] ss:$16 sps:$4 sm:$0xff]   ;;  %589 = vmatpush2.bf16.msra.mxu1 %v839_v49  ;;  %v845_v53 = vld [vmem:[%s1146_s3 + $0x188] ss:$16 sps:$4 sm:$0xff]   ;;  %v85_v5 = vlaneseq }
  0x2e   :  { %590 = vmatprep.subr.bf16.mxu1 %v842_v50  ;;  %v848_v54 = vld [vmem:[%s1146_s3 + $0x16c] ss:$16 sps:$4 sm:$0xff]   ;;  %v850_v55 = vld [vmem:[%s1146_s3 + $0x160] ss:$16 sps:$4 sm:$0xff]   ;;  %v852_v56 = vld [vmem:[%s1146_s3 + $0x144] ss:$16 sps:$4 sm:$0xff]  }
  0x2f   :  { %v851_v57 = vld [vmem:[%s1146_s3 + $0x168] ss:$16 sps:$4 sm:$0xff]   ;;  %v854_v58 = vld [vmem:[%s1146_s3 + $0x14c] ss:$16 sps:$4 sm:$0xff]   ;;  %v856_v59 = vld [vmem:[%s1146_s3 + $0x140] ss:$16 sps:$4 sm:$0xff]  }
  0x30   :  { %538 = vmatpush2.bf16.msra.mxu0 %v844_v51  ;;  %v858_v60 = vld [vmem:[%s1146_s3 + $0x124] ss:$16 sps:$4 sm:$0xff]   ;;  %v857_v61 = vld [vmem:[%s1146_s3 + $0x148] ss:$16 sps:$4 sm:$0xff]   ;;  %v860_v62 = vld [vmem:[%s1146_s3 + $0x12c] ss:$16 sps:$4 sm:$0xff]  }
  0x31   :  { %539 = vmatprep.subr.bf16.mxu0 %v846_v52  ;;  %591 = vmatpush2.bf16.msra.mxu1 %v845_v53  ;;  %v862_v63 = vld [vmem:[%s1146_s3 + $0x120] ss:$16 sps:$4 sm:$0xff]   ;;  %v864_v0 = vld [vmem:[%s1146_s3 + $0x104] ss:$16 sps:$4 sm:$0xff]   ;;  %v863_v1 = vld [vmem:[%s1146_s3 + $0x128] ss:$16 sps:$4 sm:$0xff]  }
  0x32   :  { %592 = vmatprep.subr.bf16.mxu1 %v848_v54  ;;  %v866_v2 = vld [vmem:[%s1146_s3 + $0x10c] ss:$16 sps:$4 sm:$0xff]   ;;  %v868_v3 = vld [vmem:[%s1146_s3 + $0x100] ss:$16 sps:$4 sm:$0xff]   ;;  %v869_v4 = vld [vmem:[%s1146_s3 + $0x108] ss:$16 sps:$4 sm:$0xff]  }
  0x33   :  { %v86_v6 = vshrl.u32 %v85_v5, 7  ;;  %v82_v7 = vld [vmem:[%s1145_s2] sm:$0x3]  ;;  %v40_v10 = vld [vmem:[%s1143_s0 + $0x10] sm:$0xff]  ;;  %v39_v16 = vld [vmem:[%s1143_s0 + $0x8] sm:$0xff] }
  0x34   :  { %540 = vmatpush2.bf16.msra.mxu0 %v850_v55  ;;  %v83_v8 = vunpack.c.l.bf16 %v82_v7  ;;  %v38_v11 = vld [vmem:[%s1143_s0] sm:$0xff]  ;;  %v47_v13 = vunpack.c.h.bf16 %v40_v10  ;;  %v41_v17 = vld [vmem:[%s1143_s0 + $0x18] sm:$0xff]  ;;  %v44_v23 = vunpack.c.l.bf16 %v39_v16  ;;  %v45_v24 = vunpack.c.h.bf16 %v39_v16  ;;  %s893_s0 = smov [#allocation3]  }
  0x35   :  { %541 = vmatprep.subr.bf16.mxu0 %v852_v56  ;;  %593 = vmatpush2.bf16.msra.mxu1 %v851_v57  ;;  %v87_v9 = vsub.s32 0, %v86_v6  ;;  %v91_v12 = vsub.s32 2, %v86_v6  ;;  %v42_v15 = vunpack.c.l.bf16 %v38_v11  ;;  %v43_v18 = vunpack.c.h.bf16 %v38_v11  ;;  %s693_s24 = sshll.u32 %s893_s0, 4  ;;  %s694_s24 = int_to_ptr.vmem [resolvable:$true] %s693_s24 }
  0x36   :  { %594 = vmatprep.subr.bf16.mxu1 %v854_v58  ;;  %v49_v25 = vunpack.c.h.bf16 %v41_v17  ;;  %v46_v37 = vunpack.c.l.bf16 %v40_v10  ;;  %v48_v38 = vunpack.c.l.bf16 %v41_v17  ;;  %s870_s25 = scalar_lea.vmem %s694_s24, 2048  ;;  %p875_p1 = scmp.lt.s32.totalorder %s694_s24, %s694_s24 }
  0x37   :  { %v88_v14 = vrot.slane %v83_v8, %v87_v9  ;;  %v92_v19 = vrot.slane %v83_v8, %v91_v12  ;;  %p871_p0 = scmp.ne.s32.totalorder %s694_s24, %s870_s25  ;;  %p876_p2 = scmp.lt.s32.totalorder %s870_s25, %s870_s25 }
  0x38   :  { %542 = vmatpush2.bf16.msra.mxu0 %v856_v59 }
  0x39   :  { %543 = vmatprep.subr.bf16.mxu0 %v858_v60  ;;  %595 = vmatpush2.bf16.msra.mxu1 %v857_v61  ;;  %v98_v26 = vrot.slane %v88_v14, %v87_v9  ;;  %v102_v29 = vrot.slane %v92_v19, %v87_v9  ;;  %p877_p3 = por %p876_p2, %p875_p1 }
  0x3a   :  { %596 = vmatprep.subr.bf16.mxu1 %v860_v62 }
  0x3b   :  { %p878_p4 = pnand %p877_p3, %p871_p0 }
  0x3c   :  { %544 = vmatpush2.bf16.msra.mxu0 %v862_v63 }
  0x3d   :  { %545 = vmatprep.subr.bf16.mxu0 %v864_v0  ;;  %597 = vmatpush2.bf16.msra.mxu1 %v863_v1 }
  0x3e   :  { %598 = vmatprep.subr.bf16.mxu1 %v866_v2 }
  0x40   :  { %546 = vmatpush2.bf16.msra.mxu0 %v868_v3 }
  0x41   :  { %599 = vmatpush2.bf16.msra.mxu1 %v869_v4 }
  0x7d   :  { %v57_v20 = vpop.permute.xlu0 %56  ;;  %v67_v21 = vpop.permute.xlu1 %66 }
  0x7e   :  { %v79_v22 = vmul.f32 %v67_v21, %v47_v13  ;;  %v74_v27 = vmul.f32 %v57_v20, %v42_v15  ;;  %v75_v28 = vmul.f32 %v57_v20, %v43_v18  ;;  %v78_v46 = vmul.f32 %v67_v21, %v46_v37 }
  0x80   :  { %v108_v32 = vmul.f32 %v102_v29, %v79_v22  ;;  %v103_v36 = vmul.f32 %v98_v26, %v74_v27  ;;  %v104_v42 = vmul.f32 %v102_v29, %v75_v28  ;;  %v107_v48 = vmul.f32 %v98_v26, %v78_v46 }
  0x81   :  { %v62_v30 = vpop.permute.xlu0 %61  ;;  %v72_v31 = vpop.permute.xlu1 %71 }
  0x82   :  { %v76_v33 = vmul.f32 %v62_v30, %v44_v23  ;;  %v77_v34 = vmul.f32 %v62_v30, %v45_v24  ;;  %v81_v35 = vmul.f32 %v72_v31, %v49_v25  ;;  %v80_v47 = vmul.f32 %v72_v31, %v48_v38 }
  0x84   :  { %v105_v39 = vmul.f32 %v98_v26, %v76_v33  ;;  %v106_v40 = vmul.f32 %v102_v29, %v77_v34  ;;  %v110_v41 = vmul.f32 %v102_v29, %v81_v35  ;;  %v109_v49 = vmul.f32 %v98_v26, %v80_v47 }
  0x86   :  { %v112_v43 = vpack.c.bf16 %v106_v40, %v104_v42  ;;  %v111_v44 = vpack.c.bf16 %v105_v39, %v103_v36  ;;  %v114_v45 = vpack.c.bf16 %v110_v41, %v108_v32  ;;  %v113_v50 = vpack.c.bf16 %v109_v49, %v107_v48 }
  0x88   :  { %547 = vmatprep.mubr.bf16.mxu0 %v112_v43  ;;  %600 = vmatprep.mubr.bf16.mxu1 %v112_v43 }
  0x89   :  { %548 = vmatmul.mubr.bf16.vlgmr.msra.gmra.mxu0 %v111_v44  ;;  %601 = vmatmul.mubr.bf16.vlgmr.msra.gmra.mxu1 %v111_v44 }
  0x8a   :  { %557 = vmatprep.mubr.bf16.mxu0 %v114_v45  ;;  %610 = vmatprep.mubr.bf16.mxu1 %v114_v45 }
  0x91   :  { %558 = vmatmul.mubr.bf16.gmra.mxu0 %v113_v50  ;;  %611 = vmatmul.mubr.bf16.gmra.mxu1 %v113_v50 }
 0x149   :  { %v549_v51 = vpop.f32.mrf.mxu0  ;;  %v602_v52 = vpop.f32.mrf.mxu1 }
 0x14a   :  { %672 = vst [vmem:[#allocation3] sm:$0xff] %v549_v51  ;;  %674 = vst [vmem:[#allocation3 + $0x10] sm:$0xff] %v602_v52 }
 0x14b   :  { %v551_v53 = vpop.f32.mrf.mxu0  ;;  %v604_v54 = vpop.f32.mrf.mxu1 }
 0x14c   :  { %673 = vst [vmem:[#allocation3 + $0x8] sm:$0xff] %v551_v53  ;;  %675 = vst [vmem:[#allocation3 + $0x18] sm:$0xff] %v604_v54 }
 0x14d   :  { %v553_v55 = vpop.f32.mrf.mxu0  ;;  %v606_v56 = vpop.f32.mrf.mxu1 }
 0x14e   :  { %676 = vst [vmem:[#allocation3 + $0x20] sm:$0xff] %v553_v55  ;;  %678 = vst [vmem:[#allocation3 + $0x30] sm:$0xff] %v606_v56 }
 0x14f   :  { %v555_v57 = vpop.f32.mrf.mxu0  ;;  %v608_v58 = vpop.f32.mrf.mxu1 }
 0x150   :  { %677 = vst [vmem:[#allocation3 + $0x28] sm:$0xff] %v555_v57  ;;  %679 = vst [vmem:[#allocation3 + $0x38] sm:$0xff] %v608_v58 }
 0x151   :  { %v559_v59 = vpop.f32.mrf.mxu0  ;;  %v612_v60 = vpop.f32.mrf.mxu1 }
 0x152   :  { %680 = vst [vmem:[#allocation3 + $0x40] sm:$0xff] %v559_v59  ;;  %682 = vst [vmem:[#allocation3 + $0x50] sm:$0xff] %v612_v60 }
 0x153   :  { %v561_v61 = vpop.f32.mrf.mxu0  ;;  %v614_v62 = vpop.f32.mrf.mxu1 }
 0x154   :  { %681 = vst [vmem:[#allocation3 + $0x48] sm:$0xff] %v561_v61  ;;  %683 = vst [vmem:[#allocation3 + $0x58] sm:$0xff] %v614_v62 }
 0x155   :  { %v563_v63 = vpop.f32.mrf.mxu0  ;;  %v616_v0 = vpop.f32.mrf.mxu1 }
 0x156   :  { %684 = vst [vmem:[#allocation3 + $0x60] sm:$0xff] %v563_v63  ;;  %686 = vst [vmem:[#allocation3 + $0x70] sm:$0xff] %v616_v0 }
 0x157   :  { %v565_v1 = vpop.f32.mrf.mxu0  ;;  %v618_v2 = vpop.f32.mrf.mxu1 }
 0x158   :  { %685 = vst [vmem:[#allocation3 + $0x68] sm:$0xff] %v565_v1  ;;  %687 = vst [vmem:[#allocation3 + $0x78] sm:$0xff] %v618_v2 }
 0x159   :  { %881 = shalt.err (!%p878_p4)
}
 0x15a   :  { %s894_s26 = smov 512   ;;  %s895_s27 = smov 32  }
 0x15b   :  { %699 = dma.vmem_to_hbm [thread:$0]  %s694_s24, 2048, %s1147_s4, [#allocation4], %s894_s26, %s894_s26, %s895_s27  }
 0x15c   :  { %890 = dma.done.wait [#allocation4], 2048  }
 0x15d   :  { %891 = vsyncadd [#allocation4], 4294965248 }
 0x15e   :  { %703 = vsyncpa [#allocation4], 1 }

</bundles_post_ra>
